<compile_context>
chip_gen: v7x
topology: tpu7x:2x2x1
jax: 0.10.0
libtpu: 0.0.40
codegen_flags: <defaults>
</compile_context>

<pallas_src>
import functools

import jax
import jax.numpy as jnp
import numpy as np
from jax import lax
from jax.experimental import pallas as pl
from jax.experimental.pallas import tpu as pltpu


def _round_up(x, m):
  return ((x + m - 1) // m) * m


def _vmem_limit_bytes():
  """Per-generation scoped-VMEM budget (leave ~16 MiB headroom, cap 100 MiB)."""
  cap = 64 * 1024 * 1024            # conservative fallback (v7x-sized)
  try:
    cap = int(pltpu.get_tpu_info().vmem_capacity_bytes)
  except Exception:                 # query unavailable -> keep fallback
    pass
  return int(min(max(cap - 16 * 1024 * 1024, 32 * 1024 * 1024),
                 100 * 1024 * 1024))


# ---------------------------------------------------------------------------
# Pallas kernel
# ---------------------------------------------------------------------------
def _make_fused_conv_kernel(tap_offsets, TL, HALO, C_src, residual_mode,
                            use_mask):
  """3x3x3 conv (one large-K matmul) + bias (+ residual) + ReLU (+ mask).

  residual_mode: None | "identity" | "downsample"
  """

  def kernel(*refs):
    it = iter(refs)
    xl_ref = next(it)
    xc_ref = next(it)
    xr_ref = next(it)
    res_ref = next(it) if residual_mode is not None else None
    w_ref = next(it)
    b_ref = next(it)
    if residual_mode == "downsample":
      wds_ref = next(it)
      bds_ref = next(it)
    m_ref = next(it) if use_mask else None
    o_ref = next(it)
    win_ref = next(it)
    col_ref = next(it)

    # Halo window (C, TL + 2*HALO) assembled in VMEM scratch from one narrow
    # strip of each neighbour tile plus the centre tile (no concatenates).
    win_ref[:, :HALO] = xl_ref[...]
    win_ref[:, HALO:HALO + TL] = xc_ref[...]
    win_ref[:, HALO + TL:] = xr_ref[...]

    # im2col slab (27*C, TL): one statically lane-shifted view per conv tap,
    # written straight into a persistent VMEM scratch.
    for t, off in enumerate(tap_offsets):
      col_ref[t * C_src:(t + 1) * C_src, :] = (
          win_ref[:, HALO + off:HALO + off + TL])

    # Single large-K MXU matmul, bf16 operands, f32 accumulation.  The folded
    # BN scale already lives in the weight rows, so only the bias remains.
    y = jnp.dot(w_ref[...], col_ref[...], preferred_element_type=jnp.float32)
    y = y + b_ref[...]

    if residual_mode == "identity":
      y = y + res_ref[...].astype(jnp.float32)
    elif residual_mode == "downsample":
      y = y + jnp.dot(wds_ref[...], res_ref[...],
                      preferred_element_type=jnp.float32) + bds_ref[...]

    y = jnp.maximum(y, 0.0)
    if use_mask:
      # Re-zero the padding ring / tail so this output can feed the next
      # layer's halo reads directly (layer 1 only).
      y = y * m_ref[...]
    o_ref[...] = y.astype(o_ref.dtype)

  return kernel


# ---------------------------------------------------------------------------
# pallas_call wrapper for one fused conv layer
# ---------------------------------------------------------------------------
def _fused_conv_layer(src_buf, w_mat, bias, *, TL, HALO, tap_offsets,
                      out_dtype, mask=None, res_buf=None, ds=None):
  """src_buf: (N, C_src, Xlen) flat padded volume; returns same layout."""
  N, C_src, Xlen = src_buf.shape
  Cout_p, Kdim = w_mat.shape
  assert Kdim == 27 * C_src
  nT = Xlen // TL                  # total lane tiles (incl. 2 margin tiles)
  nTi = nT - 2                     # interior tiles actually computed
  k = TL // HALO                   # halo strips per lane tile

  if res_buf is None:
    residual_mode = None
  elif ds is None:
    residual_mode = "identity"
  else:
    residual_mode = "downsample"
  use_mask = mask is not None

  kernel = _make_fused_conv_kernel(tuple(tap_offsets), TL, HALO, C_src,
                                   residual_mode, use_mask)

  in_specs = [
      # narrow halo strips (HALO lanes) of the neighbour tiles + centre tile
      pl.BlockSpec((None, C_src, HALO), lambda n, j: (n, 0, (j + 1) * k - 1)),
      pl.BlockSpec((None, C_src, TL), lambda n, j: (n, 0, j + 1)),
      pl.BlockSpec((None, C_src, HALO), lambda n, j: (n, 0, (j + 2) * k)),
  ]
  args = [src_buf, src_buf, src_buf]

  if res_buf is not None:
    C_res = res_buf.shape[1]
    in_specs.append(pl.BlockSpec((None, C_res, TL),
                                 lambda n, j: (n, 0, j + 1)))
    args.append(res_buf)

  in_specs += [
      pl.BlockSpec((Cout_p, Kdim), lambda n, j: (0, 0)),
      pl.BlockSpec((Cout_p, 1), lambda n, j: (0, 0)),
  ]
  args += [w_mat, bias]

  if ds is not None:
    wds, bds = ds
    C_res = res_buf.shape[1]
    in_specs += [
        pl.BlockSpec((Cout_p, C_res), lambda n, j: (0, 0)),
        pl.BlockSpec((Cout_p, 1), lambda n, j: (0, 0)),
    ]
    args += [wds, bds]

  if use_mask:
    in_specs.append(pl.BlockSpec((1, TL), lambda n, j: (0, j + 1)))
    args.append(mask)

  isz = np.dtype(src_buf.dtype).itemsize
  osz = np.dtype(out_dtype).itemsize
  res_ch = res_buf.shape[1] if res_buf is not None else 0
  flops = 2 * N * nTi * TL * Cout_p * (Kdim + (res_ch if ds is not None else 0))
  bytes_accessed = int(
      isz * N * nTi * ((TL + 2 * HALO) * C_src + TL * res_ch)
      + osz * N * nTi * TL * Cout_p
      + isz * Cout_p * (Kdim + res_ch) + 4 * Cout_p * 2
      + (4 * nTi * TL if use_mask else 0))
  cost = pl.CostEstimate(flops=flops, transcendentals=0,
                         bytes_accessed=bytes_accessed)

  return pl.pallas_call(
      kernel,
      out_shape=jax.ShapeDtypeStruct((N, Cout_p, Xlen), out_dtype),
      grid=(N, nTi),
      in_specs=in_specs,
      out_specs=pl.BlockSpec((None, Cout_p, TL), lambda n, j: (n, 0, j + 1)),
      scratch_shapes=[
          pltpu.VMEM((C_src, TL + 2 * HALO), src_buf.dtype),   # halo window
          pltpu.VMEM((27 * C_src, TL), src_buf.dtype),          # im2col slab
      ],
      compiler_params=pltpu.CompilerParams(
          dimension_semantics=("parallel", "parallel"),
          vmem_limit_bytes=_vmem_limit_bytes()),
      cost_estimate=cost,
  )(*args)


# ---------------------------------------------------------------------------
# Parameter setup / glue
# ---------------------------------------------------------------------------
_EPS = 1e-5


def _fold_bn(bn, eps=_EPS):
  scale = bn["gamma"] / jnp.sqrt(bn["var"] + eps)
  bias = bn["beta"] - bn["mean"] * scale
  return scale, bias


def init_params(key, inplanes, planes):
  ks = jax.random.split(key, 6)

  def uconv(k, cout, cin, ksize):
    fan_in = cin * ksize ** 3
    bound = 1.0 / np.sqrt(fan_in)
    return jax.random.uniform(k, (cout, cin, ksize, ksize, ksize),
                              jnp.float32, -bound, bound)

  def bn(k, c):
    k1, k2, k3, k4 = jax.random.split(k, 4)
    return dict(
        gamma=1.0 + 0.1 * jax.random.normal(k1, (c,), jnp.float32),
        beta=0.1 * jax.random.normal(k2, (c,), jnp.float32),
        mean=0.05 * jax.random.normal(k3, (c,), jnp.float32),
        var=1.0 + 0.1 * jax.random.uniform(k4, (c,), jnp.float32),
    )

  params = dict(
      conv1_w=uconv(ks[0], planes, inplanes, 3),
      bn1=bn(ks[1], planes),
      conv2_w=uconv(ks[2], planes, planes, 3),
      bn2=bn(ks[3], planes),
  )
  if inplanes != planes:  # stride fixed at 1 -> downsample iff channel change
    params["ds_w"] = uconv(ks[4], planes, inplanes, 1)
    params["bn_ds"] = bn(ks[5], planes)
  return params


@functools.partial(jax.jit, static_argnums=(2, 3, 4))
def basic_block_3d_forward(params, x, inplanes, planes,
                           compute_dtype=jnp.bfloat16):
  """Pallas implementation of BasicBlock3D.forward (stride=1, eval-mode BN).

  compute_dtype=jnp.bfloat16 (default) uses the MXU-native bf16 path with f32
  accumulation; pass jnp.float32 for tighter-parity verification runs.
  """
  N, C, D, H, W = x.shape
  assert C == inplanes
  Dp, Hp, Wp = D + 2, H + 2, W + 2
  Q = Dp * Hp * Wp                       # flat padded-volume length
  center = Hp * Wp + Wp + 1              # max |tap offset| from the centre
  HALO = _round_up(center, 128)          # lane-aligned halo strip width
  # Lane tile ~1k lanes (amortises per-step overhead), multiple of HALO so the
  # narrow halo strips stay block-aligned; shrunk for tiny volumes.
  TL = _round_up(min(1024, _round_up(Q, 128)), HALO)
  Xlen = _round_up(Q, TL) + 2 * TL       # one zero margin tile on each side
  Cin_p = _round_up(inplanes, 16)        # bf16 sublane packing -> pad to 16
  Cout_p = _round_up(planes, 16)

  # static tap offsets relative to an output position's own flat index
  tap_offsets = [(kd - 1) * Hp * Wp + (kh - 1) * Wp + (kw - 1)
                 for kd in range(3) for kh in range(3) for kw in range(3)]

  # ---- flat padded-volume activation buffer (N, Cin_p, Xlen), bf16 ----
  xp = jnp.pad(x.astype(compute_dtype),
               ((0, 0), (0, Cin_p - inplanes), (1, 1), (1, 1), (1, 1)))
  xbuf = jnp.pad(xp.reshape(N, Cin_p, Q),
                 ((0, 0), (0, 0), (TL, Xlen - TL - Q)))

  # ---- validity mask over the flat buffer (interior positions only) ----
  u = jnp.arange(Xlen, dtype=jnp.int32)
  r = u - TL
  dp = r // (Hp * Wp)
  rem = r - dp * (Hp * Wp)
  hp = rem // Wp
  wp = rem - hp * Wp
  valid = ((r >= 0) & (r < Q) & (dp >= 1) & (dp <= D)
           & (hp >= 1) & (hp <= H) & (wp >= 1) & (wp <= W))
  mask = valid.astype(jnp.float32).reshape(1, Xlen)

  # ---- weights: fold BN scale into rows, pad channels, cast to bf16 ----
  def conv3_to_mat(w, scale, cin, cin_p, cout, cout_p):
    w = w * scale[:, None, None, None, None]           # BN scale folded in
    w_t = jnp.transpose(w, (0, 2, 3, 4, 1))            # (O,3,3,3,I)
    w_t = jnp.pad(w_t, ((0, cout_p - cout), (0, 0), (0, 0), (0, 0),
                        (0, cin_p - cin)))
    return w_t.reshape(cout_p, 27 * cin_p).astype(compute_dtype)

  def pad_vec(v, cp):
    return jnp.pad(v, (0, cp - v.shape[0])).reshape(cp, 1).astype(jnp.float32)

  s1, b1 = _fold_bn(params["bn1"])
  w1 = conv3_to_mat(params["conv1_w"], s1, inplanes, Cin_p, planes, Cout_p)

  # conv1 -> bn1 -> relu (flat padded-volume layout, bf16; mask re-zeroes the
  # padding ring / tail so conv2's halo reads are correct)
  h1buf = _fused_conv_layer(xbuf, w1, pad_vec(b1, Cout_p), TL=TL, HALO=HALO,
                            tap_offsets=tap_offsets, out_dtype=compute_dtype,
                            mask=mask)

  # conv2 -> bn2 -> +identity (fused 1x1x1 downsample if needed) -> relu.
  # No mask here: layer-2's padding-ring lanes are discarded by the final
  # host-side slice, so masking them would be pure overhead.
  s2, b2 = _fold_bn(params["bn2"])
  w2 = conv3_to_mat(params["conv2_w"], s2, planes, Cout_p, planes, Cout_p)
  if "ds_w" in params:
    sds, bds = _fold_bn(params["bn_ds"])
    wds = params["ds_w"].reshape(planes, inplanes) * sds[:, None]
    wds = jnp.pad(wds, ((0, Cout_p - planes), (0, Cin_p - inplanes)))
    ds = (wds.astype(compute_dtype), pad_vec(bds, Cout_p))
  else:
    ds = None
  out_buf = _fused_conv_layer(h1buf, w2, pad_vec(b2, Cout_p), TL=TL, HALO=HALO,
                              tap_offsets=tap_offsets, out_dtype=jnp.float32,
                              res_buf=xbuf, ds=ds)

  # extract the dense NCDHW result (margins / padding ring discarded here)
  out = out_buf[:, :planes, TL:TL + Q].reshape(N, planes, Dp, Hp, Wp)
  return out[:, :, 1:1 + D, 1:1 + H, 1:1 + W]


# ---------------------------------------------------------------------------
# Pure-JAX reference (for verification)
# ---------------------------------------------------------------------------
def reference_forward(params, x, eps=_EPS):
  def conv(x, w, pad):
    return lax.conv_general_dilated(
        x, w, (1, 1, 1), [(pad, pad)] * 3,
        dimension_numbers=("NCDHW", "OIDHW", "NCDHW"))

  def bn(x, p):
    sh = (1, -1, 1, 1, 1)
    return ((x - p["mean"].reshape(sh)) / jnp.sqrt(p["var"].reshape(sh) + eps)
            * p["gamma"].reshape(sh) + p["beta"].reshape(sh))

  out = jax.nn.relu(bn(conv(x, params["conv1_w"], 1), params["bn1"]))
  out = bn(conv(out, params["conv2_w"], 1), params["bn2"])
  if "ds_w" in params:
    identity = bn(conv(x, params["ds_w"], 0), params["bn_ds"])
  else:
    identity = x
  return jax.nn.relu(out + identity)


# ---------------------------------------------------------------------------
if __name__ == "__main__":
  key = jax.random.PRNGKey(0)
  kx, kp, kx2, kp2 = jax.random.split(key, 4)

  # bf16 compute path -> compare against the f32 reference at bf16-level
  # tolerance (explicitly accepted per the perf review).
  RTOL = ATOL = 3e-2

  # case 1: channel change -> fused 1x1x1 downsample residual path
  N, inplanes, planes, D, H, W = 2, 4, 8, 8, 16, 16
  x = jax.random.normal(kx, (N, inplanes, D, H, W), jnp.float32)
  params = init_params(kp, inplanes, planes)
  out = jax.block_until_ready(
      basic_block_3d_forward(params, x, inplanes, planes))
  ref = reference_forward(params, x)
  assert out.shape == ref.shape == (N, planes, D, H, W)
  np.testing.assert_allclose(np.asarray(out), np.asarray(ref),
                             rtol=RTOL, atol=ATOL)

  # case 2: identity residual path (inplanes == planes), odd spatial sizes
  N2, c2, D2, H2, W2 = 1, 8, 6, 10, 12
  x2 = jax.random.normal(kx2, (N2, c2, D2, H2, W2), jnp.float32)
  params2 = init_params(kp2, c2, c2)
  out2 = jax.block_until_ready(basic_block_3d_forward(params2, x2, c2, c2))
  ref2 = reference_forward(params2, x2)
  np.testing.assert_allclose(np.asarray(out2), np.asarray(ref2),
                             rtol=RTOL, atol=ATOL)

  print("KERNEL_OK")
</pallas_src>

<mosaic_0001>
module attributes {stable_mosaic.version = 11 : i64} {
  func.func @kernel(%arg0: i32, %arg1: i32, %arg2: memref<1x16x384xbf16, #tpu.memory_space<vmem>>, %arg3: memref<1x16x1152xbf16, #tpu.memory_space<vmem>>, %arg4: memref<1x16x384xbf16, #tpu.memory_space<vmem>>, %arg5: memref<16x432xbf16, #tpu.memory_space<vmem>>, %arg6: memref<16x1xf32, #tpu.memory_space<vmem>>, %arg7: memref<1x1152xf32, #tpu.memory_space<vmem>>, %arg8: memref<1x16x1152xbf16, #tpu.memory_space<vmem>>, %arg9: memref<16x1920xbf16, #tpu.memory_space<vmem>>, %arg10: memref<432x1152xbf16, #tpu.memory_space<vmem>>) attributes {dimension_semantics = [#tpu.dimension_semantics<parallel>, #tpu.dimension_semantics<parallel>], iteration_bounds = array<i64: 2, 3>, scalar_prefetch = 0 : i64, scratch_operands = 2 : i64, tpu.core_type = #tpu.core_type<tc>, window_params = [{transform_indices = @transform_0, window_bounds = array<i64: 1, 16, 384>}, {transform_indices = @transform_1, window_bounds = array<i64: 1, 16, 1152>}, {transform_indices = @transform_2, window_bounds = array<i64: 1, 16, 384>}, {pipeline_mode = #tpu.pipeline_mode<synchronous>, transform_indices = @transform_3, window_bounds = array<i64: 16, 432>}, {pipeline_mode = #tpu.pipeline_mode<synchronous>, transform_indices = @transform_4, window_bounds = array<i64: 16, 1>}, {transform_indices = @transform_5, window_bounds = array<i64: 1, 1152>}, {transform_indices = @transform_6, window_bounds = array<i64: 1, 16, 1152>}]} {
    %c0 = arith.constant 0 : index
    %c0_0 = arith.constant 0 : index
    %c0_1 = arith.constant 0 : index
    %0 = vector.load %arg2[%c0, %c0_0, %c0_1] : memref<1x16x384xbf16, #tpu.memory_space<vmem>>, vector<1x16x384xbf16>
    %1 = vector.shape_cast %0 : vector<1x16x384xbf16> to vector<16x384xbf16>
    %c0_2 = arith.constant 0 : index
    %c0_3 = arith.constant 0 : index
    %2 = vector.load %arg9[%c0_2, %c0_3] : memref<16x1920xbf16, #tpu.memory_space<vmem>>, vector<16x384xbf16>
    tpu.vector_store %arg9[%c0_2, %c0_3], %1 {strides = array<i32>} : memref<16x1920xbf16, #tpu.memory_space<vmem>>, vector<16x384xbf16>,
    %c0_4 = arith.constant 0 : index
    %c0_5 = arith.constant 0 : index
    %c0_6 = arith.constant 0 : index
    %3 = vector.load %arg3[%c0_4, %c0_5, %c0_6] : memref<1x16x1152xbf16, #tpu.memory_space<vmem>>, vector<1x16x1152xbf16>
    %4 = vector.shape_cast %3 : vector<1x16x1152xbf16> to vector<16x1152xbf16>
    %c0_7 = arith.constant 0 : index
    %c384 = arith.constant 384 : index
    %5 = vector.load %arg9[%c0_7, %c384] : memref<16x1920xbf16, #tpu.memory_space<vmem>>, vector<16x1152xbf16>
    tpu.vector_store %arg9[%c0_7, %c384], %4 {strides = array<i32>} : memref<16x1920xbf16, #tpu.memory_space<vmem>>, vector<16x1152xbf16>,
    %c0_8 = arith.constant 0 : index
    %c0_9 = arith.constant 0 : index
    %c0_10 = arith.constant 0 : index
    %6 = vector.load %arg4[%c0_8, %c0_9, %c0_10] : memref<1x16x384xbf16, #tpu.memory_space<vmem>>, vector<1x16x384xbf16>
    %7 = vector.shape_cast %6 : vector<1x16x384xbf16> to vector<16x384xbf16>
    %c0_11 = arith.constant 0 : index
    %c1536 = arith.constant 1536 : index
    %8 = vector.load %arg9[%c0_11, %c1536] : memref<16x1920xbf16, #tpu.memory_space<vmem>>, vector<16x384xbf16>
    tpu.vector_store %arg9[%c0_11, %c1536], %7 {strides = array<i32>} : memref<16x1920xbf16, #tpu.memory_space<vmem>>, vector<16x384xbf16>,
    %c0_12 = arith.constant 0 : index
    %c41 = arith.constant 41 : index
    %9 = vector.load %arg9[%c0_12, %c41] : memref<16x1920xbf16, #tpu.memory_space<vmem>>, vector<16x1152xbf16>
    %c0_13 = arith.constant 0 : index
    %c0_14 = arith.constant 0 : index
    %10 = vector.load %arg10[%c0_13, %c0_14] : memref<432x1152xbf16, #tpu.memory_space<vmem>>, vector<16x1152xbf16>
    tpu.vector_store %arg10[%c0_13, %c0_14], %9 {strides = array<i32>} : memref<432x1152xbf16, #tpu.memory_space<vmem>>, vector<16x1152xbf16>,
    %c0_15 = arith.constant 0 : index
    %c42 = arith.constant 42 : index
    %11 = vector.load %arg9[%c0_15, %c42] : memref<16x1920xbf16, #tpu.memory_space<vmem>>, vector<16x1152xbf16>
    %c16 = arith.constant 16 : index
    %c0_16 = arith.constant 0 : index
    %12 = vector.load %arg10[%c16, %c0_16] : memref<432x1152xbf16, #tpu.memory_space<vmem>>, vector<16x1152xbf16>
    tpu.vector_store %arg10[%c16, %c0_16], %11 {strides = array<i32>} : memref<432x1152xbf16, #tpu.memory_space<vmem>>, vector<16x1152xbf16>,
    %c0_17 = arith.constant 0 : index
    %c43 = arith.constant 43 : index
    %13 = vector.load %arg9[%c0_17, %c43] : memref<16x1920xbf16, #tpu.memory_space<vmem>>, vector<16x1152xbf16>
    %c32 = arith.constant 32 : index
    %c0_18 = arith.constant 0 : index
    %14 = vector.load %arg10[%c32, %c0_18] : memref<432x1152xbf16, #tpu.memory_space<vmem>>, vector<16x1152xbf16>
    tpu.vector_store %arg10[%c32, %c0_18], %13 {strides = array<i32>} : memref<432x1152xbf16, #tpu.memory_space<vmem>>, vector<16x1152xbf16>,
    %c0_19 = arith.constant 0 : index
    %c59 = arith.constant 59 : index
    %15 = vector.load %arg9[%c0_19, %c59] : memref<16x1920xbf16, #tpu.memory_space<vmem>>, vector<16x1152xbf16>
    %c48 = arith.constant 48 : index
    %c0_20 = arith.constant 0 : index
    %16 = vector.load %arg10[%c48, %c0_20] : memref<432x1152xbf16, #tpu.memory_space<vmem>>, vector<16x1152xbf16>
    tpu.vector_store %arg10[%c48, %c0_20], %15 {strides = array<i32>} : memref<432x1152xbf16, #tpu.memory_space<vmem>>, vector<16x1152xbf16>,
    %c0_21 = arith.constant 0 : index
    %c60 = arith.constant 60 : index
    %17 = vector.load %arg9[%c0_21, %c60] : memref<16x1920xbf16, #tpu.memory_space<vmem>>, vector<16x1152xbf16>
    %c64 = arith.constant 64 : index
    %c0_22 = arith.constant 0 : index
    %18 = vector.load %arg10[%c64, %c0_22] : memref<432x1152xbf16, #tpu.memory_space<vmem>>, vector<16x1152xbf16>
    tpu.vector_store %arg10[%c64, %c0_22], %17 {strides = array<i32>} : memref<432x1152xbf16, #tpu.memory_space<vmem>>, vector<16x1152xbf16>,
    %c0_23 = arith.constant 0 : index
    %c61 = arith.constant 61 : index
    %19 = vector.load %arg9[%c0_23, %c61] : memref<16x1920xbf16, #tpu.memory_space<vmem>>, vector<16x1152xbf16>
    %c80 = arith.constant 80 : index
    %c0_24 = arith.constant 0 : index
    %20 = vector.load %arg10[%c80, %c0_24] : memref<432x1152xbf16, #tpu.memory_space<vmem>>, vector<16x1152xbf16>
    tpu.vector_store %arg10[%c80, %c0_24], %19 {strides = array<i32>} : memref<432x1152xbf16, #tpu.memory_space<vmem>>, vector<16x1152xbf16>,
    %c0_25 = arith.constant 0 : index
    %c77 = arith.constant 77 : index
    %21 = vector.load %arg9[%c0_25, %c77] : memref<16x1920xbf16, #tpu.memory_space<vmem>>, vector<16x1152xbf16>
    %c96 = arith.constant 96 : index
    %c0_26 = arith.constant 0 : index
    %22 = vector.load %arg10[%c96, %c0_26] : memref<432x1152xbf16, #tpu.memory_space<vmem>>, vector<16x1152xbf16>
    tpu.vector_store %arg10[%c96, %c0_26], %21 {strides = array<i32>} : memref<432x1152xbf16, #tpu.memory_space<vmem>>, vector<16x1152xbf16>,
    %c0_27 = arith.constant 0 : index
    %c78 = arith.constant 78 : index
    %23 = vector.load %arg9[%c0_27, %c78] : memref<16x1920xbf16, #tpu.memory_space<vmem>>, vector<16x1152xbf16>
    %c112 = arith.constant 112 : index
    %c0_28 = arith.constant 0 : index
    %24 = vector.load %arg10[%c112, %c0_28] : memref<432x1152xbf16, #tpu.memory_space<vmem>>, vector<16x1152xbf16>
    tpu.vector_store %arg10[%c112, %c0_28], %23 {strides = array<i32>} : memref<432x1152xbf16, #tpu.memory_space<vmem>>, vector<16x1152xbf16>,
    %c0_29 = arith.constant 0 : index
    %c79 = arith.constant 79 : index
    %25 = vector.load %arg9[%c0_29, %c79] : memref<16x1920xbf16, #tpu.memory_space<vmem>>, vector<16x1152xbf16>
    %c128 = arith.constant 128 : index
    %c0_30 = arith.constant 0 : index
    %26 = vector.load %arg10[%c128, %c0_30] : memref<432x1152xbf16, #tpu.memory_space<vmem>>, vector<16x1152xbf16>
    tpu.vector_store %arg10[%c128, %c0_30], %25 {strides = array<i32>} : memref<432x1152xbf16, #tpu.memory_space<vmem>>, vector<16x1152xbf16>,
    %c0_31 = arith.constant 0 : index
    %c365 = arith.constant 365 : index
    %27 = vector.load %arg9[%c0_31, %c365] : memref<16x1920xbf16, #tpu.memory_space<vmem>>, vector<16x1152xbf16>
    %c144 = arith.constant 144 : index
    %c0_32 = arith.constant 0 : index
    %28 = vector.load %arg10[%c144, %c0_32] : memref<432x1152xbf16, #tpu.memory_space<vmem>>, vector<16x1152xbf16>
    tpu.vector_store %arg10[%c144, %c0_32], %27 {strides = array<i32>} : memref<432x1152xbf16, #tpu.memory_space<vmem>>, vector<16x1152xbf16>,
    %c0_33 = arith.constant 0 : index
    %c366 = arith.constant 366 : index
    %29 = vector.load %arg9[%c0_33, %c366] : memref<16x1920xbf16, #tpu.memory_space<vmem>>, vector<16x1152xbf16>
    %c160 = arith.constant 160 : index
    %c0_34 = arith.constant 0 : index
    %30 = vector.load %arg10[%c160, %c0_34] : memref<432x1152xbf16, #tpu.memory_space<vmem>>, vector<16x1152xbf16>
    tpu.vector_store %arg10[%c160, %c0_34], %29 {strides = array<i32>} : memref<432x1152xbf16, #tpu.memory_space<vmem>>, vector<16x1152xbf16>,
    %c0_35 = arith.constant 0 : index
    %c367 = arith.constant 367 : index
    %31 = vector.load %arg9[%c0_35, %c367] : memref<16x1920xbf16, #tpu.memory_space<vmem>>, vector<16x1152xbf16>
    %c176 = arith.constant 176 : index
    %c0_36 = arith.constant 0 : index
    %32 = vector.load %arg10[%c176, %c0_36] : memref<432x1152xbf16, #tpu.memory_space<vmem>>, vector<16x1152xbf16>
    tpu.vector_store %arg10[%c176, %c0_36], %31 {strides = array<i32>} : memref<432x1152xbf16, #tpu.memory_space<vmem>>, vector<16x1152xbf16>,
    %c0_37 = arith.constant 0 : index
    %c383 = arith.constant 383 : index
    %33 = vector.load %arg9[%c0_37, %c383] : memref<16x1920xbf16, #tpu.memory_space<vmem>>, vector<16x1152xbf16>
    %c192 = arith.constant 192 : index
    %c0_38 = arith.constant 0 : index
    %34 = vector.load %arg10[%c192, %c0_38] : memref<432x1152xbf16, #tpu.memory_space<vmem>>, vector<16x1152xbf16>
    tpu.vector_store %arg10[%c192, %c0_38], %33 {strides = array<i32>} : memref<432x1152xbf16, #tpu.memory_space<vmem>>, vector<16x1152xbf16>,
    %c0_39 = arith.constant 0 : index
    %c384_40 = arith.constant 384 : index
    %35 = vector.load %arg9[%c0_39, %c384_40] : memref<16x1920xbf16, #tpu.memory_space<vmem>>, vector<16x1152xbf16>
    %c208 = arith.constant 208 : index
    %c0_41 = arith.constant 0 : index
    %36 = vector.load %arg10[%c208, %c0_41] : memref<432x1152xbf16, #tpu.memory_space<vmem>>, vector<16x1152xbf16>
    tpu.vector_store %arg10[%c208, %c0_41], %35 {strides = array<i32>} : memref<432x1152xbf16, #tpu.memory_space<vmem>>, vector<16x1152xbf16>,
    %c0_42 = arith.constant 0 : index
    %c385 = arith.constant 385 : index
    %37 = vector.load %arg9[%c0_42, %c385] : memref<16x1920xbf16, #tpu.memory_space<vmem>>, vector<16x1152xbf16>
    %c224 = arith.constant 224 : index
    %c0_43 = arith.constant 0 : index
    %38 = vector.load %arg10[%c224, %c0_43] : memref<432x1152xbf16, #tpu.memory_space<vmem>>, vector<16x1152xbf16>
    tpu.vector_store %arg10[%c224, %c0_43], %37 {strides = array<i32>} : memref<432x1152xbf16, #tpu.memory_space<vmem>>, vector<16x1152xbf16>,
    %c0_44 = arith.constant 0 : index
    %c401 = arith.constant 401 : index
    %39 = vector.load %arg9[%c0_44, %c401] : memref<16x1920xbf16, #tpu.memory_space<vmem>>, vector<16x1152xbf16>
    %c240 = arith.constant 240 : index
    %c0_45 = arith.constant 0 : index
    %40 = vector.load %arg10[%c240, %c0_45] : memref<432x1152xbf16, #tpu.memory_space<vmem>>, vector<16x1152xbf16>
    tpu.vector_store %arg10[%c240, %c0_45], %39 {strides = array<i32>} : memref<432x1152xbf16, #tpu.memory_space<vmem>>, vector<16x1152xbf16>,
    %c0_46 = arith.constant 0 : index
    %c402 = arith.constant 402 : index
    %41 = vector.load %arg9[%c0_46, %c402] : memref<16x1920xbf16, #tpu.memory_space<vmem>>, vector<16x1152xbf16>
    %c256 = arith.constant 256 : index
    %c0_47 = arith.constant 0 : index
    %42 = vector.load %arg10[%c256, %c0_47] : memref<432x1152xbf16, #tpu.memory_space<vmem>>, vector<16x1152xbf16>
    tpu.vector_store %arg10[%c256, %c0_47], %41 {strides = array<i32>} : memref<432x1152xbf16, #tpu.memory_space<vmem>>, vector<16x1152xbf16>,
    %c0_48 = arith.constant 0 : index
    %c403 = arith.constant 403 : index
    %43 = vector.load %arg9[%c0_48, %c403] : memref<16x1920xbf16, #tpu.memory_space<vmem>>, vector<16x1152xbf16>
    %c272 = arith.constant 272 : index
    %c0_49 = arith.constant 0 : index
    %44 = vector.load %arg10[%c272, %c0_49] : memref<432x1152xbf16, #tpu.memory_space<vmem>>, vector<16x1152xbf16>
    tpu.vector_store %arg10[%c272, %c0_49], %43 {strides = array<i32>} : memref<432x1152xbf16, #tpu.memory_space<vmem>>, vector<16x1152xbf16>,
    %c0_50 = arith.constant 0 : index
    %c689 = arith.constant 689 : index
    %45 = vector.load %arg9[%c0_50, %c689] : memref<16x1920xbf16, #tpu.memory_space<vmem>>, vector<16x1152xbf16>
    %c288 = arith.constant 288 : index
    %c0_51 = arith.constant 0 : index
    %46 = vector.load %arg10[%c288, %c0_51] : memref<432x1152xbf16, #tpu.memory_space<vmem>>, vector<16x1152xbf16>
    tpu.vector_store %arg10[%c288, %c0_51], %45 {strides = array<i32>} : memref<432x1152xbf16, #tpu.memory_space<vmem>>, vector<16x1152xbf16>,
    %c0_52 = arith.constant 0 : index
    %c690 = arith.constant 690 : index
    %47 = vector.load %arg9[%c0_52, %c690] : memref<16x1920xbf16, #tpu.memory_space<vmem>>, vector<16x1152xbf16>
    %c304 = arith.constant 304 : index
    %c0_53 = arith.constant 0 : index
    %48 = vector.load %arg10[%c304, %c0_53] : memref<432x1152xbf16, #tpu.memory_space<vmem>>, vector<16x1152xbf16>
    tpu.vector_store %arg10[%c304, %c0_53], %47 {strides = array<i32>} : memref<432x1152xbf16, #tpu.memory_space<vmem>>, vector<16x1152xbf16>,
    %c0_54 = arith.constant 0 : index
    %c691 = arith.constant 691 : index
    %49 = vector.load %arg9[%c0_54, %c691] : memref<16x1920xbf16, #tpu.memory_space<vmem>>, vector<16x1152xbf16>
    %c320 = arith.constant 320 : index
    %c0_55 = arith.constant 0 : index
    %50 = vector.load %arg10[%c320, %c0_55] : memref<432x1152xbf16, #tpu.memory_space<vmem>>, vector<16x1152xbf16>
    tpu.vector_store %arg10[%c320, %c0_55], %49 {strides = array<i32>} : memref<432x1152xbf16, #tpu.memory_space<vmem>>, vector<16x1152xbf16>,
    %c0_56 = arith.constant 0 : index
    %c707 = arith.constant 707 : index
    %51 = vector.load %arg9[%c0_56, %c707] : memref<16x1920xbf16, #tpu.memory_space<vmem>>, vector<16x1152xbf16>
    %c336 = arith.constant 336 : index
    %c0_57 = arith.constant 0 : index
    %52 = vector.load %arg10[%c336, %c0_57] : memref<432x1152xbf16, #tpu.memory_space<vmem>>, vector<16x1152xbf16>
    tpu.vector_store %arg10[%c336, %c0_57], %51 {strides = array<i32>} : memref<432x1152xbf16, #tpu.memory_space<vmem>>, vector<16x1152xbf16>,
    %c0_58 = arith.constant 0 : index
    %c708 = arith.constant 708 : index
    %53 = vector.load %arg9[%c0_58, %c708] : memref<16x1920xbf16, #tpu.memory_space<vmem>>, vector<16x1152xbf16>
    %c352 = arith.constant 352 : index
    %c0_59 = arith.constant 0 : index
    %54 = vector.load %arg10[%c352, %c0_59] : memref<432x1152xbf16, #tpu.memory_space<vmem>>, vector<16x1152xbf16>
    tpu.vector_store %arg10[%c352, %c0_59], %53 {strides = array<i32>} : memref<432x1152xbf16, #tpu.memory_space<vmem>>, vector<16x1152xbf16>,
    %c0_60 = arith.constant 0 : index
    %c709 = arith.constant 709 : index
    %55 = vector.load %arg9[%c0_60, %c709] : memref<16x1920xbf16, #tpu.memory_space<vmem>>, vector<16x1152xbf16>
    %c368 = arith.constant 368 : index
    %c0_61 = arith.constant 0 : index
    %56 = vector.load %arg10[%c368, %c0_61] : memref<432x1152xbf16, #tpu.memory_space<vmem>>, vector<16x1152xbf16>
    tpu.vector_store %arg10[%c368, %c0_61], %55 {strides = array<i32>} : memref<432x1152xbf16, #tpu.memory_space<vmem>>, vector<16x1152xbf16>,
    %c0_62 = arith.constant 0 : index
    %c725 = arith.constant 725 : index
    %57 = vector.load %arg9[%c0_62, %c725] : memref<16x1920xbf16, #tpu.memory_space<vmem>>, vector<16x1152xbf16>
    %c384_63 = arith.constant 384 : index
    %c0_64 = arith.constant 0 : index
    %58 = vector.load %arg10[%c384_63, %c0_64] : memref<432x1152xbf16, #tpu.memory_space<vmem>>, vector<16x1152xbf16>
    tpu.vector_store %arg10[%c384_63, %c0_64], %57 {strides = array<i32>} : memref<432x1152xbf16, #tpu.memory_space<vmem>>, vector<16x1152xbf16>,
    %c0_65 = arith.constant 0 : index
    %c726 = arith.constant 726 : index
    %59 = vector.load %arg9[%c0_65, %c726] : memref<16x1920xbf16, #tpu.memory_space<vmem>>, vector<16x1152xbf16>
    %c400 = arith.constant 400 : index
    %c0_66 = arith.constant 0 : index
    %60 = vector.load %arg10[%c400, %c0_66] : memref<432x1152xbf16, #tpu.memory_space<vmem>>, vector<16x1152xbf16>
    tpu.vector_store %arg10[%c400, %c0_66], %59 {strides = array<i32>} : memref<432x1152xbf16, #tpu.memory_space<vmem>>, vector<16x1152xbf16>,
    %c0_67 = arith.constant 0 : index
    %c727 = arith.constant 727 : index
    %61 = vector.load %arg9[%c0_67, %c727] : memref<16x1920xbf16, #tpu.memory_space<vmem>>, vector<16x1152xbf16>
    %c416 = arith.constant 416 : index
    %c0_68 = arith.constant 0 : index
    %62 = vector.load %arg10[%c416, %c0_68] : memref<432x1152xbf16, #tpu.memory_space<vmem>>, vector<16x1152xbf16>
    tpu.vector_store %arg10[%c416, %c0_68], %61 {strides = array<i32>} : memref<432x1152xbf16, #tpu.memory_space<vmem>>, vector<16x1152xbf16>,
    %c0_69 = arith.constant 0 : index
    %c0_70 = arith.constant 0 : index
    %63 = vector.load %arg5[%c0_69, %c0_70] : memref<16x432xbf16, #tpu.memory_space<vmem>>, vector<16x432xbf16>
    %c0_71 = arith.constant 0 : index
    %c0_72 = arith.constant 0 : index
    %64 = vector.load %arg10[%c0_71, %c0_72] : memref<432x1152xbf16, #tpu.memory_space<vmem>>, vector<432x1152xbf16>
    %cst = arith.constant dense<0.000000e+00> : vector<16x1152xf32>
    %65 = tpu.matmul %63, %64, %cst {dimension_numbers = #tpu.dot_dimension_numbers<[1], [0], [0], [1], [0, 0, 1, 1], [], []>} : vector<16x432xbf16>, vector<432x1152xbf16>, vector<16x1152xf32> -> vector<16x1152xf32>
    %c0_73 = arith.constant 0 : index
    %c0_74 = arith.constant 0 : index
    %66 = vector.load %arg6[%c0_73, %c0_74] : memref<16x1xf32, #tpu.memory_space<vmem>>, vector<16x1xf32>
    %67 = vector.broadcast %66 : vector<16x1xf32> to vector<16x1152xf32>
    %68 = arith.addf %65, %67 : vector<16x1152xf32>
    %cst_75 = arith.constant 0.000000e+00 : f32
    %69 = vector.broadcast %cst_75 : f32 to vector<16x1152xf32>
    %70 = arith.maximumf %68, %69 : vector<16x1152xf32>
    %c0_76 = arith.constant 0 : index
    %c0_77 = arith.constant 0 : index
    %71 = vector.load %arg7[%c0_76, %c0_77] : memref<1x1152xf32, #tpu.memory_space<vmem>>, vector<1x1152xf32>
    %72 = vector.broadcast %71 : vector<1x1152xf32> to vector<16x1152xf32>
    %73 = arith.mulf %70, %72 : vector<16x1152xf32>
    %74 = arith.truncf %73 : vector<16x1152xf32> to vector<16x1152xbf16>
    %c0_78 = arith.constant 0 : index
    %c0_79 = arith.constant 0 : index
    %c0_80 = arith.constant 0 : index
    %75 = vector.load %arg8[%c0_78, %c0_79, %c0_80] : memref<1x16x1152xbf16, #tpu.memory_space<vmem>>, vector<1x16x1152xbf16>
    %76 = vector.shape_cast %75 : vector<1x16x1152xbf16> to vector<16x1152xbf16>
    %77 = vector.shape_cast %74 : vector<16x1152xbf16> to vector<1x16x1152xbf16>
    tpu.vector_store %arg8[%c0_78, %c0_79, %c0_80], %77 {strides = array<i32>} : memref<1x16x1152xbf16, #tpu.memory_space<vmem>>, vector<1x16x1152xbf16>,
    return
  }
  func.func @transform_0(%arg0: i32, %arg1: i32) -> (i32, i32, i32) {
    %c1_i32 = arith.constant 1 : i32
    %0 = arith.addi %arg1, %c1_i32 : i32
    %c3_i32 = arith.constant 3 : i32
    %1 = arith.muli %0, %c3_i32 : i32
    %c1_i32_0 = arith.constant 1 : i32
    %2 = arith.subi %1, %c1_i32_0 : i32
    %c0_i32 = arith.constant 0 : i32
    %c0_i32_1 = arith.constant 0 : i32
    return %arg0, %c0_i32, %2 : i32, i32, i32
  }
  func.func @transform_1(%arg0: i32, %arg1: i32) -> (i32, i32, i32) {
    %c1_i32 = arith.constant 1 : i32
    %0 = arith.addi %arg1, %c1_i32 : i32
    %c0_i32 = arith.constant 0 : i32
    %c0_i32_0 = arith.constant 0 : i32
    return %arg0, %c0_i32, %0 : i32, i32, i32
  }
  func.func @transform_2(%arg0: i32, %arg1: i32) -> (i32, i32, i32) {
    %c2_i32 = arith.constant 2 : i32
    %0 = arith.addi %arg1, %c2_i32 : i32
    %c3_i32 = arith.constant 3 : i32
    %1 = arith.muli %0, %c3_i32 : i32
    %c0_i32 = arith.constant 0 : i32
    %c0_i32_0 = arith.constant 0 : i32
    return %arg0, %c0_i32, %1 : i32, i32, i32
  }
  func.func @transform_3(%arg0: i32, %arg1: i32) -> (i32, i32) {
    %c0_i32 = arith.constant 0 : i32
    %c0_i32_0 = arith.constant 0 : i32
    %c0_i32_1 = arith.constant 0 : i32
    return %c0_i32, %c0_i32_0 : i32, i32
  }
  func.func @transform_4(%arg0: i32, %arg1: i32) -> (i32, i32) {
    %c0_i32 = arith.constant 0 : i32
    %c0_i32_0 = arith.constant 0 : i32
    %c0_i32_1 = arith.constant 0 : i32
    return %c0_i32, %c0_i32_0 : i32, i32
  }
  func.func @transform_5(%arg0: i32, %arg1: i32) -> (i32, i32) {
    %c1_i32 = arith.constant 1 : i32
    %0 = arith.addi %arg1, %c1_i32 : i32
    %c0_i32 = arith.constant 0 : i32
    %c0_i32_0 = arith.constant 0 : i32
    return %c0_i32, %0 : i32, i32
  }
  func.func @transform_6(%arg0: i32, %arg1: i32) -> (i32, i32, i32) {
    %c1_i32 = arith.constant 1 : i32
    %0 = arith.addi %arg1, %c1_i32 : i32
    %c0_i32 = arith.constant 0 : i32
    %c0_i32_0 = arith.constant 0 : i32
    return %arg0, %c0_i32, %0 : i32, i32, i32
  }
}

module attributes {stable_mosaic.version = 11 : i64} {
  func.func @kernel(%arg0: i32, %arg1: i32, %arg2: memref<1x16x384xbf16, #tpu.memory_space<vmem>>, %arg3: memref<1x16x1152xbf16, #tpu.memory_space<vmem>>, %arg4: memref<1x16x384xbf16, #tpu.memory_space<vmem>>, %arg5: memref<1x16x1152xbf16, #tpu.memory_space<vmem>>, %arg6: memref<16x432xbf16, #tpu.memory_space<vmem>>, %arg7: memref<16x1xf32, #tpu.memory_space<vmem>>, %arg8: memref<16x16xbf16, #tpu.memory_space<vmem>>, %arg9: memref<16x1xf32, #tpu.memory_space<vmem>>, %arg10: memref<1x16x1152xf32, #tpu.memory_space<vmem>>, %arg11: memref<16x1920xbf16, #tpu.memory_space<vmem>>, %arg12: memref<432x1152xbf16, #tpu.memory_space<vmem>>) attributes {dimension_semantics = [#tpu.dimension_semantics<parallel>, #tpu.dimension_semantics<parallel>], iteration_bounds = array<i64: 2, 3>, scalar_prefetch = 0 : i64, scratch_operands = 2 : i64, tpu.core_type = #tpu.core_type<tc>, window_params = [{transform_indices = @transform_0, window_bounds = array<i64: 1, 16, 384>}, {transform_indices = @transform_1, window_bounds = array<i64: 1, 16, 1152>}, {transform_indices = @transform_2, window_bounds = array<i64: 1, 16, 384>}, {transform_indices = @transform_3, window_bounds = array<i64: 1, 16, 1152>}, {pipeline_mode = #tpu.pipeline_mode<synchronous>, transform_indices = @transform_4, window_bounds = array<i64: 16, 432>}, {pipeline_mode = #tpu.pipeline_mode<synchronous>, transform_indices = @transform_5, window_bounds = array<i64: 16, 1>}, {pipeline_mode = #tpu.pipeline_mode<synchronous>, transform_indices = @transform_6, window_bounds = array<i64: 16, 16>}, {pipeline_mode = #tpu.pipeline_mode<synchronous>, transform_indices = @transform_7, window_bounds = array<i64: 16, 1>}, {transform_indices = @transform_8, window_bounds = array<i64: 1, 16, 1152>}]} {
    %c0 = arith.constant 0 : index
    %c0_0 = arith.constant 0 : index
    %c0_1 = arith.constant 0 : index
    %0 = vector.load %arg2[%c0, %c0_0, %c0_1] : memref<1x16x384xbf16, #tpu.memory_space<vmem>>, vector<1x16x384xbf16>
    %1 = vector.shape_cast %0 : vector<1x16x384xbf16> to vector<16x384xbf16>
    %c0_2 = arith.constant 0 : index
    %c0_3 = arith.constant 0 : index
    %2 = vector.load %arg11[%c0_2, %c0_3] : memref<16x1920xbf16, #tpu.memory_space<vmem>>, vector<16x384xbf16>
    tpu.vector_store %arg11[%c0_2, %c0_3], %1 {strides = array<i32>} : memref<16x1920xbf16, #tpu.memory_space<vmem>>, vector<16x384xbf16>,
    %c0_4 = arith.constant 0 : index
    %c0_5 = arith.constant 0 : index
    %c0_6 = arith.constant 0 : index
    %3 = vector.load %arg3[%c0_4, %c0_5, %c0_6] : memref<1x16x1152xbf16, #tpu.memory_space<vmem>>, vector<1x16x1152xbf16>
    %4 = vector.shape_cast %3 : vector<1x16x1152xbf16> to vector<16x1152xbf16>
    %c0_7 = arith.constant 0 : index
    %c384 = arith.constant 384 : index
    %5 = vector.load %arg11[%c0_7, %c384] : memref<16x1920xbf16, #tpu.memory_space<vmem>>, vector<16x1152xbf16>
    tpu.vector_store %arg11[%c0_7, %c384], %4 {strides = array<i32>} : memref<16x1920xbf16, #tpu.memory_space<vmem>>, vector<16x1152xbf16>,
    %c0_8 = arith.constant 0 : index
    %c0_9 = arith.constant 0 : index
    %c0_10 = arith.constant 0 : index
    %6 = vector.load %arg4[%c0_8, %c0_9, %c0_10] : memref<1x16x384xbf16, #tpu.memory_space<vmem>>, vector<1x16x384xbf16>
    %7 = vector.shape_cast %6 : vector<1x16x384xbf16> to vector<16x384xbf16>
    %c0_11 = arith.constant 0 : index
    %c1536 = arith.constant 1536 : index
    %8 = vector.load %arg11[%c0_11, %c1536] : memref<16x1920xbf16, #tpu.memory_space<vmem>>, vector<16x384xbf16>
    tpu.vector_store %arg11[%c0_11, %c1536], %7 {strides = array<i32>} : memref<16x1920xbf16, #tpu.memory_space<vmem>>, vector<16x384xbf16>,
    %c0_12 = arith.constant 0 : index
    %c41 = arith.constant 41 : index
    %9 = vector.load %arg11[%c0_12, %c41] : memref<16x1920xbf16, #tpu.memory_space<vmem>>, vector<16x1152xbf16>
    %c0_13 = arith.constant 0 : index
    %c0_14 = arith.constant 0 : index
    %10 = vector.load %arg12[%c0_13, %c0_14] : memref<432x1152xbf16, #tpu.memory_space<vmem>>, vector<16x1152xbf16>
    tpu.vector_store %arg12[%c0_13, %c0_14], %9 {strides = array<i32>} : memref<432x1152xbf16, #tpu.memory_space<vmem>>, vector<16x1152xbf16>,
    %c0_15 = arith.constant 0 : index
    %c42 = arith.constant 42 : index
    %11 = vector.load %arg11[%c0_15, %c42] : memref<16x1920xbf16, #tpu.memory_space<vmem>>, vector<16x1152xbf16>
    %c16 = arith.constant 16 : index
    %c0_16 = arith.constant 0 : index
    %12 = vector.load %arg12[%c16, %c0_16] : memref<432x1152xbf16, #tpu.memory_space<vmem>>, vector<16x1152xbf16>
    tpu.vector_store %arg12[%c16, %c0_16], %11 {strides = array<i32>} : memref<432x1152xbf16, #tpu.memory_space<vmem>>, vector<16x1152xbf16>,
    %c0_17 = arith.constant 0 : index
    %c43 = arith.constant 43 : index
    %13 = vector.load %arg11[%c0_17, %c43] : memref<16x1920xbf16, #tpu.memory_space<vmem>>, vector<16x1152xbf16>
    %c32 = arith.constant 32 : index
    %c0_18 = arith.constant 0 : index
    %14 = vector.load %arg12[%c32, %c0_18] : memref<432x1152xbf16, #tpu.memory_space<vmem>>, vector<16x1152xbf16>
    tpu.vector_store %arg12[%c32, %c0_18], %13 {strides = array<i32>} : memref<432x1152xbf16, #tpu.memory_space<vmem>>, vector<16x1152xbf16>,
    %c0_19 = arith.constant 0 : index
    %c59 = arith.constant 59 : index
    %15 = vector.load %arg11[%c0_19, %c59] : memref<16x1920xbf16, #tpu.memory_space<vmem>>, vector<16x1152xbf16>
    %c48 = arith.constant 48 : index
    %c0_20 = arith.constant 0 : index
    %16 = vector.load %arg12[%c48, %c0_20] : memref<432x1152xbf16, #tpu.memory_space<vmem>>, vector<16x1152xbf16>
    tpu.vector_store %arg12[%c48, %c0_20], %15 {strides = array<i32>} : memref<432x1152xbf16, #tpu.memory_space<vmem>>, vector<16x1152xbf16>,
    %c0_21 = arith.constant 0 : index
    %c60 = arith.constant 60 : index
    %17 = vector.load %arg11[%c0_21, %c60] : memref<16x1920xbf16, #tpu.memory_space<vmem>>, vector<16x1152xbf16>
    %c64 = arith.constant 64 : index
    %c0_22 = arith.constant 0 : index
    %18 = vector.load %arg12[%c64, %c0_22] : memref<432x1152xbf16, #tpu.memory_space<vmem>>, vector<16x1152xbf16>
    tpu.vector_store %arg12[%c64, %c0_22], %17 {strides = array<i32>} : memref<432x1152xbf16, #tpu.memory_space<vmem>>, vector<16x1152xbf16>,
    %c0_23 = arith.constant 0 : index
    %c61 = arith.constant 61 : index
    %19 = vector.load %arg11[%c0_23, %c61] : memref<16x1920xbf16, #tpu.memory_space<vmem>>, vector<16x1152xbf16>
    %c80 = arith.constant 80 : index
    %c0_24 = arith.constant 0 : index
    %20 = vector.load %arg12[%c80, %c0_24] : memref<432x1152xbf16, #tpu.memory_space<vmem>>, vector<16x1152xbf16>
    tpu.vector_store %arg12[%c80, %c0_24], %19 {strides = array<i32>} : memref<432x1152xbf16, #tpu.memory_space<vmem>>, vector<16x1152xbf16>,
    %c0_25 = arith.constant 0 : index
    %c77 = arith.constant 77 : index
    %21 = vector.load %arg11[%c0_25, %c77] : memref<16x1920xbf16, #tpu.memory_space<vmem>>, vector<16x1152xbf16>
    %c96 = arith.constant 96 : index
    %c0_26 = arith.constant 0 : index
    %22 = vector.load %arg12[%c96, %c0_26] : memref<432x1152xbf16, #tpu.memory_space<vmem>>, vector<16x1152xbf16>
    tpu.vector_store %arg12[%c96, %c0_26], %21 {strides = array<i32>} : memref<432x1152xbf16, #tpu.memory_space<vmem>>, vector<16x1152xbf16>,
    %c0_27 = arith.constant 0 : index
    %c78 = arith.constant 78 : index
    %23 = vector.load %arg11[%c0_27, %c78] : memref<16x1920xbf16, #tpu.memory_space<vmem>>, vector<16x1152xbf16>
    %c112 = arith.constant 112 : index
    %c0_28 = arith.constant 0 : index
    %24 = vector.load %arg12[%c112, %c0_28] : memref<432x1152xbf16, #tpu.memory_space<vmem>>, vector<16x1152xbf16>
    tpu.vector_store %arg12[%c112, %c0_28], %23 {strides = array<i32>} : memref<432x1152xbf16, #tpu.memory_space<vmem>>, vector<16x1152xbf16>,
    %c0_29 = arith.constant 0 : index
    %c79 = arith.constant 79 : index
    %25 = vector.load %arg11[%c0_29, %c79] : memref<16x1920xbf16, #tpu.memory_space<vmem>>, vector<16x1152xbf16>
    %c128 = arith.constant 128 : index
    %c0_30 = arith.constant 0 : index
    %26 = vector.load %arg12[%c128, %c0_30] : memref<432x1152xbf16, #tpu.memory_space<vmem>>, vector<16x1152xbf16>
    tpu.vector_store %arg12[%c128, %c0_30], %25 {strides = array<i32>} : memref<432x1152xbf16, #tpu.memory_space<vmem>>, vector<16x1152xbf16>,
    %c0_31 = arith.constant 0 : index
    %c365 = arith.constant 365 : index
    %27 = vector.load %arg11[%c0_31, %c365] : memref<16x1920xbf16, #tpu.memory_space<vmem>>, vector<16x1152xbf16>
    %c144 = arith.constant 144 : index
    %c0_32 = arith.constant 0 : index
    %28 = vector.load %arg12[%c144, %c0_32] : memref<432x1152xbf16, #tpu.memory_space<vmem>>, vector<16x1152xbf16>
    tpu.vector_store %arg12[%c144, %c0_32], %27 {strides = array<i32>} : memref<432x1152xbf16, #tpu.memory_space<vmem>>, vector<16x1152xbf16>,
    %c0_33 = arith.constant 0 : index
    %c366 = arith.constant 366 : index
    %29 = vector.load %arg11[%c0_33, %c366] : memref<16x1920xbf16, #tpu.memory_space<vmem>>, vector<16x1152xbf16>
    %c160 = arith.constant 160 : index
    %c0_34 = arith.constant 0 : index
    %30 = vector.load %arg12[%c160, %c0_34] : memref<432x1152xbf16, #tpu.memory_space<vmem>>, vector<16x1152xbf16>
    tpu.vector_store %arg12[%c160, %c0_34], %29 {strides = array<i32>} : memref<432x1152xbf16, #tpu.memory_space<vmem>>, vector<16x1152xbf16>,
    %c0_35 = arith.constant 0 : index
    %c367 = arith.constant 367 : index
    %31 = vector.load %arg11[%c0_35, %c367] : memref<16x1920xbf16, #tpu.memory_space<vmem>>, vector<16x1152xbf16>
    %c176 = arith.constant 176 : index
    %c0_36 = arith.constant 0 : index
    %32 = vector.load %arg12[%c176, %c0_36] : memref<432x1152xbf16, #tpu.memory_space<vmem>>, vector<16x1152xbf16>
    tpu.vector_store %arg12[%c176, %c0_36], %31 {strides = array<i32>} : memref<432x1152xbf16, #tpu.memory_space<vmem>>, vector<16x1152xbf16>,
    %c0_37 = arith.constant 0 : index
    %c383 = arith.constant 383 : index
    %33 = vector.load %arg11[%c0_37, %c383] : memref<16x1920xbf16, #tpu.memory_space<vmem>>, vector<16x1152xbf16>
    %c192 = arith.constant 192 : index
    %c0_38 = arith.constant 0 : index
    %34 = vector.load %arg12[%c192, %c0_38] : memref<432x1152xbf16, #tpu.memory_space<vmem>>, vector<16x1152xbf16>
    tpu.vector_store %arg12[%c192, %c0_38], %33 {strides = array<i32>} : memref<432x1152xbf16, #tpu.memory_space<vmem>>, vector<16x1152xbf16>,
    %c0_39 = arith.constant 0 : index
    %c384_40 = arith.constant 384 : index
    %35 = vector.load %arg11[%c0_39, %c384_40] : memref<16x1920xbf16, #tpu.memory_space<vmem>>, vector<16x1152xbf16>
    %c208 = arith.constant 208 : index
    %c0_41 = arith.constant 0 : index
    %36 = vector.load %arg12[%c208, %c0_41] : memref<432x1152xbf16, #tpu.memory_space<vmem>>, vector<16x1152xbf16>
    tpu.vector_store %arg12[%c208, %c0_41], %35 {strides = array<i32>} : memref<432x1152xbf16, #tpu.memory_space<vmem>>, vector<16x1152xbf16>,
    %c0_42 = arith.constant 0 : index
    %c385 = arith.constant 385 : index
    %37 = vector.load %arg11[%c0_42, %c385] : memref<16x1920xbf16, #tpu.memory_space<vmem>>, vector<16x1152xbf16>
    %c224 = arith.constant 224 : index
    %c0_43 = arith.constant 0 : index
    %38 = vector.load %arg12[%c224, %c0_43] : memref<432x1152xbf16, #tpu.memory_space<vmem>>, vector<16x1152xbf16>
    tpu.vector_store %arg12[%c224, %c0_43], %37 {strides = array<i32>} : memref<432x1152xbf16, #tpu.memory_space<vmem>>, vector<16x1152xbf16>,
    %c0_44 = arith.constant 0 : index
    %c401 = arith.constant 401 : index
    %39 = vector.load %arg11[%c0_44, %c401] : memref<16x1920xbf16, #tpu.memory_space<vmem>>, vector<16x1152xbf16>
    %c240 = arith.constant 240 : index
    %c0_45 = arith.constant 0 : index
    %40 = vector.load %arg12[%c240, %c0_45] : memref<432x1152xbf16, #tpu.memory_space<vmem>>, vector<16x1152xbf16>
    tpu.vector_store %arg12[%c240, %c0_45], %39 {strides = array<i32>} : memref<432x1152xbf16, #tpu.memory_space<vmem>>, vector<16x1152xbf16>,
    %c0_46 = arith.constant 0 : index
    %c402 = arith.constant 402 : index
    %41 = vector.load %arg11[%c0_46, %c402] : memref<16x1920xbf16, #tpu.memory_space<vmem>>, vector<16x1152xbf16>
    %c256 = arith.constant 256 : index
    %c0_47 = arith.constant 0 : index
    %42 = vector.load %arg12[%c256, %c0_47] : memref<432x1152xbf16, #tpu.memory_space<vmem>>, vector<16x1152xbf16>
    tpu.vector_store %arg12[%c256, %c0_47], %41 {strides = array<i32>} : memref<432x1152xbf16, #tpu.memory_space<vmem>>, vector<16x1152xbf16>,
    %c0_48 = arith.constant 0 : index
    %c403 = arith.constant 403 : index
    %43 = vector.load %arg11[%c0_48, %c403] : memref<16x1920xbf16, #tpu.memory_space<vmem>>, vector<16x1152xbf16>
    %c272 = arith.constant 272 : index
    %c0_49 = arith.constant 0 : index
    %44 = vector.load %arg12[%c272, %c0_49] : memref<432x1152xbf16, #tpu.memory_space<vmem>>, vector<16x1152xbf16>
    tpu.vector_store %arg12[%c272, %c0_49], %43 {strides = array<i32>} : memref<432x1152xbf16, #tpu.memory_space<vmem>>, vector<16x1152xbf16>,
    %c0_50 = arith.constant 0 : index
    %c689 = arith.constant 689 : index
    %45 = vector.load %arg11[%c0_50, %c689] : memref<16x1920xbf16, #tpu.memory_space<vmem>>, vector<16x1152xbf16>
    %c288 = arith.constant 288 : index
    %c0_51 = arith.constant 0 : index
    %46 = vector.load %arg12[%c288, %c0_51] : memref<432x1152xbf16, #tpu.memory_space<vmem>>, vector<16x1152xbf16>
    tpu.vector_store %arg12[%c288, %c0_51], %45 {strides = array<i32>} : memref<432x1152xbf16, #tpu.memory_space<vmem>>, vector<16x1152xbf16>,
    %c0_52 = arith.constant 0 : index
    %c690 = arith.constant 690 : index
    %47 = vector.load %arg11[%c0_52, %c690] : memref<16x1920xbf16, #tpu.memory_space<vmem>>, vector<16x1152xbf16>
    %c304 = arith.constant 304 : index
    %c0_53 = arith.constant 0 : index
    %48 = vector.load %arg12[%c304, %c0_53] : memref<432x1152xbf16, #tpu.memory_space<vmem>>, vector<16x1152xbf16>
    tpu.vector_store %arg12[%c304, %c0_53], %47 {strides = array<i32>} : memref<432x1152xbf16, #tpu.memory_space<vmem>>, vector<16x1152xbf16>,
    %c0_54 = arith.constant 0 : index
    %c691 = arith.constant 691 : index
    %49 = vector.load %arg11[%c0_54, %c691] : memref<16x1920xbf16, #tpu.memory_space<vmem>>, vector<16x1152xbf16>
    %c320 = arith.constant 320 : index
    %c0_55 = arith.constant 0 : index
    %50 = vector.load %arg12[%c320, %c0_55] : memref<432x1152xbf16, #tpu.memory_space<vmem>>, vector<16x1152xbf16>
    tpu.vector_store %arg12[%c320, %c0_55], %49 {strides = array<i32>} : memref<432x1152xbf16, #tpu.memory_space<vmem>>, vector<16x1152xbf16>,
    %c0_56 = arith.constant 0 : index
    %c707 = arith.constant 707 : index
    %51 = vector.load %arg11[%c0_56, %c707] : memref<16x1920xbf16, #tpu.memory_space<vmem>>, vector<16x1152xbf16>
    %c336 = arith.constant 336 : index
    %c0_57 = arith.constant 0 : index
    %52 = vector.load %arg12[%c336, %c0_57] : memref<432x1152xbf16, #tpu.memory_space<vmem>>, vector<16x1152xbf16>
    tpu.vector_store %arg12[%c336, %c0_57], %51 {strides = array<i32>} : memref<432x1152xbf16, #tpu.memory_space<vmem>>, vector<16x1152xbf16>,
    %c0_58 = arith.constant 0 : index
    %c708 = arith.constant 708 : index
    %53 = vector.load %arg11[%c0_58, %c708] : memref<16x1920xbf16, #tpu.memory_space<vmem>>, vector<16x1152xbf16>
    %c352 = arith.constant 352 : index
    %c0_59 = arith.constant 0 : index
    %54 = vector.load %arg12[%c352, %c0_59] : memref<432x1152xbf16, #tpu.memory_space<vmem>>, vector<16x1152xbf16>
    tpu.vector_store %arg12[%c352, %c0_59], %53 {strides = array<i32>} : memref<432x1152xbf16, #tpu.memory_space<vmem>>, vector<16x1152xbf16>,
    %c0_60 = arith.constant 0 : index
    %c709 = arith.constant 709 : index
    %55 = vector.load %arg11[%c0_60, %c709] : memref<16x1920xbf16, #tpu.memory_space<vmem>>, vector<16x1152xbf16>
    %c368 = arith.constant 368 : index
    %c0_61 = arith.constant 0 : index
    %56 = vector.load %arg12[%c368, %c0_61] : memref<432x1152xbf16, #tpu.memory_space<vmem>>, vector<16x1152xbf16>
    tpu.vector_store %arg12[%c368, %c0_61], %55 {strides = array<i32>} : memref<432x1152xbf16, #tpu.memory_space<vmem>>, vector<16x1152xbf16>,
    %c0_62 = arith.constant 0 : index
    %c725 = arith.constant 725 : index
    %57 = vector.load %arg11[%c0_62, %c725] : memref<16x1920xbf16, #tpu.memory_space<vmem>>, vector<16x1152xbf16>
    %c384_63 = arith.constant 384 : index
    %c0_64 = arith.constant 0 : index
    %58 = vector.load %arg12[%c384_63, %c0_64] : memref<432x1152xbf16, #tpu.memory_space<vmem>>, vector<16x1152xbf16>
    tpu.vector_store %arg12[%c384_63, %c0_64], %57 {strides = array<i32>} : memref<432x1152xbf16, #tpu.memory_space<vmem>>, vector<16x1152xbf16>,
    %c0_65 = arith.constant 0 : index
    %c726 = arith.constant 726 : index
    %59 = vector.load %arg11[%c0_65, %c726] : memref<16x1920xbf16, #tpu.memory_space<vmem>>, vector<16x1152xbf16>
    %c400 = arith.constant 400 : index
    %c0_66 = arith.constant 0 : index
    %60 = vector.load %arg12[%c400, %c0_66] : memref<432x1152xbf16, #tpu.memory_space<vmem>>, vector<16x1152xbf16>
    tpu.vector_store %arg12[%c400, %c0_66], %59 {strides = array<i32>} : memref<432x1152xbf16, #tpu.memory_space<vmem>>, vector<16x1152xbf16>,
    %c0_67 = arith.constant 0 : index
    %c727 = arith.constant 727 : index
    %61 = vector.load %arg11[%c0_67, %c727] : memref<16x1920xbf16, #tpu.memory_space<vmem>>, vector<16x1152xbf16>
    %c416 = arith.constant 416 : index
    %c0_68 = arith.constant 0 : index
    %62 = vector.load %arg12[%c416, %c0_68] : memref<432x1152xbf16, #tpu.memory_space<vmem>>, vector<16x1152xbf16>
    tpu.vector_store %arg12[%c416, %c0_68], %61 {strides = array<i32>} : memref<432x1152xbf16, #tpu.memory_space<vmem>>, vector<16x1152xbf16>,
    %c0_69 = arith.constant 0 : index
    %c0_70 = arith.constant 0 : index
    %63 = vector.load %arg6[%c0_69, %c0_70] : memref<16x432xbf16, #tpu.memory_space<vmem>>, vector<16x432xbf16>
    %c0_71 = arith.constant 0 : index
    %c0_72 = arith.constant 0 : index
    %64 = vector.load %arg12[%c0_71, %c0_72] : memref<432x1152xbf16, #tpu.memory_space<vmem>>, vector<432x1152xbf16>
    %cst = arith.constant dense<0.000000e+00> : vector<16x1152xf32>
    %65 = tpu.matmul %63, %64, %cst {dimension_numbers = #tpu.dot_dimension_numbers<[1], [0], [0], [1], [0, 0, 1, 1], [], []>} : vector<16x432xbf16>, vector<432x1152xbf16>, vector<16x1152xf32> -> vector<16x1152xf32>
    %c0_73 = arith.constant 0 : index
    %c0_74 = arith.constant 0 : index
    %66 = vector.load %arg7[%c0_73, %c0_74] : memref<16x1xf32, #tpu.memory_space<vmem>>, vector<16x1xf32>
    %67 = vector.broadcast %66 : vector<16x1xf32> to vector<16x1152xf32>
    %68 = arith.addf %65, %67 : vector<16x1152xf32>
    %c0_75 = arith.constant 0 : index
    %c0_76 = arith.constant 0 : index
    %69 = vector.load %arg8[%c0_75, %c0_76] : memref<16x16xbf16, #tpu.memory_space<vmem>>, vector<16x16xbf16>
    %c0_77 = arith.constant 0 : index
    %c0_78 = arith.constant 0 : index
    %c0_79 = arith.constant 0 : index
    %70 = vector.load %arg5[%c0_77, %c0_78, %c0_79] : memref<1x16x1152xbf16, #tpu.memory_space<vmem>>, vector<1x16x1152xbf16>
    %71 = vector.shape_cast %70 : vector<1x16x1152xbf16> to vector<16x1152xbf16>
    %cst_80 = arith.constant dense<0.000000e+00> : vector<16x1152xf32>
    %72 = tpu.matmul %69, %71, %cst_80 {dimension_numbers = #tpu.dot_dimension_numbers<[1], [0], [0], [1], [0, 0, 1, 1], [], []>} : vector<16x16xbf16>, vector<16x1152xbf16>, vector<16x1152xf32> -> vector<16x1152xf32>
    %73 = arith.addf %68, %72 : vector<16x1152xf32>
    %c0_81 = arith.constant 0 : index
    %c0_82 = arith.constant 0 : index
    %74 = vector.load %arg9[%c0_81, %c0_82] : memref<16x1xf32, #tpu.memory_space<vmem>>, vector<16x1xf32>
    %75 = vector.broadcast %74 : vector<16x1xf32> to vector<16x1152xf32>
    %76 = arith.addf %73, %75 : vector<16x1152xf32>
    %cst_83 = arith.constant 0.000000e+00 : f32
    %77 = vector.broadcast %cst_83 : f32 to vector<16x1152xf32>
    %78 = arith.maximumf %76, %77 : vector<16x1152xf32>
    %c0_84 = arith.constant 0 : index
    %c0_85 = arith.constant 0 : index
    %c0_86 = arith.constant 0 : index
    %79 = vector.load %arg10[%c0_84, %c0_85, %c0_86] : memref<1x16x1152xf32, #tpu.memory_space<vmem>>, vector<1x16x1152xf32>
    %80 = vector.shape_cast %79 : vector<1x16x1152xf32> to vector<16x1152xf32>
    %81 = vector.shape_cast %78 : vector<16x1152xf32> to vector<1x16x1152xf32>
    tpu.vector_store %arg10[%c0_84, %c0_85, %c0_86], %81 {strides = array<i32>} : memref<1x16x1152xf32, #tpu.memory_space<vmem>>, vector<1x16x1152xf32>,
    return
  }
  func.func @transform_0(%arg0: i32, %arg1: i32) -> (i32, i32, i32) {
    %c1_i32 = arith.constant 1 : i32
    %0 = arith.addi %arg1, %c1_i32 : i32
    %c3_i32 = arith.constant 3 : i32
    %1 = arith.muli %0, %c3_i32 : i32
    %c1_i32_0 = arith.constant 1 : i32
    %2 = arith.subi %1, %c1_i32_0 : i32
    %c0_i32 = arith.constant 0 : i32
    %c0_i32_1 = arith.constant 0 : i32
    return %arg0, %c0_i32, %2 : i32, i32, i32
  }
  func.func @transform_1(%arg0: i32, %arg1: i32) -> (i32, i32, i32) {
    %c1_i32 = arith.constant 1 : i32
    %0 = arith.addi %arg1, %c1_i32 : i32
    %c0_i32 = arith.constant 0 : i32
    %c0_i32_0 = arith.constant 0 : i32
    return %arg0, %c0_i32, %0 : i32, i32, i32
  }
  func.func @transform_2(%arg0: i32, %arg1: i32) -> (i32, i32, i32) {
    %c2_i32 = arith.constant 2 : i32
    %0 = arith.addi %arg1, %c2_i32 : i32
    %c3_i32 = arith.constant 3 : i32
    %1 = arith.muli %0, %c3_i32 : i32
    %c0_i32 = arith.constant 0 : i32
    %c0_i32_0 = arith.constant 0 : i32
    return %arg0, %c0_i32, %1 : i32, i32, i32
  }
  func.func @transform_3(%arg0: i32, %arg1: i32) -> (i32, i32, i32) {
    %c1_i32 = arith.constant 1 : i32
    %0 = arith.addi %arg1, %c1_i32 : i32
    %c0_i32 = arith.constant 0 : i32
    %c0_i32_0 = arith.constant 0 : i32
    return %arg0, %c0_i32, %0 : i32, i32, i32
  }
  func.func @transform_4(%arg0: i32, %arg1: i32) -> (i32, i32) {
    %c0_i32 = arith.constant 0 : i32
    %c0_i32_0 = arith.constant 0 : i32
    %c0_i32_1 = arith.constant 0 : i32
    return %c0_i32, %c0_i32_0 : i32, i32
  }
  func.func @transform_5(%arg0: i32, %arg1: i32) -> (i32, i32) {
    %c0_i32 = arith.constant 0 : i32
    %c0_i32_0 = arith.constant 0 : i32
    %c0_i32_1 = arith.constant 0 : i32
    return %c0_i32, %c0_i32_0 : i32, i32
  }
  func.func @transform_6(%arg0: i32, %arg1: i32) -> (i32, i32) {
    %c0_i32 = arith.constant 0 : i32
    %c0_i32_0 = arith.constant 0 : i32
    %c0_i32_1 = arith.constant 0 : i32
    return %c0_i32, %c0_i32_0 : i32, i32
  }
  func.func @transform_7(%arg0: i32, %arg1: i32) -> (i32, i32) {
    %c0_i32 = arith.constant 0 : i32
    %c0_i32_0 = arith.constant 0 : i32
    %c0_i32_1 = arith.constant 0 : i32
    return %c0_i32, %c0_i32_0 : i32, i32
  }
  func.func @transform_8(%arg0: i32, %arg1: i32) -> (i32, i32, i32) {
    %c1_i32 = arith.constant 1 : i32
    %0 = arith.addi %arg1, %c1_i32 : i32
    %c0_i32 = arith.constant 0 : i32
    %c0_i32_0 = arith.constant 0 : i32
    return %arg0, %c0_i32, %0 : i32, i32, i32
  }
}

</mosaic_0001>

<bundles_post_ra>
// kernel: basic_block_3d_forward.2
= control target key start
LH: loop header
LB: loop body
LE: loop exit
PB: predicated region body
PF: predicated region fallthrough
CT: control target
= control target key end

     0   :  { %s5271_s0 = inlined_call_operand.vmem [shape: bf16[2,16,5760], index: 0, kind: input, shape index: {}, may-alias: {0,1,2}]   ;;  %s5272_s1 = inlined_call_operand.vmem [shape: bf16[2,16,5760], index: 1, kind: input, shape index: {}, may-alias: {0,1,2}]   ;;  %s5273_s2 = inlined_call_operand.vmem [shape: bf16[2,16,5760], index: 2, kind: input, shape index: {}, may-alias: {0,1,2}]   ;;  %s5274_s3 = inlined_call_operand.vmem [shape: bf16[16,432], index: 3, kind: input, shape index: {}]   ;;  %s5275_s4 = inlined_call_operand.vmem [shape: f32[16,1], index: 4, kind: input, shape index: {}]   ;;  %s5276_s5 = inlined_call_operand.vmem [shape: f32[1,5760], index: 5, kind: input, shape index: {}]   ;;  %s5277_s6 = inlined_call_operand.vmem [shape: bf16[2,16,5760], index: 6, kind: output, shape index: {}]  }
   0x1   :  { %5341 = sst [smem:[#allocation14_spill]] %s5271_s0 }
   0x2   :  { %5342 = sst [smem:[#allocation15_spill]] %s5272_s1 }
   0x3   :  { %5343 = sst [smem:[#allocation16_spill]] %s5273_s2 }
   0x4   :  { %5344 = sst [smem:[#allocation17_spill]] %s5276_s5 }
   0x5   :  { %5345 = sst [smem:[#allocation18_spill]] %s5277_s6 }
   0x6   :  { %s3902_s21 = smov 0   ;;  %s3904_s22 = smov 0  }
   0x7   :  { %s3906_s23 = smov 0   ;;  %s3908_s24 = smov 0  }
   0x8   :  { %s3910_s25 = smov 0   ;;  %s3912_s26 = smov 0  }
   0x9   :  { %s3914_s27 = smov 0   ;;  %s3916_s28 = smov 0  }
   0xa   :  { %s3918_s29 = smov 0   ;;  %s3920_s30 = smov 0  }
   0xb   :  { %s3922_s7 = smov 0  }
   0xc LB: > { %5346 = sst [smem:[#allocation8_spill]] %s3822_s27  ;;  %s25_s9 = sadd.s32 1, %s3830_s29  ;;  %s3838_s7 = sphi %s3922_s7, %s16_s7   ;;  %s3834_s30 = sphi %s3920_s30, %s5444_s30   ;;  %s3830_s29 = sphi %s3918_s29, %s5452_s29   ;;  %s3826_s28 = sphi %s3916_s28, %s5442_s28   ;;  %s3822_s27 = sphi %s3914_s27, %s5451_s27   ;;  %s3818_s26 = sphi %s3912_s26, %s5450_s26   ;;  %s3814_s25 = sphi %s3910_s25, %s5449_s25   ;;  %s3810_s24 = sphi %s3908_s24, %s5448_s24   ;;  %s3806_s23 = sphi %s3906_s23, %s5447_s23   ;;  %s3802_s22 = sphi %s3904_s22, %s5446_s22   ;;  %s3798_s21 = sphi %s3902_s21, %s5445_s21  }
   0xd   : > { %5347 = sst [smem:[#allocation9_spill]] %s3826_s28  ;;  %p26_p0 = scmp.ge.s32.totalorder %s25_s9, 3 }
   0xe   : > { %5348 = sst [smem:[#allocation10_spill]] %s3834_s30  ;;  %s28_s10 = sadd.s32 1, %s3834_s30 }
   0xf   : > { %s33_s11 = smul.u32 3, %s25_s9  ;;  %s43_s12 = sadd.s32 1, %s3818_s26 }
  0x10   : > { %s3961_s13 = scalar_select %p26_p0, 0, %s25_s9  }
  0x11   : > { %s5454_s10 = smov (!%p26_p0, %s28_s10), %s3834_s30  ;;  %s3964_s14 = sadd.s32 4294967295, %s33_s11 }
  0x12   : > { %5349 = sst [smem:[#allocation11_spill]] %s3961_s13  ;;  %s35_s15 = sadd.s32 1, %s3961_s13 }
  0x13   : > { %p30_p1 = scmp.ge.s32.totalorder %s5454_s10, 2  ;;  %s36_s16 = smul.u32 3, %s35_s15 }
  0x14   : > { %p50_p2 = scmp.ne.s32.totalorder %s3818_s26, %s3814_s25  ;;  %p51_p3 = scmp.eq.s32.totalorder %s3838_s7, 0 }
  0x15   : > { %s5456_s10 = smov (%p30_p1, %s5454_s10), 0  ;;  %s3450_s17 = sadd.s32 4294967295, %s36_s16 }
  0x16   : > { %5350 = sst [smem:[#allocation12_spill]] %s5456_s10  ;;  %p3974_p4 = por %p51_p3, %p50_p2 }
  0x17   : > { %s38_s19 = ssub.s32 %s3834_s30, %s5456_s10  ;;  %s39_s20 = ssub.s32 %s3964_s14, %s3450_s17 }
  0x18   : > { %s40_s11 = sor.u32 %s39_s20, %s38_s19  ;;  %s69_s8 = ssub.s32 %s25_s9, %s35_s15 }
  0x19   : > { %p41_p5 = scmp.eq.s32.totalorder %s40_s11, 0  ;;  %s70_s6 = sor.u32 %s69_s8, %s38_s19 }
  0x1a   : > { %p71_p6 = scmp.eq.s32.totalorder %s70_s6, 0  ;;  %s73_s16 = sadd.s32 1, %s3810_s24 }
  0x1b   : > { %s3983_s28 = scalar_select %p41_p5, %s3818_s26, %s43_s12  }
  0x1c   : > { %s3986_s5 = scalar_select %p71_p6, %s3810_s24, %s73_s16  }
  0x1d   : > { %5352 = sst [smem:[#allocation13_spill]] %s3983_s28  ;;  %p80_p7 = scmp.ne.s32.totalorder %s3810_s24, %s3806_s23 }
  0x1e   : > { %s96_s10 = sadd.s32 2, %s3830_s29  ;;  %s98_s27 = sadd.s32 2, %s3961_s13 }
  0x1f   : > { %s97_s17 = smul.u32 3, %s96_s10  ;;  %p3997_p8 = por %p80_p7, %p51_p3 }
  0x20   : > { %s99_s8 = smul.u32 3, %s98_s27  ;;  %s105_s6 = sadd.s32 1, %s3802_s22 }
  0x21   : > { %p112_p9 = scmp.ne.s32.totalorder %s3802_s22, %s3798_s21  ;;  %s5354_s20 = sadd.s32 4294967295, %s3838_s7  }
  0x22   : > { %s101_s15 = ssub.s32 %s97_s17, %s99_s8  ;;  %p216_p10 = scmp.eq.s32.totalorder %s5354_s20, 5 }
  0x23   : > { %s102_s12 = sor.u32 %s101_s15, %s38_s19  ;;  %p4008_p11 = por %p112_p9, %p51_p3 }
  0x24   : > { %p103_p12 = scmp.eq.s32.totalorder %s102_s12, 0  ;;  %p4015_p13 = por %p216_p10, %p80_p7 }
  0x25   : > { %p3452_p0 = scmp.ge.s32.totalorder %s3838_s7, 6 }
  0x26   : > { %s4020_s16 = scalar_select %p103_p12, %s3802_s22, %s105_s6  }
  0x27   : > { %244 = sbr.rel (%p3452_p0) target bundleno = 82 (0x52), region = 24 }
  0x2e   : > { %247 = sbr.rel (!%p3974_p4) target bundleno = 57 (0x39), region = 28  ;;  %s249_s27 = sand.u32 (%p3974_p4), 1, %s3818_s26  }
  0x2f   : > { %s255_s19 = smul.u32 (%p3974_p4), 3, %s3964_s14  ;;  %s5357_s0 = sld [smem:[#allocation14_spill]] (%p3974_p4) }
  0x30   : > { %s3594_s17 = smul.u32 (%p3974_p4), 24, %s249_s27 }
  0x31   : > { %s3595_s8 = smul.u32 (%p3974_p4), 90, %s3834_s30 }
  0x32   : > { %s251_s28 = scalar_lea.vmem (%p3974_p4), [#allocation4], %s3594_s17 }
  0x33   : > { %s257_s15 = sadd.s32 (%p3974_p4), %s3595_s8, %s255_s19 }
  0x34   : > { %s3454_s20 = sshll.u32 (%p3974_p4), %s257_s15, 2 }
  0x35   : > { %s259_s6 = scalar_lea.vmem %s5357_s0, %s3454_s20 }
  0x36   : > { %v274_v0 = vld [vmem:[%s259_s6] sm:$0xff]  ;;  %v276_v1 = vld [vmem:[%s259_s6 + $0xb4] sm:$0xff]  ;;  %v3455_v2 = vld [vmem:[%s259_s6 + $0x8] sm:$0xf] }
  0x37   : > { %275 = vst [vmem:[%s251_s28] sm:$0xff] %v274_v0  ;;  %277 = vst [vmem:[%s251_s28 + $0xc] sm:$0xff] %v276_v1  ;;  %v3457_v3 = vld [vmem:[%s259_s6 + $0xbc] sm:$0xf] }
  0x38   : > { %3456 = vst [vmem:[%s251_s28 + $0x8] sm:$0xf] %v3455_v2  ;;  %3458 = vst [vmem:[%s251_s28 + $0x14] sm:$0xf] %v3457_v3 }
  0x39 PF: > { %294 = sbr.rel (!%p3997_p8) target bundleno = 71 (0x47), region = 54  ;;  %s296_s14 = sand.u32 (%p3997_p8), 1, %s3810_s24  }
  0x3a   : > { %s3321_s18 = smul.u32 (%p3997_p8), 9, %s3830_s29  ;;  %s5358_s1 = sld [smem:[#allocation15_spill]] (%p3997_p8) }
  0x3b   : > { %s3596_s13 = smul.u32 (%p3997_p8), 72, %s296_s14 }
  0x3c   : > { %s3322_s27 = smul.u32 (%p3997_p8), 90, %s3834_s30 }
  0x3d   : > { %s298_s28 = scalar_lea.vmem (%p3997_p8), [#allocation5], %s3596_s13 }
  0x3e   : > { %s3323_s19 = sadd.s32 (%p3997_p8), %s3322_s27, %s3321_s18 }
  0x3f   : > { %s3459_s8 = sshll.u32 (%p3997_p8), %s3323_s19, 2 }
  0x40   : > { %s3325_s20 = scalar_lea.vmem %s5358_s1, %s3459_s8 }
  0x41   : > { %v3460_v4 = vld [vmem:[%s3325_s20 + $0x24] sm:$0xff]  ;;  %v3461_v5 = vld [vmem:[%s3325_s20 + $0x2c] sm:$0xff]  ;;  %v3462_v6 = vld [vmem:[%s3325_s20 + $0x34] sm:$0xff] }
  0x42   : > { %320 = vst [vmem:[%s298_s28] sm:$0xff] %v3460_v4  ;;  %322 = vst [vmem:[%s298_s28 + $0x8] sm:$0xff] %v3461_v5  ;;  %v3463_v7 = vld [vmem:[%s3325_s20 + $0x3c] sm:$0xff]  ;;  %v3466_v10 = vld [vmem:[%s3325_s20 + $0xe8] sm:$0xff] }
  0x43   : > { %324 = vst [vmem:[%s298_s28 + $0x10] sm:$0xff] %v3462_v6  ;;  %v3464_v8 = vld [vmem:[%s3325_s20 + $0xd8] sm:$0xff]  ;;  %v3465_v9 = vld [vmem:[%s3325_s20 + $0xe0] sm:$0xff]  ;;  %326 = vst [vmem:[%s298_s28 + $0x18] sm:$0xff] %v3463_v7 }
  0x44   : > { %328 = vst [vmem:[%s298_s28 + $0x24] sm:$0xff] %v3464_v8  ;;  %330 = vst [vmem:[%s298_s28 + $0x2c] sm:$0xff] %v3465_v9  ;;  %v3467_v11 = vld [vmem:[%s3325_s20 + $0xf0] sm:$0xff]  ;;  %v3468_v12 = vld [vmem:[%s3325_s20 + $0x44] sm:$0xf] }
  0x45   : > { %332 = vst [vmem:[%s298_s28 + $0x34] sm:$0xff] %v3466_v10  ;;  %334 = vst [vmem:[%s298_s28 + $0x3c] sm:$0xff] %v3467_v11  ;;  %v3470_v13 = vld [vmem:[%s3325_s20 + $0xf8] sm:$0xf] }
  0x46   : > { %3469 = vst [vmem:[%s298_s28 + $0x20] sm:$0xf] %v3468_v12  ;;  %3471 = vst [vmem:[%s298_s28 + $0x44] sm:$0xf] %v3470_v13 }
  0x47 PF: > { %351 = sbr.rel (!%p4008_p11) target bundleno = 82 (0x52), region = 80  ;;  %s353_s9 = sand.u32 (%p4008_p11), 1, %s3802_s22  }
  0x48   : > { %s3330_s12 = smul.u32 (%p4008_p11), 9, %s3830_s29  ;;  %s5359_s2 = sld [smem:[#allocation16_spill]] (%p4008_p11) }
  0x49   : > { %s3597_s6 = smul.u32 (%p4008_p11), 24, %s353_s9 }
  0x4a   : > { %s3331_s14 = smul.u32 (%p4008_p11), 90, %s3834_s30 }
  0x4b   : > { %s355_s15 = scalar_lea.vmem (%p4008_p11), [#allocation6], %s3597_s6 }
  0x4c   : > { %s3332_s18 = sadd.s32 (%p4008_p11), %s3331_s14, %s3330_s12 }
  0x4d   : > { %s3472_s13 = sshll.u32 (%p4008_p11), %s3332_s18, 2 }
  0x4e   : > { %s3334_s8 = scalar_lea.vmem %s5359_s2, %s3472_s13 }
  0x4f   : > { %v3473_v14 = vld [vmem:[%s3334_s8 + $0x48] sm:$0xff]  ;;  %v3474_v15 = vld [vmem:[%s3334_s8 + $0xfc] sm:$0xff]  ;;  %v3475_v16 = vld [vmem:[%s3334_s8 + $0x50] sm:$0xf] }
  0x50   : > { %378 = vst [vmem:[%s355_s15] sm:$0xff] %v3473_v14  ;;  %380 = vst [vmem:[%s355_s15 + $0xc] sm:$0xff] %v3474_v15  ;;  %v3477_v17 = vld [vmem:[%s3334_s8 + $0x104] sm:$0xf] }
  0x51   : > { %3476 = vst [vmem:[%s355_s15 + $0x8] sm:$0xf] %v3475_v16  ;;  %3478 = vst [vmem:[%s355_s15 + $0x14] sm:$0xf] %v3477_v17 }
  0x52 PF: > { %p3479_p1 = scmp.ge.s32.totalorder %s3838_s7, 1  ;;  %p406_p2 = scmp.lt.s32.totalorder %s3838_s7, 7 }
  0x54   : > { %p407_p3 = pnand %p3479_p1, %p406_p2 }
  0x55   : > { %s420_s11 = sand.u32 (!%p407_p3), 1, %s3806_s23   ;;  %s413_s20 = sand.u32 (!%p407_p3), 1, %s3814_s25   ;;  %vm638_vm0 = vcmask (!%p407_p3), 711680   ;;  %vm706_vm1 = vcmask (!%p407_p3), 703488   ;;  %vm774_vm2 = vcmask (!%p407_p3), 695296   ;;  %vm5340_vm3 = vcmask (!%p407_p3), 564224  }
  0x56   : > { %410 = sbr.rel (%p407_p3) target bundleno = 961 (0x3c1), region = 110  ;;  %s5330_s12 = smov (!%p407_p3), 87   ;;  %v4213_v46 = vld [vmem:[%s5274_s3 + $0x4] ss:$16 sps:$4 sm:$0xff] (!%p407_p3)   ;;  %vm5339_vm4 = vcmask (!%p407_p3), 556032   ;;  %vm5338_vm5 = vcmask (!%p407_p3), 547840  }
  0x57   : > { %s4050_s17 = smul.u32 (!%p407_p3), 72, %s420_s11  ;;  %s5329_s23 = smov (!%p407_p3), 86   ;;  %2784 = vmatprep.mubr.bf16.mxu1 (!%p407_p3), %v4213_v46  ;;  %2698 = vmatprep.mubr.bf16.mxu0 (!%p407_p3), %v4213_v46  ;;  %vm5337_vm6 = vcmask (!%p407_p3), 416768   ;;  %vm5336_vm7 = vcmask (!%p407_p3), 408576   ;;  %vm1182_vm8 = vcmask (!%p407_p3), 400384   ;;  %vm1250_vm9 = vcmask (!%p407_p3), 154624  }
  0x58   : > { %s3598_s28 = smul.u32 (!%p407_p3), 24, %s413_s20  ;;  %s5328_s25 = smov (!%p407_p3), 85   ;;  %vm1318_vm10 = vcmask (!%p407_p3), 146432   ;;  %vm1386_vm11 = vcmask (!%p407_p3), 138240   ;;  %vm5312_vm12 = vcmask (!%p407_p3), 7168   ;;  %vm5313_vm13 = vcmask (!%p407_p3), 1039360  }
  0x59   : > { %s4054_s9 = scalar_lea.vmem (!%p407_p3), [#allocation5], %s4050_s17  ;;  %s5327_s14 = smov (!%p407_p3), 69   ;;  %vm5314_vm14 = vcmask (!%p407_p3), 908288   ;;  %vm5315_vm15 = vcmask (!%p407_p3), 392192  }
  0x5a   : > { %v4057_v18 = vld [vmem:[%s4054_s9] ss:$36 sps:$4 sm:$0xff] (!%p407_p3)   ;;  %s415_s6 = scalar_lea.vmem (!%p407_p3), [#allocation4], %s3598_s28  ;;  %s5326_s18 = smov (!%p407_p3), 68   ;;  %v4133_v23 = vld [vmem:[%s4054_s9 + $0x8] ss:$36 sps:$4 sm:$0xff] (!%p407_p3)  }
  0x5b   : > { %624 = vrot.lane.b32.xlu0 (!%p407_p3), %v4057_v18, %s5330_s12  ;;  %v4061_v19 = vld [vmem:[%s415_s6 + $0x8] ss:$12 sps:$4 sm:$0xff] (!%p407_p3)   ;;  %v3730_v21 = vld [vmem:[%s415_s6 + $0x4] ss:$12 sps:$4 sm:$0xff] (!%p407_p3)   ;;  %v3732_v22 = vld [vmem:[%s415_s6] ss:$12 sps:$4 sm:$0xff] (!%p407_p3)  }
  0x5c   : > { %v4064_v20 = vld [vmem:[%s4054_s9 + $0x4] ss:$36 sps:$4 sm:$0xff] (!%p407_p3)   ;;  %622 = vrot.lane.b32.xlu1 (!%p407_p3), %v4061_v19, %s5330_s12  ;;  %s5325_s13 = smov (!%p407_p3), 67   ;;  %s5324_s27 = smov (!%p407_p3), 51   ;;  %v4137_v24 = vld [vmem:[%s4054_s9 + $0xc] ss:$36 sps:$4 sm:$0xff] (!%p407_p3)  }
  0x5d   : > { %s5322_s19 = smov 50   ;;  %s5310_s8 = smov 49   ;;  %v4192_v37 = vld [vmem:[%s4054_s9 + $0x10] ss:$36 sps:$4 sm:$0xff]   ;;  %v4267_v8 = vld [vmem:[%s4054_s9 + $0x18] ss:$36 sps:$4 sm:$0xff]  }
  0x5e   : > { %s5308_s15 = smov 19   ;;  %s5284_s11 = smov 18   ;;  %v4260_v6 = vld [vmem:[%s4054_s9 + $0x14] ss:$36 sps:$4 sm:$0xff]  }
  0x5f   : > { %626 = vrot.lane.b32.xlu0 %v4064_v20, %s5330_s12  ;;  %s5282_s20 = smov 17   ;;  %s5280_s28 = smov 1  }
  0x60   : > { %692 = vrot.lane.b32.xlu1 %v4057_v18, %s5329_s23  ;;  %s5306_s6 = smov 127   ;;  %s5374_s0 = smov 59  }
  0x61   : > { %s5375_s1 = smov 43   ;;  %s5376_s2 = smov 42  }
  0x62   : > { %s5377_s30 = smov 41  }
  0x63   : > { %694 = vrot.lane.b32.xlu0 %v4064_v20, %s5329_s23 }
  0x64   : > { %690 = vrot.lane.b32.xlu1 %v4061_v19, %s5329_s23 }
  0x67   : > { %620 = vrot.lane.b32.xlu0 %v3730_v21, %s5330_s12 }
  0x68   : > { %618 = vrot.lane.b32.xlu1 %v3732_v22, %s5330_s12 }
  0x6b   : > { %760 = vrot.lane.b32.xlu0 %v4057_v18, %s5328_s25 }
  0x6c   : > { %762 = vrot.lane.b32.xlu1 %v4064_v20, %s5328_s25 }
  0x6f   : > { %758 = vrot.lane.b32.xlu0 %v4061_v19, %s5328_s25 }
  0x70   : > { %688 = vrot.lane.b32.xlu1 %v3730_v21, %s5329_s23 }
  0x73   : > { %686 = vrot.lane.b32.xlu0 %v3732_v22, %s5329_s23 }
  0x74   : > { %828 = vrot.lane.b32.xlu1 %v4057_v18, %s5327_s14 }
  0x77   : > { %830 = vrot.lane.b32.xlu0 %v4064_v20, %s5327_s14 }
  0x78   : > { %826 = vrot.lane.b32.xlu1 %v4061_v19, %s5327_s14 }
  0x7b   : > { %756 = vrot.lane.b32.xlu0 %v3730_v21, %s5328_s25 }
  0x7c   : > { %754 = vrot.lane.b32.xlu1 %v3732_v22, %s5328_s25 }
  0x7f   : > { %896 = vrot.lane.b32.xlu0 %v4057_v18, %s5326_s18 }
  0x80   : > { %898 = vrot.lane.b32.xlu1 %v4064_v20, %s5326_s18 }
  0x83   : > { %894 = vrot.lane.b32.xlu0 %v4061_v19, %s5326_s18 }
  0x84   : > { %824 = vrot.lane.b32.xlu1 %v3730_v21, %s5327_s14 }
  0x87   : > { %822 = vrot.lane.b32.xlu0 %v3732_v22, %s5327_s14 }
  0x88   : > { %964 = vrot.lane.b32.xlu1 %v4057_v18, %s5325_s13 }
  0x8b   : > { %966 = vrot.lane.b32.xlu0 %v4064_v20, %s5325_s13 }
  0x8c   : > { %962 = vrot.lane.b32.xlu1 %v4061_v19, %s5325_s13 }
  0x8f   : > { %892 = vrot.lane.b32.xlu0 %v3730_v21, %s5326_s18 }
  0x90   : > { %890 = vrot.lane.b32.xlu1 %v3732_v22, %s5326_s18 }
  0x93   : > { %1032 = vrot.lane.b32.xlu0 %v4057_v18, %s5324_s27 }
  0x94   : > { %1034 = vrot.lane.b32.xlu1 %v4064_v20, %s5324_s27 }
  0x97   : > { %1030 = vrot.lane.b32.xlu0 %v4061_v19, %s5324_s27 }
  0x98   : > { %960 = vrot.lane.b32.xlu1 %v3730_v21, %s5325_s13 }
  0x9b   : > { %958 = vrot.lane.b32.xlu0 %v3732_v22, %s5325_s13 }
  0x9c   : > { %1100 = vrot.lane.b32.xlu1 %v4057_v18, %s5322_s19 }
  0x9f   : > { %1102 = vrot.lane.b32.xlu0 %v4064_v20, %s5322_s19 }
  0xa0   : > { %1098 = vrot.lane.b32.xlu1 %v4061_v19, %s5322_s19 }
  0xa3   : > { %1028 = vrot.lane.b32.xlu0 %v3730_v21, %s5324_s27 }
  0xa4   : > { %1026 = vrot.lane.b32.xlu1 %v3732_v22, %s5324_s27 }
  0xa7   : > { %1168 = vrot.lane.b32.xlu0 %v4057_v18, %s5310_s8 }
  0xa8   : > { %1170 = vrot.lane.b32.xlu1 %v4064_v20, %s5310_s8 }
  0xab   : > { %1166 = vrot.lane.b32.xlu0 %v4061_v19, %s5310_s8 }
  0xac   : > { %1096 = vrot.lane.b32.xlu1 %v3730_v21, %s5322_s19 }
  0xaf   : > { %1094 = vrot.lane.b32.xlu0 %v3732_v22, %s5322_s19 }
  0xb0   : > { %1236 = vrot.lane.b32.xlu1 %v4133_v23, %s5308_s15 }
  0xb3   : > { %1238 = vrot.lane.b32.xlu0 %v4137_v24, %s5308_s15 }
  0xb4   : > { %1234 = vrot.lane.b32.xlu1 %v4064_v20, %s5308_s15 }
  0xb7   : > { %1164 = vrot.lane.b32.xlu0 %v3730_v21, %s5310_s8 }
  0xb8   : > { %1162 = vrot.lane.b32.xlu1 %v3732_v22, %s5310_s8 }
  0xbb   : > { %1304 = vrot.lane.b32.xlu0 %v4133_v23, %s5284_s11 }
  0xbc   : > { %1306 = vrot.lane.b32.xlu1 %v4137_v24, %s5284_s11 }
  0xbf   : > { %1302 = vrot.lane.b32.xlu0 %v4064_v20, %s5284_s11 }
  0xc0   : > { %1232 = vrot.lane.b32.xlu1 %v4057_v18, %s5308_s15 }
  0xc3   : > { %1230 = vrot.lane.b32.xlu0 %v4061_v19, %s5308_s15 }
  0xc4   : > { %1372 = vrot.lane.b32.xlu1 %v4133_v23, %s5282_s20 }
  0xc7   : > { %1374 = vrot.lane.b32.xlu0 %v4137_v24, %s5282_s20 }
  0xc8   : > { %1370 = vrot.lane.b32.xlu1 %v4064_v20, %s5282_s20 }
  0xcb   : > { %1300 = vrot.lane.b32.xlu0 %v4057_v18, %s5284_s11 }
  0xcc   : > { %1298 = vrot.lane.b32.xlu1 %v4061_v19, %s5284_s11  ;;  %s5288_s11 = smov 110  }
  0xcd   : > { %v625_v25 = vpop.permute.xlu0 %624 }
  0xce   : > { %v623_v26 = vpop.permute.xlu1 %622 }
  0xcf   : > { %1440 = vrot.lane.b32.xlu0 %v4133_v23, %s5280_s28  ;;  %v641_v29 = vsel %vm638_vm0, %v623_v26, %v625_v25 }
  0xd0   : > { %1442 = vrot.lane.b32.xlu1 %v4137_v24, %s5280_s28 }
  0xd1   : > { %v4170_v27 = vpop.permute.xlu0 %626 }
  0xd2   : > { %v642_v28 = vsel %vm638_vm0, %v625_v25, %v4170_v27  ;;  %v693_v30 = vpop.permute.xlu1 %692 }
  0xd3   : > { %2752 = vmatprep.subr.bf16.mxu1 %v642_v28  ;;  %1438 = vrot.lane.b32.xlu0 %v4064_v20, %s5280_s28 }
  0xd4   : > { %2753 = vmatpush1.bf16.msra.mxu1 %v641_v29  ;;  %1368 = vrot.lane.b32.xlu1 %v4057_v18, %s5282_s20 }
  0xd5   : > { %v4179_v31 = vpop.permute.xlu0 %694 }
  0xd6   : > { %v710_v32 = vsel %vm706_vm1, %v693_v30, %v4179_v31  ;;  %v691_v33 = vpop.permute.xlu1 %690 }
  0xd7   : > { %2754 = vmatprep.subr.bf16.mxu1 %v710_v32  ;;  %1366 = vrot.lane.b32.xlu0 %v4061_v19, %s5282_s20  ;;  %v709_v34 = vsel %vm706_vm1, %v691_v33, %v693_v30  ;;  %s5290_s20 = smov 109  }
  0xd8   : > { %1436 = vrot.lane.b32.xlu1 %v4057_v18, %s5280_s28  ;;  %2755 = vmatpush1.bf16.msra.mxu1 %v709_v34 }
  0xd9   : > { %v621_v35 = vpop.permute.xlu0 %620 }
  0xda   : > { %v640_v36 = vsel %vm638_vm0, %v621_v35, %v623_v26  ;;  %v619_v38 = vpop.permute.xlu1 %618 }
  0xdb   : > { %2666 = vmatprep.subr.bf16.mxu0 %v640_v36  ;;  %1434 = vrot.lane.b32.xlu0 %v4061_v19, %s5280_s28  ;;  %v639_v39 = vsel %vm638_vm0, %v619_v38, %v621_v35  ;;  %s5286_s28 = smov 111  }
  0xdc   : > { %1526 = vrot.lane.b32.xlu1 %v4137_v24, %s5306_s6  ;;  %2667 = vmatpush1.bf16.msra.mxu0 %v639_v39 }
  0xdd   : > { %v761_v40 = vpop.permute.xlu0 %760 }
  0xde   : > { %v4201_v41 = vpop.permute.xlu1 %762 }
  0xdf   : > { %1528 = vrot.lane.b32.xlu0 %v4192_v37, %s5306_s6  ;;  %v778_v42 = vsel %vm774_vm2, %v761_v40, %v4201_v41 }
  0xe0   : > { %1524 = vrot.lane.b32.xlu1 %v4133_v23, %s5306_s6  ;;  %2756 = vmatprep.subr.bf16.mxu1 %v778_v42 }
  0xe1   : > { %v759_v43 = vpop.permute.xlu0 %758 }
  0xe2   : > { %v777_v44 = vsel %vm774_vm2, %v759_v43, %v761_v40  ;;  %v689_v45 = vpop.permute.xlu1 %688 }
  0xe3   : > { %1594 = vrot.lane.b32.xlu0 %v4137_v24, %s5286_s28  ;;  %2757 = vmatpush1.bf16.msra.mxu1 %v777_v44  ;;  %v708_v47 = vsel %vm706_vm1, %v689_v45, %v691_v33 }
  0xe4   : > { %1596 = vrot.lane.b32.xlu1 %v4192_v37, %s5286_s28  ;;  %2668 = vmatprep.subr.bf16.mxu0 %v708_v47 }
  0xe5   : > { %v687_v48 = vpop.permute.xlu0 %686 }
  0xe6   : > { %v707_v49 = vsel %vm706_vm1, %v687_v48, %v689_v45  ;;  %v829_v50 = vpop.permute.xlu1 %828 }
  0xe7   : > { %1592 = vrot.lane.b32.xlu0 %v4133_v23, %s5286_s28  ;;  %2669 = vmatpush1.bf16.msra.mxu0 %v707_v49 }
  0xe8   : > { %1522 = vrot.lane.b32.xlu1 %v4064_v20, %s5306_s6 }
  0xe9   : > { %v4223_v51 = vpop.permute.xlu0 %830 }
  0xea   : > { %v846_v52 = vsel %vm5340_vm3, %v829_v50, %v4223_v51  ;;  %v827_v53 = vpop.permute.xlu1 %826 }
  0xeb   : > { %1520 = vrot.lane.b32.xlu0 %v4057_v18, %s5306_s6  ;;  %2758 = vmatprep.subr.bf16.mxu1 %v846_v52  ;;  %v845_v54 = vsel %vm5340_vm3, %v827_v53, %v829_v50  ;;  %s5361_s6 = smov 19  }
  0xec   : > { %1662 = vrot.lane.b32.xlu1 %v4137_v24, %s5288_s11  ;;  %2759 = vmatpush1.bf16.msra.mxu1 %v845_v54 }
  0xed   : > { %v757_v55 = vpop.permute.xlu0 %756 }
  0xee   : > { %v776_v56 = vsel %vm774_vm2, %v757_v55, %v759_v43  ;;  %v755_v57 = vpop.permute.xlu1 %754 }
  0xef   : > { %1664 = vrot.lane.b32.xlu0 %v4192_v37, %s5288_s11  ;;  %2670 = vmatprep.subr.bf16.mxu0 %v776_v56  ;;  %v775_v58 = vsel %vm774_vm2, %v755_v57, %v757_v55 }
  0xf0   : > { %1660 = vrot.lane.b32.xlu1 %v4133_v23, %s5288_s11  ;;  %2671 = vmatpush1.bf16.msra.mxu0 %v775_v58 }
  0xf1   : > { %v897_v59 = vpop.permute.xlu0 %896 }
  0xf2   : > { %v4242_v60 = vpop.permute.xlu1 %898 }
  0xf3   : > { %1590 = vrot.lane.b32.xlu0 %v4064_v20, %s5286_s28  ;;  %v914_v61 = vsel %vm5339_vm4, %v897_v59, %v4242_v60 }
  0xf4   : > { %1588 = vrot.lane.b32.xlu1 %v4057_v18, %s5286_s28  ;;  %2760 = vmatprep.subr.bf16.mxu1 %v914_v61  ;;  %s5292_s28 = smov 79  }
  0xf5   : > { %v895_v62 = vpop.permute.xlu0 %894 }
  0xf6   : > { %v913_v63 = vsel %vm5339_vm4, %v895_v62, %v897_v59  ;;  %v825_v0 = vpop.permute.xlu1 %824 }
  0xf7   : > { %1730 = vrot.lane.b32.xlu0 %v4137_v24, %s5290_s20  ;;  %2761 = vmatpush1.bf16.msra.mxu1 %v913_v63  ;;  %v844_v1 = vsel %vm5340_vm3, %v825_v0, %v827_v53 }
  0xf8   : > { %1732 = vrot.lane.b32.xlu1 %v4192_v37, %s5290_s20  ;;  %2672 = vmatprep.subr.bf16.mxu0 %v844_v1 }
  0xf9   : > { %v823_v2 = vpop.permute.xlu0 %822 }
  0xfa   : > { %v843_v3 = vsel %vm5340_vm3, %v823_v2, %v825_v0  ;;  %v965_v4 = vpop.permute.xlu1 %964 }
  0xfb   : > { %1728 = vrot.lane.b32.xlu0 %v4133_v23, %s5290_s20  ;;  %2673 = vmatpush1.bf16.msra.mxu0 %v843_v3 }
  0xfc   : > { %1658 = vrot.lane.b32.xlu1 %v4064_v20, %s5288_s11 }
  0xfd   : > { %v4257_v5 = vpop.permute.xlu0 %966 }
  0xfe   : > { %v982_v7 = vsel %vm5338_vm5, %v965_v4, %v4257_v5  ;;  %v963_v9 = vpop.permute.xlu1 %962 }
  0xff   : > { %1656 = vrot.lane.b32.xlu0 %v4057_v18, %s5288_s11  ;;  %2762 = vmatprep.subr.bf16.mxu1 %v982_v7  ;;  %v981_v10 = vsel %vm5338_vm5, %v963_v9, %v965_v4  ;;  %s5294_s11 = smov 78  }
 0x100   : > { %1798 = vrot.lane.b32.xlu1 %v4260_v6, %s5292_s28  ;;  %2763 = vmatpush1.bf16.msra.mxu1 %v981_v10 }
 0x101   : > { %v893_v11 = vpop.permute.xlu0 %892 }
 0x102   : > { %v912_v12 = vsel %vm5339_vm4, %v893_v11, %v895_v62  ;;  %v891_v13 = vpop.permute.xlu1 %890 }
 0x103   : > { %1800 = vrot.lane.b32.xlu0 %v4267_v8, %s5292_s28  ;;  %2674 = vmatprep.subr.bf16.mxu0 %v912_v12  ;;  %v911_v14 = vsel %vm5339_vm4, %v891_v13, %v893_v11 }
 0x104   : > { %1796 = vrot.lane.b32.xlu1 %v4192_v37, %s5292_s28  ;;  %2675 = vmatpush1.bf16.msra.mxu0 %v911_v14 }
 0x105   : > { %v1033_v15 = vpop.permute.xlu0 %1032 }
 0x106   : > { %v4282_v16 = vpop.permute.xlu1 %1034 }
 0x107   : > { %1726 = vrot.lane.b32.xlu0 %v4064_v20, %s5290_s20  ;;  %v1050_v17 = vsel %vm5337_vm6, %v1033_v15, %v4282_v16 }
 0x108   : > { %1724 = vrot.lane.b32.xlu1 %v4057_v18, %s5290_s20  ;;  %2764 = vmatprep.subr.bf16.mxu1 %v1050_v17  ;;  %s5296_s20 = smov 77  }
 0x109   : > { %v1031_v19 = vpop.permute.xlu0 %1030 }
 0x10a   : > { %v1049_v21 = vsel %vm5337_vm6, %v1031_v19, %v1033_v15  ;;  %v961_v22 = vpop.permute.xlu1 %960 }
 0x10b   : > { %1866 = vrot.lane.b32.xlu0 %v4260_v6, %s5294_s11  ;;  %2765 = vmatpush1.bf16.msra.mxu1 %v1049_v21  ;;  %v980_v25 = vsel %vm5338_vm5, %v961_v22, %v963_v9 }
 0x10c   : > { %1868 = vrot.lane.b32.xlu1 %v4267_v8, %s5294_s11  ;;  %2676 = vmatprep.subr.bf16.mxu0 %v980_v25 }
 0x10d   : > { %v959_v26 = vpop.permute.xlu0 %958 }
 0x10e   : > { %v979_v28 = vsel %vm5338_vm5, %v959_v26, %v961_v22  ;;  %v1101_v29 = vpop.permute.xlu1 %1100 }
 0x10f   : > { %1864 = vrot.lane.b32.xlu0 %v4192_v37, %s5294_s11  ;;  %2677 = vmatpush1.bf16.msra.mxu0 %v979_v28 }
 0x110   : > { %1794 = vrot.lane.b32.xlu1 %v4137_v24, %s5292_s28 }
 0x111   : > { %v4297_v30 = vpop.permute.xlu0 %1102 }
 0x112   : > { %v1118_v32 = vsel %vm5336_vm7, %v1101_v29, %v4297_v30  ;;  %v1099_v33 = vpop.permute.xlu1 %1098 }
 0x113   : > { %1792 = vrot.lane.b32.xlu0 %v4133_v23, %s5292_s28  ;;  %2766 = vmatprep.subr.bf16.mxu1 %v1118_v32  ;;  %v1117_v34 = vsel %vm5336_vm7, %v1099_v33, %v1101_v29  ;;  %s5298_s28 = smov 61  }
 0x114   : > { %1934 = vrot.lane.b32.xlu1 %v4260_v6, %s5296_s20  ;;  %2767 = vmatpush1.bf16.msra.mxu1 %v1117_v34 }
 0x115   : > { %v1029_v35 = vpop.permute.xlu0 %1028 }
 0x116   : > { %v1048_v36 = vsel %vm5337_vm6, %v1029_v35, %v1031_v19  ;;  %v1027_v38 = vpop.permute.xlu1 %1026 }
 0x117   : > { %1936 = vrot.lane.b32.xlu0 %v4267_v8, %s5296_s20  ;;  %2678 = vmatprep.subr.bf16.mxu0 %v1048_v36  ;;  %v1047_v39 = vsel %vm5337_vm6, %v1027_v38, %v1029_v35 }
 0x118   : > { %1932 = vrot.lane.b32.xlu1 %v4192_v37, %s5296_s20  ;;  %2679 = vmatpush1.bf16.msra.mxu0 %v1047_v39 }
 0x119   : > { %v1169_v40 = vpop.permute.xlu0 %1168 }
 0x11a   : > { %v4316_v42 = vpop.permute.xlu1 %1170 }
 0x11b   : > { %1862 = vrot.lane.b32.xlu0 %v4137_v24, %s5294_s11  ;;  %v1186_v43 = vsel %vm1182_vm8, %v1169_v40, %v4316_v42 }
 0x11c   : > { %1860 = vrot.lane.b32.xlu1 %v4133_v23, %s5294_s11  ;;  %2768 = vmatprep.subr.bf16.mxu1 %v1186_v43  ;;  %s5300_s11 = smov 60  }
 0x11d   : > { %v1167_v44 = vpop.permute.xlu0 %1166 }
 0x11e   : > { %v1185_v45 = vsel %vm1182_vm8, %v1167_v44, %v1169_v40  ;;  %v1097_v47 = vpop.permute.xlu1 %1096 }
 0x11f   : > { %2002 = vrot.lane.b32.xlu0 %v4260_v6, %s5298_s28  ;;  %2769 = vmatpush1.bf16.msra.mxu1 %v1185_v45  ;;  %v1116_v48 = vsel %vm5336_vm7, %v1097_v47, %v1099_v33 }
 0x120   : > { %2004 = vrot.lane.b32.xlu1 %v4267_v8, %s5298_s28  ;;  %2680 = vmatprep.subr.bf16.mxu0 %v1116_v48 }
 0x121   : > { %v1095_v49 = vpop.permute.xlu0 %1094 }
 0x122   : > { %v1115_v50 = vsel %vm5336_vm7, %v1095_v49, %v1097_v47  ;;  %v1237_v52 = vpop.permute.xlu1 %1236 }
 0x123   : > { %2000 = vrot.lane.b32.xlu0 %v4192_v37, %s5298_s28  ;;  %2681 = vmatpush1.bf16.msra.mxu0 %v1115_v50 }
 0x124   : > { %1930 = vrot.lane.b32.xlu1 %v4137_v24, %s5296_s20 }
 0x125   : > { %v4331_v53 = vpop.permute.xlu0 %1238 }
 0x126   : > { %v1254_v54 = vsel %vm1250_vm9, %v1237_v52, %v4331_v53  ;;  %v1235_v55 = vpop.permute.xlu1 %1234 }
 0x127   : > { %1928 = vrot.lane.b32.xlu0 %v4133_v23, %s5296_s20  ;;  %2770 = vmatprep.subr.bf16.mxu1 %v1254_v54  ;;  %v1253_v56 = vsel %vm1250_vm9, %v1235_v55, %v1237_v52  ;;  %s5302_s20 = smov 59  }
 0x128   : > { %2070 = vrot.lane.b32.xlu1 %v4260_v6, %s5300_s11  ;;  %2771 = vmatpush1.bf16.msra.mxu1 %v1253_v56 }
 0x129   : > { %v1165_v57 = vpop.permute.xlu0 %1164 }
 0x12a   : > { %v1184_v58 = vsel %vm1182_vm8, %v1165_v57, %v1167_v44  ;;  %v1163_v59 = vpop.permute.xlu1 %1162 }
 0x12b   : > { %2072 = vrot.lane.b32.xlu0 %v4267_v8, %s5300_s11  ;;  %2682 = vmatprep.subr.bf16.mxu0 %v1184_v58  ;;  %v1183_v61 = vsel %vm1182_vm8, %v1163_v59, %v1165_v57  ;;  %v4440_v58 = vld [vmem:[%s5274_s3 + $0xc] ss:$16 sps:$4 sm:$0xff]  }
 0x12c   : > { %2068 = vrot.lane.b32.xlu1 %v4192_v37, %s5300_s11  ;;  %2683 = vmatpush1.bf16.msra.mxu0 %v1183_v61 }
 0x12d   : > { %v1305_v62 = vpop.permute.xlu0 %1304 }
 0x12e   : > { %v4350_v63 = vpop.permute.xlu1 %1306 }
 0x12f   : > { %1998 = vrot.lane.b32.xlu0 %v4137_v24, %s5298_s28  ;;  %v1322_v0 = vsel %vm1318_vm10, %v1305_v62, %v4350_v63 }
 0x130   : > { %1996 = vrot.lane.b32.xlu1 %v4133_v23, %s5298_s28  ;;  %2772 = vmatprep.subr.bf16.mxu1 %v1322_v0  ;;  %s5304_s28 = smov 43  }
 0x131   : > { %v1303_v1 = vpop.permute.xlu0 %1302 }
 0x132   : > { %v1321_v2 = vsel %vm1318_vm10, %v1303_v1, %v1305_v62  ;;  %v1233_v3 = vpop.permute.xlu1 %1232 }
 0x133   : > { %2138 = vrot.lane.b32.xlu0 %v4260_v6, %s5302_s20  ;;  %2773 = vmatpush1.bf16.msra.mxu1 %v1321_v2  ;;  %v1252_v4 = vsel %vm1250_vm9, %v1233_v3, %v1235_v55  ;;  %v4434_v55 = vld [vmem:[%s5274_s3] ss:$16 sps:$4 sm:$0xff]  }
 0x134   : > { %2140 = vrot.lane.b32.xlu1 %v4267_v8, %s5302_s20  ;;  %2684 = vmatprep.subr.bf16.mxu0 %v1252_v4 }
 0x135   : > { %v1231_v7 = vpop.permute.xlu0 %1230 }
 0x136   : > { %v1251_v9 = vsel %vm1250_vm9, %v1231_v7, %v1233_v3  ;;  %v1373_v10 = vpop.permute.xlu1 %1372 }
 0x137   : > { %2136 = vrot.lane.b32.xlu0 %v4192_v37, %s5302_s20  ;;  %2685 = vmatpush1.bf16.msra.mxu0 %v1251_v9 }
 0x138   : > { %2066 = vrot.lane.b32.xlu1 %v4137_v24, %s5300_s11 }
 0x139   : > { %v4365_v11 = vpop.permute.xlu0 %1374 }
 0x13a   : > { %v1390_v12 = vsel %vm1386_vm11, %v1373_v10, %v4365_v11  ;;  %v1371_v13 = vpop.permute.xlu1 %1370 }
 0x13b   : > { %2064 = vrot.lane.b32.xlu0 %v4133_v23, %s5300_s11  ;;  %2774 = vmatprep.subr.bf16.mxu1 %v1390_v12  ;;  %v1389_v14 = vsel %vm1386_vm11, %v1371_v13, %v1373_v10  ;;  %s5333_s11 = smov 42  }
 0x13c   : > { %2206 = vrot.lane.b32.xlu1 %v4260_v6, %s5304_s28  ;;  %2775 = vmatpush1.bf16.msra.mxu1 %v1389_v14 }
 0x13d   : > { %v1301_v15 = vpop.permute.xlu0 %1300 }
 0x13e   : > { %v1320_v17 = vsel %vm1318_vm10, %v1301_v15, %v1303_v1  ;;  %v1299_v19 = vpop.permute.xlu1 %1298 }
 0x13f   : > { %2208 = vrot.lane.b32.xlu0 %v4267_v8, %s5304_s28  ;;  %2686 = vmatprep.subr.bf16.mxu0 %v1320_v17  ;;  %v1319_v21 = vsel %vm1318_vm10, %v1299_v19, %v1301_v15 }
 0x140   : > { %2204 = vrot.lane.b32.xlu1 %v4192_v37, %s5304_s28  ;;  %2687 = vmatpush1.bf16.msra.mxu0 %v1319_v21 }
 0x141   : > { %v1441_v22 = vpop.permute.xlu0 %1440 }
 0x142   : > { %v4384_v25 = vpop.permute.xlu1 %1442 }
 0x143   : > { %2134 = vrot.lane.b32.xlu0 %v4137_v24, %s5302_s20  ;;  %v1458_v26 = vsel %vm5312_vm12, %v1441_v22, %v4384_v25 }
 0x144   : > { %2132 = vrot.lane.b32.xlu1 %v4133_v23, %s5302_s20  ;;  %2776 = vmatprep.subr.bf16.mxu1 %v1458_v26  ;;  %s5331_s20 = smov 41  }
 0x145   : > { %v1439_v28 = vpop.permute.xlu0 %1438 }
 0x146   : > { %v1457_v29 = vsel %vm5312_vm12, %v1439_v28, %v1441_v22  ;;  %v1369_v32 = vpop.permute.xlu1 %1368 }
 0x147   : > { %2274 = vrot.lane.b32.xlu0 %v4260_v6, %s5333_s11  ;;  %2777 = vmatpush1.bf16.msra.mxu1 %v1457_v29  ;;  %v1388_v33 = vsel %vm1386_vm11, %v1369_v32, %v1371_v13 }
 0x148   : > { %2778 = vmatprep.subr.bf16.mxu1 %v4137_v24  ;;  %2276 = vrot.lane.b32.xlu1 %v4267_v8, %s5333_s11 }
 0x149   : > { %v1367_v34 = vpop.permute.xlu0 %1366  ;;  %2688 = vmatprep.subr.bf16.mxu0 %v1388_v33 }
 0x14a   : > { %v1387_v35 = vsel %vm1386_vm11, %v1367_v34, %v1369_v32  ;;  %v1437_v36 = vpop.permute.xlu1 %1436 }
 0x14b   : > { %2272 = vrot.lane.b32.xlu0 %v4192_v37, %s5333_s11  ;;  %2689 = vmatpush1.bf16.msra.mxu0 %v1387_v35  ;;  %v1456_v38 = vsel %vm5312_vm12, %v1437_v36, %v1439_v28 }
 0x14c   : > { %2779 = vmatpush1.bf16.msra.mxu1 %v4133_v23  ;;  %2202 = vrot.lane.b32.xlu1 %v4137_v24, %s5304_s28 }
 0x14d   : > { %v1435_v39 = vpop.permute.xlu0 %1434  ;;  %2690 = vmatprep.subr.bf16.mxu0 %v1456_v38 }
 0x14e   : > { %v1455_v40 = vsel %vm5312_vm12, %v1435_v39, %v1437_v36  ;;  %v1527_v43 = vpop.permute.xlu1 %1526  ;;  %vm1676_vm12 = vcmask 900096  }
 0x14f   : > { %2200 = vrot.lane.b32.xlu0 %v4133_v23, %s5304_s28  ;;  %2691 = vmatpush1.bf16.msra.mxu0 %v1455_v40  ;;  %s427_s28 = sand.u32 1, %s3798_s21   ;;  %s5360_s21 = smov 49  }
 0x150   : > { %2692 = vmatprep.subr.bf16.mxu0 %v4064_v20  ;;  %2342 = vrot.lane.b32.xlu1 %v4260_v6, %s5331_s20  ;;  %s3600_s8 = smul.u32 24, %s427_s28  ;;  %s5362_s28 = smov 18  }
 0x151   : > { %v4408_v44 = vpop.permute.xlu0 %1528 }
 0x152   : > { %v1544_v45 = vsel %vm5313_vm13, %v1527_v43, %v4408_v44  ;;  %v1525_v47 = vpop.permute.xlu1 %1524  ;;  %s4459_s15 = scalar_lea.vmem [#allocation6], %s3600_s8  ;;  %s5363_s8 = smov 17  }
 0x153   : > { %2344 = vrot.lane.b32.xlu0 %v4267_v8, %s5331_s20  ;;  %2780 = vmatprep.subr.bf16.mxu1 %v1544_v45  ;;  %v1543_v48 = vsel %vm5313_vm13, %v1525_v47, %v1527_v43 }
 0x154   : > { %2693 = vmatpush1.bf16.msra.mxu0 %v4057_v18  ;;  %2340 = vrot.lane.b32.xlu1 %v4192_v37, %s5331_s20 }
 0x155   : > { %v1595_v49 = vpop.permute.xlu0 %1594  ;;  %2781 = vmatpush1.bf16.msra.mxu1 %v1543_v48 }
 0x156   : > { %v4422_v20 = vpop.permute.xlu1 %1596 }
 0x157   : > { %2270 = vrot.lane.b32.xlu0 %v4137_v24, %s5333_s11  ;;  %v1612_v50 = vsel %vm5314_vm14, %v1595_v49, %v4422_v20 }
 0x158   : > { %632 = vrot.lane.b32.xlu1 %v4192_v37, %s5330_s12  ;;  %2782 = vmatprep.subr.bf16.mxu1 %v1612_v50 }
 0x159   : > { %v1593_v52 = vpop.permute.xlu0 %1592 }
 0x15a   : > { %v1611_v18 = vsel %vm5314_vm14, %v1593_v52, %v1595_v49  ;;  %v1523_v54 = vpop.permute.xlu1 %1522 }
 0x15b   : > { %634 = vrot.lane.b32.xlu0 %v4260_v6, %s5330_s12  ;;  %2783 = vmatpush1.bf16.msra.mxu1 %v1611_v18  ;;  %v1542_v56 = vsel %vm5313_vm13, %v1523_v54, %v1525_v47 }
 0x15c   : > { %2268 = vrot.lane.b32.xlu1 %v4133_v23, %s5333_s11  ;;  %2694 = vmatprep.subr.bf16.mxu0 %v1542_v56  ;;  %s5373_s11 = smov 60  }
 0x15d   : > { %v1521_v57 = vpop.permute.xlu0 %1520 }
 0x15e   : > { %v1541_v59 = vsel %vm5313_vm13, %v1521_v57, %v1523_v54  ;;  %v1663_v61 = vpop.permute.xlu1 %1662  ;;  %2785 = vmatmul.mubr.bf16.vlgmr.msra.gmra.mrb[0].mxu1 %v4434_v55  ;;  %vm5316_vm13 = vcmask 891904  }
 0x15f   : > { %630 = vrot.lane.b32.xlu0 %v4137_v24, %s5330_s12  ;;  %2695 = vmatpush1.bf16.msra.mxu0 %v1541_v59 }
 0x160   : > { %3500 = vmatprep.mubr.msk.bf16.mxu1 %vm5315_vm15, %v4440_v58  ;;  %2338 = vrot.lane.b32.xlu1 %v4137_v24, %s5331_s20 }
 0x161   : > { %v4449_v62 = vpop.permute.xlu0 %1664 }
 0x162   : > { %v1680_v0 = vsel %vm1676_vm12, %v1663_v61, %v4449_v62  ;;  %v1661_v1 = vpop.permute.xlu1 %1660 }
 0x163   : > { %700 = vrot.lane.b32.xlu0 %v4192_v37, %s5329_s23  ;;  %2795 = vmatprep.subr.bf16.mxu1 %v1680_v0  ;;  %v1679_v2 = vsel %vm1676_vm12, %v1661_v1, %v1663_v61 }
 0x164   : > { %702 = vrot.lane.b32.xlu1 %v4260_v6, %s5329_s23  ;;  %2796 = vmatpush1.bf16.msra.mxu1 %v1679_v2 }
 0x165   : > { %v1591_v3 = vpop.permute.xlu0 %1590 }
 0x166   : > { %v1610_v4 = vsel %vm5314_vm14, %v1591_v3, %v1593_v52  ;;  %v1589_v7 = vpop.permute.xlu1 %1588 }
 0x167   : > { %2336 = vrot.lane.b32.xlu0 %v4133_v23, %s5331_s20  ;;  %2696 = vmatprep.subr.bf16.mxu0 %v1610_v4  ;;  %v1609_v9 = vsel %vm5314_vm14, %v1589_v7, %v1591_v3  ;;  %vm5317_vm14 = vcmask 646144   ;;  %s5372_s20 = smov 61  }
 0x168   : > { %698 = vrot.lane.b32.xlu1 %v4137_v24, %s5329_s23  ;;  %2697 = vmatpush1.bf16.msra.mxu0 %v1609_v9 }
 0x169   : > { %v1731_v10 = vpop.permute.xlu0 %1730 }
 0x16a   : > { %v4472_v12 = vpop.permute.xlu1 %1732 }
 0x16b   : > { %628 = vrot.lane.b32.xlu0 %v4133_v23, %s5330_s12  ;;  %v1748_v13 = vsel %vm5316_vm13, %v1731_v10, %v4472_v12  ;;  %2699 = vmatmul.mubr.bf16.vlgmr.msra.gmra.mrb[0].mxu0 %v4434_v55  ;;  %s5371_s12 = smov 77  }
 0x16c   : > { %768 = vrot.lane.b32.xlu1 %v4192_v37, %s5328_s25  ;;  %2797 = vmatprep.subr.bf16.mxu1 %v1748_v13 }
 0x16d   : > { %v1729_v14 = vpop.permute.xlu0 %1728  ;;  %3499 = vmatprep.mubr.msk.bf16.mxu0 %vm5315_vm15, %v4440_v58  ;;  %vm5318_vm15 = vcmask 637952  }
 0x16e   : > { %v1747_v15 = vsel %vm5316_vm13, %v1729_v14, %v1731_v10  ;;  %v1659_v17 = vpop.permute.xlu1 %1658 }
 0x16f   : > { %770 = vrot.lane.b32.xlu0 %v4260_v6, %s5328_s25  ;;  %2798 = vmatpush1.bf16.msra.mxu1 %v1747_v15  ;;  %v1678_v19 = vsel %vm1676_vm12, %v1659_v17, %v1661_v1 }
 0x170   : > { %766 = vrot.lane.b32.xlu1 %v4137_v24, %s5328_s25  ;;  %2709 = vmatprep.subr.bf16.mxu0 %v1678_v19 }
 0x171   : > { %v1657_v21 = vpop.permute.xlu0 %1656 }
 0x172   : > { %v1677_v22 = vsel %vm1676_vm12, %v1657_v21, %v1659_v17  ;;  %v1799_v26 = vpop.permute.xlu1 %1798 }
 0x173   : > { %696 = vrot.lane.b32.xlu0 %v4133_v23, %s5329_s23  ;;  %2710 = vmatpush1.bf16.msra.mxu0 %v1677_v22  ;;  %s5369_s23 = smov 79  }
 0x174   : > { %836 = vrot.lane.b32.xlu1 %v4192_v37, %s5327_s14 }
 0x175   : > { %v4490_v28 = vpop.permute.xlu0 %1800 }
 0x176   : > { %v1816_v29 = vsel %vm5317_vm14, %v1799_v26, %v4490_v28  ;;  %v1797_v32 = vpop.permute.xlu1 %1796 }
 0x177   : > { %838 = vrot.lane.b32.xlu0 %v4260_v6, %s5327_s14  ;;  %2799 = vmatprep.subr.bf16.mxu1 %v1816_v29  ;;  %v1815_v33 = vsel %vm5317_vm14, %v1797_v32, %v1799_v26 }
 0x178   : > { %834 = vrot.lane.b32.xlu1 %v4137_v24, %s5327_s14  ;;  %2800 = vmatpush1.bf16.msra.mxu1 %v1815_v33 }
 0x179   : > { %v1727_v34 = vpop.permute.xlu0 %1726 }
 0x17a   : > { %v1746_v35 = vsel %vm5316_vm13, %v1727_v34, %v1729_v14  ;;  %v1725_v36 = vpop.permute.xlu1 %1724 }
 0x17b   : > { %764 = vrot.lane.b32.xlu0 %v4133_v23, %s5328_s25  ;;  %2711 = vmatprep.subr.bf16.mxu0 %v1746_v35  ;;  %v1745_v38 = vsel %vm5316_vm13, %v1725_v36, %v1727_v34  ;;  %vm5319_vm13 = vcmask 629760   ;;  %v4573_v34 = vld [vmem:[%s4054_s9 + $0x1c] ss:$36 sps:$4 sm:$0xff]   ;;  %s5370_s25 = smov 78  }
 0x17c   : > { %904 = vrot.lane.b32.xlu1 %v4192_v37, %s5326_s18  ;;  %2712 = vmatpush1.bf16.msra.mxu0 %v1745_v38 }
 0x17d   : > { %v1867_v39 = vpop.permute.xlu0 %1866 }
 0x17e   : > { %v4509_v40 = vpop.permute.xlu1 %1868 }
 0x17f   : > { %906 = vrot.lane.b32.xlu0 %v4260_v6, %s5326_s18  ;;  %v1884_v43 = vsel %vm5318_vm15, %v1867_v39, %v4509_v40 }
 0x180   : > { %902 = vrot.lane.b32.xlu1 %v4137_v24, %s5326_s18  ;;  %2801 = vmatprep.subr.bf16.mxu1 %v1884_v43 }
 0x181   : > { %v1865_v45 = vpop.permute.xlu0 %1864 }
 0x182   : > { %v1883_v47 = vsel %vm5318_vm15, %v1865_v45, %v1867_v39  ;;  %v1795_v48 = vpop.permute.xlu1 %1794 }
 0x183   : > { %832 = vrot.lane.b32.xlu0 %v4133_v23, %s5327_s14  ;;  %2802 = vmatpush1.bf16.msra.mxu1 %v1883_v47  ;;  %v1814_v49 = vsel %vm5317_vm14, %v1795_v48, %v1797_v32  ;;  %s5366_s14 = smov 111  }
 0x184   : > { %972 = vrot.lane.b32.xlu1 %v4192_v37, %s5325_s13  ;;  %2713 = vmatprep.subr.bf16.mxu0 %v1814_v49 }
 0x185   : > { %v1793_v50 = vpop.permute.xlu0 %1792 }
 0x186   : > { %v1813_v52 = vsel %vm5317_vm14, %v1793_v50, %v1795_v48  ;;  %v1935_v18 = vpop.permute.xlu1 %1934  ;;  %vm5320_vm14 = vcmask 498688  }
 0x187   : > { %974 = vrot.lane.b32.xlu0 %v4260_v6, %s5325_s13  ;;  %2714 = vmatpush1.bf16.msra.mxu0 %v1813_v52 }
 0x188   : > { %970 = vrot.lane.b32.xlu1 %v4137_v24, %s5325_s13 }
 0x189   : > { %v4524_v54 = vpop.permute.xlu0 %1936 }
 0x18a   : > { %v1952_v56 = vsel %vm5319_vm13, %v1935_v18, %v4524_v54  ;;  %v1933_v57 = vpop.permute.xlu1 %1932 }
 0x18b   : > { %900 = vrot.lane.b32.xlu0 %v4133_v23, %s5326_s18  ;;  %2803 = vmatprep.subr.bf16.mxu1 %v1952_v56  ;;  %v1951_v59 = vsel %vm5319_vm13, %v1933_v57, %v1935_v18  ;;  %s5367_s18 = smov 110  }
 0x18c   : > { %1040 = vrot.lane.b32.xlu1 %v4192_v37, %s5324_s27  ;;  %2804 = vmatpush1.bf16.msra.mxu1 %v1951_v59 }
 0x18d   : > { %v1863_v61 = vpop.permute.xlu0 %1862 }
 0x18e   : > { %v1882_v0 = vsel %vm5318_vm15, %v1863_v61, %v1865_v45  ;;  %v1861_v1 = vpop.permute.xlu1 %1860 }
 0x18f   : > { %1042 = vrot.lane.b32.xlu0 %v4260_v6, %s5324_s27  ;;  %2715 = vmatprep.subr.bf16.mxu0 %v1882_v0  ;;  %v1881_v2 = vsel %vm5318_vm15, %v1861_v1, %v1863_v61  ;;  %vm5321_vm15 = vcmask 490496  }
 0x190   : > { %1038 = vrot.lane.b32.xlu1 %v4137_v24, %s5324_s27  ;;  %2716 = vmatpush1.bf16.msra.mxu0 %v1881_v2 }
 0x191   : > { %v2003_v3 = vpop.permute.xlu0 %2002 }
 0x192   : > { %v4543_v4 = vpop.permute.xlu1 %2004 }
 0x193   : > { %968 = vrot.lane.b32.xlu0 %v4133_v23, %s5325_s13  ;;  %v2020_v7 = vsel %vm5320_vm14, %v2003_v3, %v4543_v4  ;;  %s5368_s13 = smov 109  }
 0x194   : > { %1108 = vrot.lane.b32.xlu1 %v4192_v37, %s5322_s19  ;;  %2805 = vmatprep.subr.bf16.mxu1 %v2020_v7 }
 0x195   : > { %v2001_v9 = vpop.permute.xlu0 %2000 }
 0x196   : > { %v2019_v10 = vsel %vm5320_vm14, %v2001_v9, %v2003_v3  ;;  %v1931_v13 = vpop.permute.xlu1 %1930 }
 0x197   : > { %1110 = vrot.lane.b32.xlu0 %v4260_v6, %s5322_s19  ;;  %2806 = vmatpush1.bf16.msra.mxu1 %v2019_v10  ;;  %v1950_v14 = vsel %vm5319_vm13, %v1931_v13, %v1933_v57 }
 0x198   : > { %1106 = vrot.lane.b32.xlu1 %v4137_v24, %s5322_s19  ;;  %2717 = vmatprep.subr.bf16.mxu0 %v1950_v14 }
 0x199   : > { %v1929_v15 = vpop.permute.xlu0 %1928 }
 0x19a   : > { %v1949_v17 = vsel %vm5319_vm13, %v1929_v15, %v1931_v13  ;;  %v2071_v19 = vpop.permute.xlu1 %2070  ;;  %vm5323_vm13 = vcmask 482304  }
 0x19b   : > { %1036 = vrot.lane.b32.xlu0 %v4133_v23, %s5324_s27  ;;  %2718 = vmatpush1.bf16.msra.mxu0 %v1949_v17  ;;  %s5365_s27 = smov 127  }
 0x19c   : > { %1176 = vrot.lane.b32.xlu1 %v4192_v37, %s5360_s21 }
 0x19d   : > { %v4558_v21 = vpop.permute.xlu0 %2072 }
 0x19e   : > { %v2088_v22 = vsel %vm5321_vm15, %v2071_v19, %v4558_v21  ;;  %v2069_v26 = vpop.permute.xlu1 %2068 }
 0x19f   : > { %1178 = vrot.lane.b32.xlu0 %v4260_v6, %s5360_s21  ;;  %2807 = vmatprep.subr.bf16.mxu1 %v2088_v22  ;;  %v2087_v29 = vsel %vm5321_vm15, %v2069_v26, %v2071_v19 }
 0x1a0   : > { %1174 = vrot.lane.b32.xlu1 %v4137_v24, %s5360_s21  ;;  %2808 = vmatpush1.bf16.msra.mxu1 %v2087_v29 }
 0x1a1   : > { %v1999_v32 = vpop.permute.xlu0 %1998 }
 0x1a2   : > { %v2018_v33 = vsel %vm5320_vm14, %v1999_v32, %v2001_v9  ;;  %v1997_v35 = vpop.permute.xlu1 %1996 }
 0x1a3   : > { %1104 = vrot.lane.b32.xlu0 %v4133_v23, %s5322_s19  ;;  %2719 = vmatprep.subr.bf16.mxu0 %v2018_v33  ;;  %v2017_v36 = vsel %vm5320_vm14, %v1997_v35, %v1999_v32  ;;  %vm2220_vm14 = vcmask 351232   ;;  %s5364_s19 = smov 1  }
 0x1a4   : > { %1244 = vrot.lane.b32.xlu1 %v4267_v8, %s5361_s6  ;;  %2720 = vmatpush1.bf16.msra.mxu0 %v2017_v36  ;;  %v4644_v36 = vld [vmem:[%s5274_s3 + $0x8] ss:$16 sps:$4 sm:$0xff]  }
 0x1a5   : > { %v2139_v38 = vpop.permute.xlu0 %2138 }
 0x1a6   : > { %v4580_v24 = vpop.permute.xlu1 %2140 }
 0x1a7   : > { %1246 = vrot.lane.b32.xlu0 %v4573_v34, %s5361_s6  ;;  %v2156_v39 = vsel %vm5323_vm13, %v2139_v38, %v4580_v24 }
 0x1a8   : > { %1242 = vrot.lane.b32.xlu1 %v4260_v6, %s5361_s6  ;;  %2809 = vmatprep.subr.bf16.mxu1 %v2156_v39 }
 0x1a9   : > { %v2137_v43 = vpop.permute.xlu0 %2136 }
 0x1aa   : > { %v2155_v45 = vsel %vm5323_vm13, %v2137_v43, %v2139_v38  ;;  %v2067_v47 = vpop.permute.xlu1 %2066 }
 0x1ab   : > { %1172 = vrot.lane.b32.xlu0 %v4133_v23, %s5360_s21  ;;  %2810 = vmatpush1.bf16.msra.mxu1 %v2155_v45  ;;  %v2086_v48 = vsel %vm5321_vm15, %v2067_v47, %v2069_v26  ;;  %v4634_v26 = vld [vmem:[%s4054_s9 + $0x20] ss:$36 sps:$4 sm:$0xff]  }
 0x1ac   : > { %1312 = vrot.lane.b32.xlu1 %v4267_v8, %s5362_s28  ;;  %2721 = vmatprep.subr.bf16.mxu0 %v2086_v48 }
 0x1ad   : > { %v2065_v49 = vpop.permute.xlu0 %2064 }
 0x1ae   : > { %v2085_v50 = vsel %vm5321_vm15, %v2065_v49, %v2067_v47  ;;  %v2207_v52 = vpop.permute.xlu1 %2206  ;;  %vm2288_vm15 = vcmask 343040  }
 0x1af   : > { %1314 = vrot.lane.b32.xlu0 %v4573_v34, %s5362_s28  ;;  %2722 = vmatpush1.bf16.msra.mxu0 %v2085_v50 }
 0x1b0   : > { %1310 = vrot.lane.b32.xlu1 %v4260_v6, %s5362_s28 }
 0x1b1   : > { %v4595_v18 = vpop.permute.xlu0 %2208 }
 0x1b2   : > { %v2224_v23 = vsel %vm2220_vm14, %v2207_v52, %v4595_v18  ;;  %v2205_v56 = vpop.permute.xlu1 %2204 }
 0x1b3   : > { %1240 = vrot.lane.b32.xlu0 %v4192_v37, %s5361_s6  ;;  %2811 = vmatprep.subr.bf16.mxu1 %v2224_v23  ;;  %v2223_v57 = vsel %vm2220_vm14, %v2205_v56, %v2207_v52 }
 0x1b4   : > { %1380 = vrot.lane.b32.xlu1 %v4267_v8, %s5363_s8  ;;  %2812 = vmatpush1.bf16.msra.mxu1 %v2223_v57 }
 0x1b5   : > { %v2135_v59 = vpop.permute.xlu0 %2134 }
 0x1b6   : > { %v2154_v61 = vsel %vm5323_vm13, %v2135_v59, %v2137_v43  ;;  %v2133_v0 = vpop.permute.xlu1 %2132 }
 0x1b7   : > { %1382 = vrot.lane.b32.xlu0 %v4573_v34, %s5363_s8  ;;  %2723 = vmatprep.subr.bf16.mxu0 %v2154_v61  ;;  %v2153_v1 = vsel %vm5323_vm13, %v2133_v0, %v2135_v59  ;;  %vm2356_vm13 = vcmask 334848  }
 0x1b8   : > { %1378 = vrot.lane.b32.xlu1 %v4260_v6, %s5363_s8  ;;  %2724 = vmatpush1.bf16.msra.mxu0 %v2153_v1 }
 0x1b9   : > { %v2275_v2 = vpop.permute.xlu0 %2274 }
 0x1ba   : > { %v4614_v3 = vpop.permute.xlu1 %2276 }
 0x1bb   : > { %1308 = vrot.lane.b32.xlu0 %v4192_v37, %s5362_s28  ;;  %v2292_v7 = vsel %vm2288_vm15, %v2275_v2, %v4614_v3 }
 0x1bc   : > { %1448 = vrot.lane.b32.xlu1 %v4267_v8, %s5364_s19  ;;  %2813 = vmatprep.subr.bf16.mxu1 %v2292_v7 }
 0x1bd   : > { %v2273_v9 = vpop.permute.xlu0 %2272 }
 0x1be   : > { %v2291_v10 = vsel %vm2288_vm15, %v2273_v9, %v2275_v2  ;;  %v2203_v13 = vpop.permute.xlu1 %2202 }
 0x1bf   : > { %1450 = vrot.lane.b32.xlu0 %v4573_v34, %s5364_s19  ;;  %2814 = vmatpush1.bf16.msra.mxu1 %v2291_v10  ;;  %v2222_v14 = vsel %vm2220_vm14, %v2203_v13, %v2205_v56 }
 0x1c0   : > { %1446 = vrot.lane.b32.xlu1 %v4260_v6, %s5364_s19  ;;  %2725 = vmatprep.subr.bf16.mxu0 %v2222_v14 }
 0x1c1   : > { %v2201_v15 = vpop.permute.xlu0 %2200 }
 0x1c2   : > { %v2221_v17 = vsel %vm2220_vm14, %v2201_v15, %v2203_v13  ;;  %v2343_v19 = vpop.permute.xlu1 %2342  ;;  %v4695_v13 = vld [vmem:[%s5274_s3 + $0x4] ss:$16 sps:$4 sm:$0xff]  }
 0x1c3   : > { %1376 = vrot.lane.b32.xlu0 %v4192_v37, %s5363_s8  ;;  %2726 = vmatpush1.bf16.msra.mxu0 %v2221_v17  ;;  %v4708_v15 = vld [vmem:[%s4459_s15 + $0x4] ss:$12 sps:$4 sm:$0xff]  }
 0x1c4   : > { %1444 = vrot.lane.b32.xlu1 %v4192_v37, %s5364_s19 }
 0x1c5   : > { %v4629_v22 = vpop.permute.xlu0 %2344 }
 0x1c6   : > { %v2360_v29 = vsel %vm2356_vm13, %v2343_v19, %v4629_v22  ;;  %v2341_v32 = vpop.permute.xlu1 %2340 }
 0x1c7   : > { %1534 = vrot.lane.b32.xlu0 %v4573_v34, %s5365_s27  ;;  %2815 = vmatprep.subr.bf16.mxu1 %v2360_v29  ;;  %v2359_v33 = vsel %vm2356_vm13, %v2341_v32, %v2343_v19 }
 0x1c8   : > { %1536 = vrot.lane.b32.xlu1 %v4634_v26, %s5365_s27  ;;  %2816 = vmatpush1.bf16.msra.mxu1 %v2359_v33 }
 0x1c9   : > { %v2271_v35 = vpop.permute.xlu0 %2270 }
 0x1ca   : > { %v2290_v37 = vsel %vm2288_vm15, %v2271_v35, %v2273_v9  ;;  %v633_v38 = vpop.permute.xlu1 %632 }
 0x1cb   : > { %1532 = vrot.lane.b32.xlu0 %v4267_v8, %s5365_s27  ;;  %2727 = vmatprep.subr.bf16.mxu0 %v2290_v37 }
 0x1cc   : > { %2828 = vmatmul.mubr.bf16.vlgmr.msra.gmra.mrb[0].mxu1 %v4644_v36  ;;  %1602 = vrot.lane.b32.xlu1 %v4573_v34, %s5366_s14 }
 0x1cd   : > { %v4651_v39 = vpop.permute.xlu0 %634  ;;  %2956 = vmatprep.mubr.bf16.mxu1 %v4213_v46 }
 0x1ce   : > { %v646_v43 = vsel %vm638_vm0, %v633_v38, %v4651_v39  ;;  %v2269_v45 = vpop.permute.xlu1 %2268 }
 0x1cf   : > { %1604 = vrot.lane.b32.xlu0 %v4634_v26, %s5366_s14  ;;  %2924 = vmatprep.subr.bf16.mxu1 %v646_v43  ;;  %v2289_v47 = vsel %vm2288_vm15, %v2269_v45, %v2271_v35  ;;  %v3866_v45 = vmov 0  }
 0x1d0   : > { %1600 = vrot.lane.b32.xlu1 %v4267_v8, %s5366_s14  ;;  %2728 = vmatpush1.bf16.msra.mxu0 %v2289_v47 }
 0x1d1   : > { %v631_v48 = vpop.permute.xlu0 %630  ;;  %3717 = vset.pattern.permute.xlu1 %v3866_v45  ;;  %3716 = vset.pattern.permute.xlu0 %v3866_v45 }
 0x1d2   : > { %v645_v49 = vsel %vm638_vm0, %v631_v48, %v633_v38  ;;  %v2339_v50 = vpop.permute.xlu1 %2338 }
 0x1d3   : > { %1530 = vrot.lane.b32.xlu0 %v4260_v6, %s5365_s27  ;;  %2925 = vmatpush1.bf16.msra.mxu1 %v645_v49  ;;  %v2358_v46 = vsel %vm2356_vm13, %v2339_v50, %v2341_v32 }
 0x1d4   : > { %1670 = vrot.lane.b32.xlu1 %v4573_v34, %s5367_s18  ;;  %2729 = vmatprep.subr.bf16.mxu0 %v2358_v46 }
 0x1d5   : > { %v701_v52 = vpop.permute.xlu0 %700 }
 0x1d6   : > { %v4672_v23 = vpop.permute.xlu1 %702 }
 0x1d7   : > { %1672 = vrot.lane.b32.xlu0 %v4634_v26, %s5367_s18  ;;  %v714_v56 = vsel %vm706_vm1, %v701_v52, %v4672_v23 }
 0x1d8   : > { %1668 = vrot.lane.b32.xlu1 %v4267_v8, %s5367_s18  ;;  %2926 = vmatprep.subr.bf16.mxu1 %v714_v56 }
 0x1d9   : > { %v2337_v57 = vpop.permute.xlu0 %2336 }
 0x1da   : > { %v2357_v59 = vsel %vm2356_vm13, %v2337_v57, %v2339_v50  ;;  %v699_v61 = vpop.permute.xlu1 %698 }
 0x1db   : > { %1598 = vrot.lane.b32.xlu0 %v4260_v6, %s5366_s14  ;;  %2730 = vmatpush1.bf16.msra.mxu0 %v2357_v59  ;;  %v713_v0 = vsel %vm706_vm1, %v699_v61, %v701_v52 }
 0x1dc   : > { %1738 = vrot.lane.b32.xlu1 %v4573_v34, %s5368_s13  ;;  %2927 = vmatpush1.bf16.msra.mxu1 %v713_v0 }
 0x1dd   : > { %v629_v1 = vpop.permute.xlu0 %628 }
 0x1de   : > { %v644_v2 = vsel %vm638_vm0, %v629_v1, %v631_v48  ;;  %v643_v7 = vsel %vm638_vm0, %v4170_v27, %v629_v1  ;;  %v769_v9 = vpop.permute.xlu1 %768  ;;  %2742 = vmatmul.mubr.bf16.vlgmr.msra.gmra.mrb[0].mxu0 %v4644_v36  ;;  %v4701_v27 = vld [vmem:[%s4459_s15] ss:$12 sps:$4 sm:$0xff]  }
 0x1df   : > { %1740 = vrot.lane.b32.xlu0 %v4634_v26, %s5368_s13  ;;  %2838 = vmatprep.subr.bf16.mxu0 %v644_v2 }
 0x1e0   : > { %2839 = vmatpush1.bf16.msra.mxu0 %v643_v7  ;;  %2870 = vmatprep.mubr.bf16.mxu0 %v4695_v13 }
 0x1e1   : > { %v4690_v10 = vpop.permute.xlu0 %770  ;;  %1736 = vrot.lane.b32.xlu1 %v4267_v8, %s5368_s13 }
 0x1e2   : > { %v782_v14 = vsel %vm774_vm2, %v769_v9, %v4690_v10  ;;  %v767_v17 = vpop.permute.xlu1 %766 }
 0x1e3   : > { %1666 = vrot.lane.b32.xlu0 %v4260_v6, %s5367_s18  ;;  %2928 = vmatprep.subr.bf16.mxu1 %v782_v14  ;;  %v781_v19 = vsel %vm774_vm2, %v767_v17, %v769_v9 }
 0x1e4   : > { %2929 = vmatpush1.bf16.msra.mxu1 %v781_v19 }
 0x1e5   : > { %v697_v29 = vpop.permute.xlu0 %696  ;;  %1806 = vrot.lane.b32.xlu1 %v4701_v27, %s5369_s23 }
 0x1e6   : > { %v712_v8 = vsel %vm706_vm1, %v697_v29, %v699_v61  ;;  %v711_v32 = vsel %vm706_vm1, %v4179_v31, %v697_v29  ;;  %v837_v33 = vpop.permute.xlu1 %836 }
 0x1e7   : > { %1808 = vrot.lane.b32.xlu0 %v4708_v15, %s5369_s23  ;;  %2840 = vmatprep.subr.bf16.mxu0 %v712_v8 }
 0x1e8   : > { %2841 = vmatpush1.bf16.msra.mxu0 %v711_v32 }
 0x1e9   : > { %v4718_v35 = vpop.permute.xlu0 %838  ;;  %1804 = vrot.lane.b32.xlu1 %v4634_v26, %s5369_s23 }
 0x1ea   : > { %v850_v37 = vsel %vm5340_vm3, %v837_v33, %v4718_v35  ;;  %v835_v38 = vpop.permute.xlu1 %834 }
 0x1eb   : > { %1734 = vrot.lane.b32.xlu0 %v4260_v6, %s5368_s13  ;;  %2930 = vmatprep.subr.bf16.mxu1 %v850_v37  ;;  %v849_v31 = vsel %vm5340_vm3, %v835_v38, %v837_v33 }
 0x1ec   : > { %2931 = vmatpush1.bf16.msra.mxu1 %v849_v31 }
 0x1ed   : > { %v765_v43 = vpop.permute.xlu0 %764  ;;  %1874 = vrot.lane.b32.xlu1 %v4701_v27, %s5370_s25 }
 0x1ee   : > { %v780_v47 = vsel %vm774_vm2, %v765_v43, %v767_v17  ;;  %v779_v48 = vsel %vm774_vm2, %v4201_v41, %v765_v43  ;;  %v905_v6 = vpop.permute.xlu1 %904 }
 0x1ef   : > { %1876 = vrot.lane.b32.xlu0 %v4708_v15, %s5370_s25  ;;  %2842 = vmatprep.subr.bf16.mxu0 %v780_v47 }
 0x1f0   : > { %2843 = vmatpush1.bf16.msra.mxu0 %v779_v48 }
 0x1f1   : > { %v4736_v49 = vpop.permute.xlu0 %906  ;;  %1872 = vrot.lane.b32.xlu1 %v4634_v26, %s5370_s25 }
 0x1f2   : > { %v918_v50 = vsel %vm5339_vm4, %v905_v6, %v4736_v49  ;;  %v903_v46 = vpop.permute.xlu1 %902 }
 0x1f3   : > { %1802 = vrot.lane.b32.xlu0 %v4573_v34, %s5369_s23  ;;  %2932 = vmatprep.subr.bf16.mxu1 %v918_v50  ;;  %v917_v41 = vsel %vm5339_vm4, %v903_v46, %v905_v6 }
 0x1f4   : > { %2933 = vmatpush1.bf16.msra.mxu1 %v917_v41 }
 0x1f5   : > { %v833_v52 = vpop.permute.xlu0 %832  ;;  %1942 = vrot.lane.b32.xlu1 %v4701_v27, %s5371_s12 }
 0x1f6   : > { %v848_v56 = vsel %vm5340_vm3, %v833_v52, %v835_v38  ;;  %v847_v57 = vsel %vm5340_vm3, %v4223_v51, %v833_v52  ;;  %v973_v59 = vpop.permute.xlu1 %972 }
 0x1f7   : > { %1944 = vrot.lane.b32.xlu0 %v4708_v15, %s5371_s12  ;;  %2844 = vmatprep.subr.bf16.mxu0 %v848_v56 }
 0x1f8   : > { %2845 = vmatpush1.bf16.msra.mxu0 %v847_v57 }
 0x1f9   : > { %v4752_v61 = vpop.permute.xlu0 %974  ;;  %1940 = vrot.lane.b32.xlu1 %v4634_v26, %s5371_s12 }
 0x1fa   : > { %v986_v0 = vsel %vm5338_vm5, %v973_v59, %v4752_v61  ;;  %v971_v1 = vpop.permute.xlu1 %970 }
 0x1fb   : > { %1870 = vrot.lane.b32.xlu0 %v4573_v34, %s5370_s25  ;;  %2934 = vmatprep.subr.bf16.mxu1 %v986_v0  ;;  %v985_v51 = vsel %vm5338_vm5, %v971_v1, %v973_v59 }
 0x1fc   : > { %2935 = vmatpush1.bf16.msra.mxu1 %v985_v51 }
 0x1fd   : > { %v901_v2 = vpop.permute.xlu0 %900  ;;  %2010 = vrot.lane.b32.xlu1 %v4701_v27, %s5372_s20 }
 0x1fe   : > { %v916_v7 = vsel %vm5339_vm4, %v901_v2, %v903_v46  ;;  %v915_v9 = vsel %vm5339_vm4, %v4242_v60, %v901_v2  ;;  %v1041_v14 = vpop.permute.xlu1 %1040 }
 0x1ff   : > { %2012 = vrot.lane.b32.xlu0 %v4708_v15, %s5372_s20  ;;  %2846 = vmatprep.subr.bf16.mxu0 %v916_v7 }
 0x200   : > { %2847 = vmatpush1.bf16.msra.mxu0 %v915_v9 }
 0x201   : > { %v4768_v17 = vpop.permute.xlu0 %1042  ;;  %2008 = vrot.lane.b32.xlu1 %v4634_v26, %s5372_s20 }
 0x202   : > { %v1054_v19 = vsel %vm5337_vm6, %v1041_v14, %v4768_v17  ;;  %v1039_v29 = vpop.permute.xlu1 %1038 }
 0x203   : > { %1938 = vrot.lane.b32.xlu0 %v4573_v34, %s5371_s12  ;;  %2936 = vmatprep.subr.bf16.mxu1 %v1054_v19  ;;  %v1053_v60 = vsel %vm5337_vm6, %v1039_v29, %v1041_v14 }
 0x204   : > { %2937 = vmatpush1.bf16.msra.mxu1 %v1053_v60 }
 0x205   : > { %v969_v8 = vpop.permute.xlu0 %968  ;;  %2078 = vrot.lane.b32.xlu1 %v4701_v27, %s5373_s11 }
 0x206   : > { %v984_v32 = vsel %vm5338_vm5, %v969_v8, %v971_v1  ;;  %v983_v33 = vsel %vm5338_vm5, %v4257_v5, %v969_v8  ;;  %v1109_v37 = vpop.permute.xlu1 %1108  ;;  %vm5383_vm5 = vcmask 1039360  }
 0x207   : > { %2080 = vrot.lane.b32.xlu0 %v4708_v15, %s5373_s11  ;;  %2848 = vmatprep.subr.bf16.mxu0 %v984_v32 }
 0x208   : > { %2849 = vmatpush1.bf16.msra.mxu0 %v983_v33 }
 0x209   : > { %v4784_v38 = vpop.permute.xlu0 %1110  ;;  %2076 = vrot.lane.b32.xlu1 %v4634_v26, %s5373_s11 }
 0x20a   : > { %v1122_v31 = vsel %vm5336_vm7, %v1109_v37, %v4784_v38  ;;  %v1107_v43 = vpop.permute.xlu1 %1106 }
 0x20b   : > { %2006 = vrot.lane.b32.xlu0 %v4573_v34, %s5372_s20  ;;  %2938 = vmatprep.subr.bf16.mxu1 %v1122_v31  ;;  %v1121_v5 = vsel %vm5336_vm7, %v1107_v43, %v1109_v37 }
 0x20c   : > { %2939 = vmatpush1.bf16.msra.mxu1 %v1121_v5 }
 0x20d   : > { %v1037_v47 = vpop.permute.xlu0 %1036  ;;  %2146 = vrot.lane.b32.xlu1 %v4701_v27, %s5374_s0 }
 0x20e   : > { %v1052_v48 = vsel %vm5337_vm6, %v1037_v47, %v1039_v29  ;;  %v1051_v6 = vsel %vm5337_vm6, %v4282_v16, %v1037_v47  ;;  %v1177_v50 = vpop.permute.xlu1 %1176 }
 0x20f   : > { %2148 = vrot.lane.b32.xlu0 %v4708_v15, %s5374_s0  ;;  %2850 = vmatprep.subr.bf16.mxu0 %v1052_v48 }
 0x210   : > { %2851 = vmatpush1.bf16.msra.mxu0 %v1051_v6 }
 0x211   : > { %v4800_v46 = vpop.permute.xlu0 %1178  ;;  %2144 = vrot.lane.b32.xlu1 %v4634_v26, %s5374_s0 }
 0x212   : > { %v1190_v41 = vsel %vm1182_vm8, %v1177_v50, %v4800_v46  ;;  %v1175_v52 = vpop.permute.xlu1 %1174 }
 0x213   : > { %2074 = vrot.lane.b32.xlu0 %v4573_v34, %s5373_s11  ;;  %2940 = vmatprep.subr.bf16.mxu1 %v1190_v41  ;;  %v1189_v16 = vsel %vm1182_vm8, %v1175_v52, %v1177_v50 }
 0x214   : > { %2941 = vmatpush1.bf16.msra.mxu1 %v1189_v16  ;;  %v4871_v16 = vld [vmem:[%s4054_s9 + $0x18] ss:$36 sps:$4 sm:$0xff]  }
 0x215   : > { %v1105_v56 = vpop.permute.xlu0 %1104  ;;  %2214 = vrot.lane.b32.xlu1 %v4701_v27, %s5375_s1 }
 0x216   : > { %v1119_v57 = vsel %vm5336_vm7, %v4297_v30, %v1105_v56  ;;  %v1120_v59 = vsel %vm5336_vm7, %v1105_v56, %v1107_v43  ;;  %v1245_v0 = vpop.permute.xlu1 %1244  ;;  %vm5378_vm7 = vcmask 7168  }
 0x217   : > { %2216 = vrot.lane.b32.xlu0 %v4708_v15, %s5375_s1  ;;  %2852 = vmatprep.subr.bf16.mxu0 %v1120_v59  ;;  %vm5379_vm6 = vmmov %vm5378_vm7 }
 0x218   : > { %2853 = vmatpush1.bf16.msra.mxu0 %v1119_v57 }
 0x219   : > { %v4816_v1 = vpop.permute.xlu0 %1246  ;;  %2212 = vrot.lane.b32.xlu1 %v4634_v26, %s5375_s1 }
 0x21a   : > { %v1258_v51 = vsel %vm1250_vm9, %v1245_v0, %v4816_v1  ;;  %v1243_v30 = vpop.permute.xlu1 %1242 }
 0x21b   : > { %2142 = vrot.lane.b32.xlu0 %v4573_v34, %s5374_s0  ;;  %2942 = vmatprep.subr.bf16.mxu1 %v1258_v51  ;;  %v1257_v2 = vsel %vm1250_vm9, %v1243_v30, %v1245_v0 }
 0x21c   : > { %2943 = vmatpush1.bf16.msra.mxu1 %v1257_v2 }
 0x21d   : > { %v1173_v7 = vpop.permute.xlu0 %1172  ;;  %2282 = vrot.lane.b32.xlu1 %v4701_v27, %s5376_s2 }
 0x21e   : > { %v1187_v9 = vsel %vm1182_vm8, %v4316_v42, %v1173_v7  ;;  %v1188_v14 = vsel %vm1182_vm8, %v1173_v7, %v1175_v52  ;;  %v1313_v19 = vpop.permute.xlu1 %1312 }
 0x21f   : > { %2284 = vrot.lane.b32.xlu0 %v4708_v15, %s5376_s2  ;;  %2854 = vmatprep.subr.bf16.mxu0 %v1188_v14 }
 0x220   : > { %2855 = vmatpush1.bf16.msra.mxu0 %v1187_v9 }
 0x221   : > { %v4832_v29 = vpop.permute.xlu0 %1314  ;;  %2280 = vrot.lane.b32.xlu1 %v4634_v26, %s5376_s2 }
 0x222   : > { %v1326_v60 = vsel %vm1318_vm10, %v1313_v19, %v4832_v29  ;;  %v1311_v42 = vpop.permute.xlu1 %1310 }
 0x223   : > { %2210 = vrot.lane.b32.xlu0 %v4573_v34, %s5375_s1  ;;  %2944 = vmatprep.subr.bf16.mxu1 %v1326_v60  ;;  %v1325_v8 = vsel %vm1318_vm10, %v1311_v42, %v1313_v19  ;;  %v3747_v19 = vld [vmem:[%s4054_s9 + $0x14] ss:$36 sps:$4 sm:$0xff]  }
 0x224   : > { %2945 = vmatpush1.bf16.msra.mxu1 %v1325_v8 }
 0x225   : > { %v1241_v32 = vpop.permute.xlu0 %1240  ;;  %2350 = vrot.lane.b32.xlu1 %v4701_v27, %s5377_s30 }
 0x226   : > { %v1255_v33 = vsel %vm1250_vm9, %v4331_v53, %v1241_v32  ;;  %v1256_v37 = vsel %vm1250_vm9, %v1241_v32, %v1243_v30  ;;  %v1381_v31 = vpop.permute.xlu1 %1380 }
 0x227   : > { %2352 = vrot.lane.b32.xlu0 %v4708_v15, %s5377_s30  ;;  %2856 = vmatprep.subr.bf16.mxu0 %v1256_v37 }
 0x228   : > { %2857 = vmatpush1.bf16.msra.mxu0 %v1255_v33 }
 0x229   : > { %v4848_v43 = vpop.permute.xlu0 %1382  ;;  %2348 = vrot.lane.b32.xlu1 %v4634_v26, %s5377_s30 }
 0x22a   : > { %v1394_v5 = vsel %vm1386_vm11, %v1381_v31, %v4848_v43  ;;  %v1379_v53 = vpop.permute.xlu1 %1378 }
 0x22b   : > { %2278 = vrot.lane.b32.xlu0 %v4573_v34, %s5376_s2  ;;  %2946 = vmatprep.subr.bf16.mxu1 %v1394_v5  ;;  %v1393_v47 = vsel %vm1386_vm11, %v1379_v53, %v1381_v31 }
 0x22c   : > { %2947 = vmatpush1.bf16.msra.mxu1 %v1393_v47 }
 0x22d   : > { %v1309_v15 = vpop.permute.xlu0 %1308  ;;  %1674 = vrot.lane.b32.xlu1 %v4701_v27, %s5367_s18  ;;  %s5380_s18 = smov 87  }
 0x22e   : > { %v1323_v48 = vsel %vm1318_vm10, %v4350_v63, %v1309_v15  ;;  %v1324_v6 = vsel %vm1318_vm10, %v1309_v15, %v1311_v42  ;;  %v1449_v50 = vpop.permute.xlu1 %1448  ;;  %v4876_v63 = vld [vmem:[%s4459_s15 + $0x8] ss:$12 sps:$4 sm:$0xff]   ;;  %s5382_s15 = smov 86  }
 0x22f   : > { %2346 = vrot.lane.b32.xlu0 %v4573_v34, %s5377_s30  ;;  %2858 = vmatprep.subr.bf16.mxu0 %v1324_v6  ;;  %v3748_v42 = vld [vmem:[%s4054_s9 + $0x10] ss:$36 sps:$4 sm:$0xff]   ;;  %s5389_s9 = smov 69  }
 0x230   : > { %2859 = vmatpush1.bf16.msra.mxu0 %v1323_v48 }
 0x231   : > { %v4864_v41 = vpop.permute.xlu0 %1450  ;;  %1742 = vrot.lane.b32.xlu1 %v4701_v27, %s5368_s13 }
 0x232   : > { %v1462_v52 = vsel %vm5378_vm7, %v1449_v50, %v4864_v41  ;;  %v1447_v56 = vpop.permute.xlu1 %1446  ;;  %vm5381_vm7 = vmmov %vm5379_vm6 }
 0x233   : > { %1180 = vrot.lane.b32.xlu0 %v4871_v16, %s5360_s21  ;;  %2948 = vmatprep.subr.bf16.mxu1 %v1462_v52  ;;  %v1461_v57 = vsel %vm5379_vm6, %v1447_v56, %v1449_v50  ;;  %s5385_s21 = smov 85  }
 0x234   : > { %2949 = vmatpush1.bf16.msra.mxu1 %v1461_v57 }
 0x235   : > { %v1377_v59 = vpop.permute.xlu0 %1376  ;;  %636 = vrot.lane.b32.xlu1 %v4871_v16, %s5380_s18  ;;  %2950 = vmatprep.subr.bf16.mxu1 %v4573_v34 }
 0x236   : > { %v1391_v0 = vsel %vm1386_vm11, %v4365_v11, %v1377_v59  ;;  %v1392_v51 = vsel %vm1386_vm11, %v1377_v59, %v1379_v53  ;;  %v1445_v30 = vpop.permute.xlu1 %1444  ;;  %v4952_v59 = vld [vmem:[%s5274_s3] ss:$16 sps:$4 sm:$0xff]  }
 0x237   : > { %1810 = vrot.lane.b32.xlu0 %v4876_v63, %s5369_s23  ;;  %2860 = vmatprep.subr.bf16.mxu0 %v1392_v51  ;;  %v1460_v7 = vsel %vm5379_vm6, %v1445_v30, %v1447_v56  ;;  %v1459_v11 = vsel %vm5381_vm7, %v4384_v25, %v1445_v30  ;;  %vm5384_vm6 = vmmov %vm5383_vm5  ;;  %v4959_v30 = vld [vmem:[%s5274_s3 + $0xc] ss:$16 sps:$4 sm:$0xff]  }
 0x238   : > { %2861 = vmatpush1.bf16.msra.mxu0 %v1391_v0  ;;  %2951 = vmatpush1.bf16.msra.mxu1 %v4871_v16  ;;  %vm5388_vm4 = vmmov %vm5384_vm6 }
 0x239   : > { %v1535_v2 = vpop.permute.xlu0 %1534  ;;  %1248 = vrot.lane.b32.xlu1 %v4634_v26, %s5361_s6  ;;  %2862 = vmatprep.subr.bf16.mxu0 %v1460_v7 }
 0x23a   : > { %v4895_v9 = vpop.permute.xlu1 %1536 }
 0x23b   : > { %704 = vrot.lane.b32.xlu0 %v4871_v16, %s5382_s15  ;;  %v1548_v34 = vsel %vm5383_vm5, %v1535_v2, %v4895_v9  ;;  %vm5386_vm5 = vcmask 908288  }
 0x23c   : > { %2863 = vmatpush1.bf16.msra.mxu0 %v1459_v11  ;;  %2952 = vmatprep.subr.bf16.mxu1 %v1548_v34  ;;  %vm5387_vm7 = vmmov %vm5386_vm5 }
 0x23d   : > { %v1533_v14 = vpop.permute.xlu0 %1532  ;;  %2864 = vmatprep.subr.bf16.mxu0 %v3747_v19  ;;  %1878 = vrot.lane.b32.xlu1 %v4876_v63, %s5370_s25 }
 0x23e   : > { %v1547_v25 = vsel %vm5384_vm6, %v1533_v14, %v1535_v2  ;;  %v1603_v60 = vpop.permute.xlu1 %1602 }
 0x23f   : > { %1316 = vrot.lane.b32.xlu0 %v4634_v26, %s5362_s28  ;;  %2953 = vmatpush1.bf16.msra.mxu1 %v1547_v25 }
 0x240   : > { %2865 = vmatpush1.bf16.msra.mxu0 %v3748_v42 }
 0x241   : > { %v4906_v8 = vpop.permute.xlu0 %1604  ;;  %772 = vrot.lane.b32.xlu1 %v4871_v16, %s5385_s21 }
 0x242   : > { %v1616_v32 = vsel %vm5386_vm5, %v1603_v60, %v4906_v8  ;;  %v1601_v33 = vpop.permute.xlu1 %1600  ;;  %vm5390_vm5 = vcmask 392192  }
 0x243   : > { %1946 = vrot.lane.b32.xlu0 %v4876_v63, %s5371_s12  ;;  %2954 = vmatprep.subr.bf16.mxu1 %v1616_v32  ;;  %v1615_v37 = vsel %vm5387_vm7, %v1601_v33, %v1603_v60  ;;  %s5391_s12 = smov 68  }
 0x244   : > { %2955 = vmatpush1.bf16.msra.mxu1 %v1615_v37 }
 0x245   : > { %v1531_v31 = vpop.permute.xlu0 %1530  ;;  %1384 = vrot.lane.b32.xlu1 %v4634_v26, %s5363_s8 }
 0x246   : > { %v1545_v5 = vsel %vm5384_vm6, %v4408_v44, %v1531_v31  ;;  %v1546_v53 = vsel %vm5388_vm4, %v1531_v31, %v1533_v14  ;;  %v1671_v47 = vpop.permute.xlu1 %1670  ;;  %vm5392_vm4 = vmmov %vm5387_vm7  ;;  %vm5395_vm6 = vcmask 891904  }
 0x247   : > { %840 = vrot.lane.b32.xlu0 %v4871_v16, %s5389_s9  ;;  %2866 = vmatprep.subr.bf16.mxu0 %v1546_v53  ;;  %vm5393_vm7 = vmmov %vm5392_vm4  ;;  %s5437_s9 = sld [smem:[#allocation17_spill]] }
 0x248   : > { %2867 = vmatpush1.bf16.msra.mxu0 %v1545_v5  ;;  %2957 = vmatmul.mubr.bf16.vlgmr.msra.gmra.mrb[4].mxu1 %v4434_v55 }
 0x249   : > { %v4922_v15 = vpop.permute.xlu0 %1672  ;;  %2014 = vrot.lane.b32.xlu1 %v4876_v63, %s5372_s20  ;;  %3502 = vmatprep.mubr.msk.bf16.mxu1 %vm5390_vm5, %v4440_v58  ;;  %vm5396_vm5 = vmmov %vm5395_vm6  ;;  %s5439_s20 = sld [smem:[#allocation9_spill]] (%p4015_p13) }
 0x24a   : > { %v1684_v48 = vsel %vm1676_vm12, %v1671_v47, %v4922_v15  ;;  %v1669_v44 = vpop.permute.xlu1 %1668 }
 0x24b   : > { %1452 = vrot.lane.b32.xlu0 %v4634_v26, %s5364_s19  ;;  %2967 = vmatprep.subr.bf16.mxu1 %v1684_v48  ;;  %v1683_v6 = vsel %vm1676_vm12, %v1669_v44, %v1671_v47  ;;  %s5394_s19 = smov 67  }
 0x24c   : > { %2968 = vmatpush1.bf16.msra.mxu1 %v1683_v6 }
 0x24d   : > { %v1599_v50 = vpop.permute.xlu0 %1598  ;;  %908 = vrot.lane.b32.xlu1 %v4871_v16, %s5391_s12 }
 0x24e   : > { %v1613_v55 = vsel %vm5392_vm4, %v4422_v20, %v1599_v50  ;;  %v1614_v52 = vsel %vm5393_vm7, %v1599_v50, %v1601_v33  ;;  %v1739_v58 = vpop.permute.xlu1 %1738  ;;  %vm5397_vm4 = vcmask 392192   ;;  %vm5399_vm7 = vcmask 646144  }
 0x24f   : > { %2082 = vrot.lane.b32.xlu0 %v4876_v63, %s5373_s11  ;;  %2868 = vmatprep.subr.bf16.mxu0 %v1614_v52  ;;  %s3357_s11 = smul.u32 (%p4015_p13), 90, %s5439_s20 }
 0x250   : > { %2869 = vmatpush1.bf16.msra.mxu0 %v1613_v55 }
 0x251   : > { %v4941_v56 = vpop.permute.xlu0 %1740  ;;  %976 = vrot.lane.b32.xlu1 %v4871_v16, %s5394_s19  ;;  %s5190_s19 = scalar_lea.vmem [#allocation7], %s4050_s17  ;;  %s5438_s17 = sld [smem:[#allocation8_spill]] (%p4015_p13) }
 0x252   : > { %v1752_v57 = vsel %vm5395_vm6, %v1739_v58, %v4941_v56  ;;  %vm5400_vm6 = vmmov %vm5399_vm7 }
 0x253   : > { %2150 = vrot.lane.b32.xlu0 %v4876_v63, %s5374_s0  ;;  %2969 = vmatprep.subr.bf16.mxu1 %v1752_v57  ;;  %v1737_v20 = vpop.permute.xlu1 %1736  ;;  %s5398_s0 = smov 51  }
 0x254   : > { %2871 = vmatmul.mubr.bf16.vlgmr.msra.gmra.mrb[4].mxu0 %v4952_v59  ;;  %v1751_v0 = vsel %vm5396_vm5, %v1737_v20, %v1739_v58 }
 0x255   : > { %v1667_v51 = vpop.permute.xlu0 %1666  ;;  %3501 = vmatprep.mubr.msk.bf16.mxu0 %vm5397_vm4, %v4959_v30  ;;  %1538 = vrot.lane.b32.xlu1 %v4701_v27, %s5365_s27  ;;  %s5401_s27 = smov 50   ;;  %vm5402_vm4 = vmmov %vm5396_vm5 }
 0x256   : > { %2970 = vmatpush1.bf16.msra.mxu1 %v1751_v0  ;;  %v1681_v2 = vsel %vm1676_vm12, %v4449_v62, %v1667_v51  ;;  %v1682_v7 = vsel %vm1676_vm12, %v1667_v51, %v1669_v44 }
 0x257   : > { %1044 = vrot.lane.b32.xlu0 %v4871_v16, %s5398_s0  ;;  %2881 = vmatprep.subr.bf16.mxu0 %v1682_v7  ;;  %v1807_v11 = vpop.permute.xlu1 %1806  ;;  %s3356_s6 = smul.u32 (%p4015_p13), 9, %s5438_s17 }
 0x258   : > { %2882 = vmatpush1.bf16.msra.mxu0 %v1681_v2 }
 0x259   : > { %v4970_v34 = vpop.permute.xlu0 %1808  ;;  %2218 = vrot.lane.b32.xlu1 %v4876_v63, %s5375_s1  ;;  %s3358_s10 = sadd.s32 (%p4015_p13), %s3357_s11, %s3356_s6  ;;  %s5440_s1 = sld [smem:[#allocation18_spill]] (%p4015_p13) }
 0x25a   : > { %v1820_v14 = vsel %vm5399_vm7, %v1807_v11, %v4970_v34  ;;  %vm5403_vm7 = vcmask 637952   ;;  %s3515_s28 = sshll.u32 (%p4015_p13), %s3358_s10, 2 }
 0x25b   : > { %1606 = vrot.lane.b32.xlu0 %v4701_v27, %s5366_s14  ;;  %2971 = vmatprep.subr.bf16.mxu1 %v1820_v14  ;;  %v1805_v62 = vpop.permute.xlu1 %1804  ;;  %v2631_v27 = vld [vmem:[%s5275_s4] sm:$0xff] }
 0x25c   : > { %v1819_v19 = vsel %vm5400_vm6, %v1805_v62, %v1807_v11  ;;  %vm5404_vm6 = vmmov %vm5403_vm7 }
 0x25d   : > { %v1735_v25 = vpop.permute.xlu0 %1734  ;;  %1112 = vrot.lane.b32.xlu1 %v4871_v16, %s5401_s27  ;;  %2972 = vmatpush1.bf16.msra.mxu1 %v1819_v19  ;;  %v2632_v16 = vld [vmem:[%s5275_s4 + $0x8] sm:$0xff] }
 0x25e   : > { %v1749_v60 = vsel %vm5396_vm5, %v4472_v12, %v1735_v25  ;;  %v1750_v42 = vsel %vm5402_vm4, %v1735_v25, %v1737_v20  ;;  %vm5405_vm5 = vcmask 646144  }
 0x25f   : > { %2286 = vrot.lane.b32.xlu0 %v4876_v63, %s5376_s2  ;;  %2883 = vmatprep.subr.bf16.mxu0 %v1750_v42  ;;  %v1875_v32 = vpop.permute.xlu1 %1874  ;;  %vm5406_vm4 = vmmov %vm5405_vm5  ;;  %s5432_s2 = sld [smem:[#allocation8_spill]]  ;;  %s3360_s14 = scalar_lea.vmem (%p4015_p13), %s5440_s1, %s3515_s28 }
 0x260   : > { %2884 = vmatpush1.bf16.msra.mxu0 %v1749_v60 }
 0x261   : > { %v4989_v33 = vpop.permute.xlu0 %1876  ;;  %2354 = vrot.lane.b32.xlu1 %v4876_v63, %s5377_s30 }
 0x262   : > { %v1888_v12 = vsel %vm5403_vm7, %v1875_v32, %v4989_v33  ;;  %vm5407_vm7 = vcmask 629760  }
 0x263   : > { %2973 = vmatprep.subr.bf16.mxu1 %v1888_v12  ;;  %2635 = vperm.xlu0 %3716, %v2631_v27   ;;  %v1873_v37 = vpop.permute.xlu1 %1872  ;;  %vm5408_vm3 = vmmov %vm5407_vm7 }
 0x264   : > { %v1887_v31 = vsel %vm5404_vm6, %v1873_v37, %v1875_v32 }
 0x265   : > { %v1803_v5 = vpop.permute.xlu0 %1802  ;;  %2974 = vmatpush1.bf16.msra.mxu1 %v1887_v31  ;;  %2640 = vperm.xlu1 %3717, %v2632_v16   ;;  %s477_s30 = sadd.s32 1, %s5432_s2 }
 0x266   : > { %v1817_v53 = vsel %vm5405_vm5, %v4490_v28, %v1803_v5  ;;  %v1818_v47 = vsel %vm5406_vm4, %v1803_v5, %v1805_v62  ;;  %vm5409_vm5 = vmmov %vm5404_vm6  ;;  %vm5410_vm4 = vcmask 498688   ;;  %s478_s23 = smul.u32 9, %s477_s30 }
 0x267   : > { %2885 = vmatprep.subr.bf16.mxu0 %v1818_v47  ;;  %v1943_v63 = vpop.permute.xlu1 %1942 }
 0x268   : > { %2886 = vmatpush1.bf16.msra.mxu0 %v1817_v53  ;;  %p479_p4 = scmp.lt.s32.totalorder %s478_s23, 44 }
 0x269   : > { %v5002_v48 = vpop.permute.xlu0 %1944 }
 0x26a   : > { %v1956_v44 = vsel %vm5407_vm7, %v1943_v63, %v5002_v48  ;;  %vm5411_vm7 = vmmov %vm5410_vm4  ;;  %s5458_s23 = smov (!%p479_p4, %s478_s23), 44 }
 0x26b   : > { %2975 = vmatprep.subr.bf16.mxu1 %v1956_v44  ;;  %v1941_v6 = vpop.permute.xlu1 %1940  ;;  %s5156_s12 = scalar_lea.vmem %s5437_s9, %s5458_s23 }
 0x26c   : > { %v1955_v50 = vsel %vm5408_vm3, %v1941_v6, %v1943_v63 }
 0x26d   : > { %v1871_v55 = vpop.permute.xlu0 %1870  ;;  %2976 = vmatpush1.bf16.msra.mxu1 %v1955_v50 }
 0x26e   : > { %v1885_v28 = vsel %vm5404_vm6, %v4509_v40, %v1871_v55  ;;  %v1886_v52 = vsel %vm5409_vm5, %v1871_v55, %v1873_v37  ;;  %vm5412_vm6 = vmmov %vm5408_vm3  ;;  %vm5413_vm5 = vcmask 490496  }
 0x26f   : > { %2887 = vmatprep.subr.bf16.mxu0 %v1886_v52  ;;  %v2011_v58 = vpop.permute.xlu1 %2010 }
 0x270   : > { %2888 = vmatpush1.bf16.msra.mxu0 %v1885_v28 }
 0x271   : > { %v5010_v57 = vpop.permute.xlu0 %2012 }
 0x272   : > { %v2024_v20 = vsel %vm5410_vm4, %v2011_v58, %v5010_v57  ;;  %vm5414_vm4 = vmmov %vm5413_vm5 }
 0x273   : > { %2977 = vmatprep.subr.bf16.mxu1 %v2024_v20  ;;  %v2009_v0 = vpop.permute.xlu1 %2008 }
 0x274   : > { %v2023_v51 = vsel %vm5411_vm7, %v2009_v0, %v2011_v58 }
 0x275   : > { %v1939_v2 = vpop.permute.xlu0 %1938  ;;  %2978 = vmatpush1.bf16.msra.mxu1 %v2023_v51 }
 0x276   : > { %v1953_v7 = vsel %vm5408_vm3, %v4524_v54, %v1939_v2  ;;  %v1954_v40 = vsel %vm5412_vm6, %v1939_v2, %v1941_v6  ;;  %vm5415_vm3 = vmmov %vm5411_vm7  ;;  %vm5416_vm6 = vcmask 482304  }
 0x277   : > { %2889 = vmatprep.subr.bf16.mxu0 %v1954_v40  ;;  %v2079_v11 = vpop.permute.xlu1 %2078 }
 0x278   : > { %2890 = vmatpush1.bf16.msra.mxu0 %v1953_v7 }
 0x279   : > { %v5018_v14 = vpop.permute.xlu0 %2080 }
 0x27a   : > { %v2092_v62 = vsel %vm5413_vm5, %v2079_v11, %v5018_v14  ;;  %vm5417_vm5 = vmmov %vm5416_vm6 }
 0x27b   : > { %2979 = vmatprep.subr.bf16.mxu1 %v2092_v62  ;;  %v2077_v19 = vpop.permute.xlu1 %2076 }
 0x27c   : > { %v2091_v25 = vsel %vm5414_vm4, %v2077_v19, %v2079_v11 }
 0x27d   : > { %v2007_v60 = vpop.permute.xlu0 %2006  ;;  %2980 = vmatpush1.bf16.msra.mxu1 %v2091_v25 }
 0x27e   : > { %v2021_v42 = vsel %vm5411_vm7, %v4543_v4, %v2007_v60  ;;  %v2022_v54 = vsel %vm5415_vm3, %v2007_v60, %v2009_v0  ;;  %vm5418_vm7 = vmmov %vm5414_vm4 }
 0x27f   : > { %2891 = vmatprep.subr.bf16.mxu0 %v2022_v54  ;;  %v2147_v32 = vpop.permute.xlu1 %2146  ;;  %vm5419_vm3 = vmmov %vm5417_vm5 }
 0x280   : > { %2892 = vmatpush1.bf16.msra.mxu0 %v2021_v42 }
 0x281   : > { %v5026_v27 = vpop.permute.xlu0 %2148 }
 0x282   : > { %v2160_v12 = vsel %vm5416_vm6, %v2147_v32, %v5026_v27  ;;  %vm5420_vm6 = vmmov %vm5419_vm3 }
 0x283   : > { %2981 = vmatprep.subr.bf16.mxu1 %v2160_v12  ;;  %v2145_v16 = vpop.permute.xlu1 %2144 }
 0x284   : > { %v2159_v37 = vsel %vm5417_vm5, %v2145_v16, %v2147_v32  ;;  %vm5421_vm5 = vcmask 392192  }
 0x285   : > { %v2075_v31 = vpop.permute.xlu0 %2074  ;;  %2982 = vmatpush1.bf16.msra.mxu1 %v2159_v37 }
 0x286   : > { %v2089_v5 = vsel %vm5414_vm4, %v4558_v21, %v2075_v31  ;;  %v2090_v4 = vsel %vm5418_vm7, %v2075_v31, %v2077_v19  ;;  %vm5423_vm4 = vcmask 646144  }
 0x287   : > { %2893 = vmatprep.subr.bf16.mxu0 %v2090_v4  ;;  %v2215_v53 = vpop.permute.xlu1 %2214 }
 0x288   : > { %2894 = vmatpush1.bf16.msra.mxu0 %v2089_v5 }
 0x289   : > { %v5034_v47 = vpop.permute.xlu0 %2216 }
 0x28a   : > { %v2228_v63 = vsel %vm2220_vm14, %v2215_v53, %v5034_v47 }
 0x28b   : > { %2983 = vmatprep.subr.bf16.mxu1 %v2228_v63  ;;  %v2213_v44 = vpop.permute.xlu1 %2212 }
 0x28c   : > { %v2227_v6 = vsel %vm2220_vm14, %v2213_v44, %v2215_v53 }
 0x28d   : > { %v2143_v50 = vpop.permute.xlu0 %2142  ;;  %2984 = vmatpush1.bf16.msra.mxu1 %v2227_v6 }
 0x28e   : > { %v2157_v55 = vsel %vm5419_vm3, %v4580_v24, %v2143_v50  ;;  %v2158_v21 = vsel %vm5420_vm6, %v2143_v50, %v2145_v16  ;;  %vm5433_vm6 = vcmask 1039360  }
 0x28f   : > { %2895 = vmatprep.subr.bf16.mxu0 %v2158_v21  ;;  %v2283_v28 = vpop.permute.xlu1 %2282 }
 0x290   : > { %2896 = vmatpush1.bf16.msra.mxu0 %v2157_v55 }
 0x291   : > { %v5042_v52 = vpop.permute.xlu0 %2284 }
 0x292   : > { %v2296_v58 = vsel %vm2288_vm15, %v2283_v28, %v5042_v52 }
 0x293   : > { %2985 = vmatprep.subr.bf16.mxu1 %v2296_v58  ;;  %v2281_v20 = vpop.permute.xlu1 %2280 }
 0x294   : > { %v2295_v0 = vsel %vm2288_vm15, %v2281_v20, %v2283_v28 }
 0x295   : > { %v2211_v51 = vpop.permute.xlu0 %2210  ;;  %2986 = vmatpush1.bf16.msra.mxu1 %v2295_v0 }
 0x296   : > { %v2225_v2 = vsel %vm2220_vm14, %v4595_v18, %v2211_v51  ;;  %v2226_v24 = vsel %vm2220_vm14, %v2211_v51, %v2213_v44 }
 0x297   : > { %2897 = vmatprep.subr.bf16.mxu0 %v2226_v24  ;;  %v2351_v7 = vpop.permute.xlu1 %2350 }
 0x298   : > { %2898 = vmatpush1.bf16.msra.mxu0 %v2225_v2 }
 0x299   : > { %v5050_v40 = vpop.permute.xlu0 %2352 }
 0x29a   : > { %v2364_v11 = vsel %vm2356_vm13, %v2351_v7, %v5050_v40 }
 0x29b   : > { %2987 = vmatprep.subr.bf16.mxu1 %v2364_v11  ;;  %v2349_v62 = vpop.permute.xlu1 %2348 }
 0x29c   : > { %v2363_v19 = vsel %vm2356_vm13, %v2349_v62, %v2351_v7 }
 0x29d   : > { %v2279_v25 = vpop.permute.xlu0 %2278  ;;  %2988 = vmatpush1.bf16.msra.mxu1 %v2363_v19 }
 0x29e   : > { %v2293_v60 = vsel %vm2288_vm15, %v4614_v3, %v2279_v25  ;;  %v2294_v18 = vsel %vm2288_vm15, %v2279_v25, %v2281_v20  ;;  %3051 = vmatprep.subr.bf16.mxu1 %v3866_v45 }
 0x29f   : > { %2899 = vmatprep.subr.bf16.mxu0 %v2294_v18  ;;  %v1675_v42 = vpop.permute.xlu1 %1674  ;;  %v5059_v54 = vpop.f32.mrb[0].mxu1 }
 0x2a0   : > { %2900 = vmatpush1.bf16.msra.mxu0 %v2293_v60  ;;  %v1685_v32 = vsel %vm1676_vm12, %v4922_v15, %v1675_v42  ;;  %3000 = vmatmul.mubr.bf16.vlgmr.msra.gmra.mrb[4].mxu1 %v4644_v36  ;;  %v5064_v16 = vpop.f32.mrb[1].mxu1  ;;  %vm5422_vm12 = vcmask 891904  }
 0x2a1   : > { %v2347_v12 = vpop.permute.xlu0 %2346  ;;  %3052 = vmatpush1.bf16.msra.mxu1 %v1685_v32  ;;  %3503 = vmatprep.mubr.msk.bf16.mxu1 %vm5421_vm5, %v4959_v30  ;;  %v5071_v31 = vpop.f32.mrb[2].mxu1  ;;  %vm5434_vm5 = vcmask 416768  }
 0x2a2   : > { %v2361_v3 = vsel %vm2356_vm13, %v4629_v22, %v2347_v12  ;;  %v2362_v37 = vsel %vm2356_vm13, %v2347_v12, %v2349_v62  ;;  %3053 = vmatprep.subr.bf16.mxu1 %v3866_v45  ;;  %v5074_v15 = vpop.f32.mrb[3].mxu1 }
 0x2a3   : > { %2901 = vmatprep.subr.bf16.mxu0 %v2362_v37  ;;  %v1743_v5 = vpop.permute.xlu1 %1742  ;;  %v3114_v37 = vlaneseq }
 0x2a4   : > { %2902 = vmatpush1.bf16.msra.mxu0 %v2361_v3  ;;  %v1753_v4 = vsel %vm5422_vm12, %v4941_v56, %v1743_v5  ;;  %vm5435_vm12 = vcmask 908288  }
 0x2a5   : > { %v1181_v53 = vpop.permute.xlu0 %1180  ;;  %3054 = vmatpush1.bf16.msra.mxu1 %v1753_v4  ;;  %v5151_v5 = vshrl.u32 %v3114_v37, 7  ;;  %v5163_v4 = vld [vmem:[%s5156_s12] sm:$0xff] }
 0x2a6   : > { %v1191_v22 = vsel %vm1182_vm8, %v4800_v46, %v1181_v53  ;;  %3055 = vmatprep.subr.bf16.mxu1 %v3866_v45  ;;  %vm5427_vm8 = vcmask 498688  }
 0x2a7   : > { %2914 = vmatmul.mubr.bf16.vlgmr.msra.gmra.mrb[4].mxu0 %v4644_v36  ;;  %3540 = vmatprep.subr.bf16.mxu0 %v1191_v22  ;;  %v637_v30 = vpop.permute.xlu1 %636 }
 0x2a8   : > { %3042 = vmatprep.mubr.bf16.mxu0 %v4695_v13  ;;  %v647_v63 = vsel %vm638_vm0, %v4651_v39, %v637_v30  ;;  %vm5424_vm0 = vcmask 637952  }
 0x2a9   : > { %v1811_v44 = vpop.permute.xlu0 %1810  ;;  %3541 = vmatpush3.bf16.msra.mxu0 %v647_v63 }
 0x2aa   : > { %v1821_v56 = vsel %vm5423_vm4, %v4970_v34, %v1811_v44  ;;  %vm5436_vm4 = vcmask 408576  }
 0x2ab   : > { %3056 = vmatpush1.bf16.msra.mxu1 %v1821_v56  ;;  %v1249_v6 = vpop.permute.xlu1 %1248 }
 0x2ac   : > { %3057 = vmatprep.subr.bf16.mxu1 %v3866_v45  ;;  %v1259_v36 = vsel %vm1250_vm9, %v4816_v1, %v1249_v6  ;;  %vm5428_vm9 = vcmask 7168  }
 0x2ad   : > { %v705_v46 = vpop.permute.xlu0 %704  ;;  %3542 = vmatprep.subr.bf16.mxu0 %v1259_v36 }
 0x2ae   : > { %v715_v13 = vsel %vm706_vm1, %v4672_v23, %v705_v46  ;;  %vm5425_vm1 = vcmask 629760  }
 0x2af   : > { %3543 = vmatpush3.bf16.msra.mxu0 %v715_v13  ;;  %v1879_v50 = vpop.permute.xlu1 %1878 }
 0x2b0   : > { %v1889_v39 = vsel %vm5424_vm0, %v4989_v33, %v1879_v50 }
 0x2b1   : > { %v1317_v55 = vpop.permute.xlu0 %1316  ;;  %3058 = vmatpush1.bf16.msra.mxu1 %v1889_v39  ;;  %v5097_v21 = vpop.f32.mrb[0].mxu0 }
 0x2b2   : > { %v1327_v34 = vsel %vm1318_vm10, %v4832_v29, %v1317_v55  ;;  %3059 = vmatprep.subr.bf16.mxu1 %v3866_v45  ;;  %v5099_v28 = vpop.f32.mrb[1].mxu0  ;;  %vm5429_vm10 = vcmask 556032  }
 0x2b3   : > { %3544 = vmatprep.subr.bf16.mxu0 %v1327_v34  ;;  %v773_v1 = vpop.permute.xlu1 %772  ;;  %v5103_v20 = vpop.f32.mrb[2].mxu0 }
 0x2b4   : > { %v783_v23 = vsel %vm774_vm2, %v4690_v10, %v773_v1  ;;  %v5107_v0 = vpop.f32.mrb[3].mxu0  ;;  %vm5426_vm2 = vcmask 564224  }
 0x2b5   : > { %v1947_v58 = vpop.permute.xlu0 %1946  ;;  %3545 = vmatpush3.bf16.msra.mxu0 %v783_v23 }
 0x2b6   : > { %v1957_v33 = vsel %vm5425_vm1, %v5002_v48, %v1947_v58 }
 0x2b7   : > { %3060 = vmatpush1.bf16.msra.mxu1 %v1957_v33  ;;  %v1385_v29 = vpop.permute.xlu1 %1384 }
 0x2b8   : > { %3061 = vmatprep.subr.bf16.mxu1 %v3866_v45  ;;  %v1395_v51 = vsel %vm1386_vm11, %v4848_v43, %v1385_v29  ;;  %vm5430_vm11 = vmmov %vm5418_vm7  ;;  %vm5431_vm7 = vcmask 547840  }
 0x2b9   : > { %v841_v2 = vpop.permute.xlu0 %840  ;;  %3546 = vmatprep.subr.bf16.mxu0 %v1395_v51 }
 0x2ba   : > { %v851_v10 = vsel %vm5426_vm2, %v4718_v35, %v841_v2 }
 0x2bb   : > { %3547 = vmatpush3.bf16.msra.mxu0 %v851_v10  ;;  %v2015_v24 = vpop.permute.xlu1 %2014 }
 0x2bc   : > { %v2025_v7 = vsel %vm5427_vm8, %v5010_v57, %v2015_v24 }
 0x2bd   : > { %v1453_v48 = vpop.permute.xlu0 %1452  ;;  %3062 = vmatpush1.bf16.msra.mxu1 %v2025_v7 }
 0x2be   : > { %v1463_v11 = vsel %vm5428_vm9, %v4864_v41, %v1453_v48  ;;  %3063 = vmatprep.subr.bf16.mxu1 %v3866_v45 }
 0x2bf   : > { %3548 = vmatprep.subr.bf16.mxu0 %v1463_v11  ;;  %v909_v62 = vpop.permute.xlu1 %908 }
 0x2c0   : > { %v919_v43 = vsel %vm5429_vm10, %v4736_v49, %v909_v62  ;;  %v3140_v62 = vsub.s32 6, %v5151_v5 }
 0x2c1   : > { %v2083_v19 = vpop.permute.xlu0 %2082  ;;  %3549 = vmatpush3.bf16.msra.mxu0 %v919_v43  ;;  %v3144_v43 = vsub.s32 7, %v5151_v5 }
 0x2c2   : > { %v2093_v35 = vsel %vm5430_vm11, %v5018_v14, %v2083_v19  ;;  %3550 = vmatprep.subr.bf16.mxu0 %v4634_v26 }
 0x2c3   : > { %3064 = vmatpush1.bf16.msra.mxu1 %v2093_v35  ;;  %v977_v57 = vpop.permute.xlu1 %976 }
 0x2c4   : > { %3065 = vmatprep.subr.bf16.mxu1 %v3866_v45  ;;  %v987_v41 = vsel %vm5431_vm7, %v4752_v61, %v977_v57  ;;  %v3141_v57 = vrot.slane %v5163_v4, %v3140_v62 }
 0x2c5   : > { %v2151_v25 = vpop.permute.xlu0 %2150  ;;  %3551 = vmatpush3.bf16.msra.mxu0 %v987_v41 }
 0x2c6   : > { %v2161_v49 = vsel %vm5419_vm3, %v5026_v27, %v2151_v25 }
 0x2c7   : > { %3066 = vmatpush1.bf16.msra.mxu1 %v2161_v49  ;;  %v1539_v60 = vpop.permute.xlu1 %1538  ;;  %v3145_v49 = vrot.slane %v5163_v4, %v3144_v43 }
 0x2c8   : > { %3067 = vmatprep.subr.bf16.mxu1 %v3866_v45  ;;  %v1549_v26 = vsel %vm5433_vm6, %v4895_v9, %v1539_v60 }
 0x2c9   : > { %v1045_v14 = vpop.permute.xlu0 %1044  ;;  %3552 = vmatprep.subr.bf16.mxu0 %v1549_v26 }
 0x2ca   : > { %v1055_v18 = vsel %vm5434_vm5, %v4768_v17, %v1045_v14 }
 0x2cb   : > { %3553 = vmatpush3.bf16.msra.mxu0 %v1055_v18  ;;  %v2219_v42 = vpop.permute.xlu1 %2218 }
 0x2cc   : > { %v2229_v61 = vsel %vm2220_vm14, %v5034_v47, %v2219_v42  ;;  %v3132_v42 = vsub.s32 4, %v5151_v5 }
 0x2cd   : > { %v1607_v32 = vpop.permute.xlu0 %1606  ;;  %3068 = vmatpush1.bf16.msra.mxu1 %v2229_v61 }
 0x2ce   : > { %v1617_v27 = vsel %vm5435_vm12, %v4906_v8, %v1607_v32  ;;  %3069 = vmatprep.subr.bf16.mxu1 %v3866_v45 }
 0x2cf   : > { %3554 = vmatprep.subr.bf16.mxu0 %v1617_v27  ;;  %v1113_v9 = vpop.permute.xlu1 %1112  ;;  %v3136_v27 = vsub.s32 5, %v5151_v5 }
 0x2d0   : > { %v1123_v12 = vsel %vm5436_vm4, %v4784_v38, %v1113_v9  ;;  %v3751_v38 = vld [vmem:[%s5274_s3 + $0x8] ss:$16 sps:$4 sm:$0xff]  }
 0x2d1   : > { %v2287_v17 = vpop.permute.xlu0 %2286  ;;  %3555 = vmatpush3.bf16.msra.mxu0 %v1123_v12 }
 0x2d2   : > { %v2297_v3 = vsel %vm2288_vm15, %v5042_v52, %v2287_v17  ;;  %v3128_v52 = vsub.s32 3, %v5151_v5 }
 0x2d3   : > { %3070 = vmatpush1.bf16.msra.mxu1 %v2297_v3  ;;  %v2355_v47 = vpop.permute.xlu1 %2354 }
 0x2d4   : > { %3071 = vmatprep.subr.bf16.mxu1 %v3866_v45  ;;  %3043 = vmatmul.mubr.bf16.vlgmr.msra.gmra.mrb[8].mxu0 %v4952_v59  ;;  %v2365_v8 = vsel %vm2356_vm13, %v5050_v40, %v2355_v47  ;;  %v3116_v45 = vsub.s32 0, %v5151_v5  ;;  %v3124_v59 = vsub.s32 2, %v5151_v5  ;;  %v3120_v40 = vsub.s32 1, %v5151_v5 }
 0x2d5   : > { %v3129_v63 = vrot.slane %v5163_v4, %v3128_v52 }
 0x2d6   : > { %v3117_v22 = vrot.slane %v5163_v4, %v3116_v45  ;;  %v3125_v30 = vrot.slane %v5163_v4, %v3124_v59  ;;  %v3121_v44 = vrot.slane %v5163_v4, %v3120_v40 }
 0x2d7   : > { %3072 = vmatpush1.bf16.msra.mxu1 %v2365_v8 }
 0x2da   : > { %3084 = vmatmul.mubr.bf16.vlgmr.msra.gmra.mrb[8].mxu1 %v3751_v38  ;;  %v3133_v38 = vrot.slane %v5163_v4, %v3132_v42 }
 0x2e2   : > { %v5165_v53 = vpop.permute.xlu0 %2635 }
 0x2e3   : > { %v3566_v56 = vadd.f32 %v5059_v54, %v5165_v53  ;;  %v3567_v6 = vadd.f32 %v5064_v16, %v5165_v53  ;;  %v3562_v36 = vadd.f32 %v5097_v21, %v5165_v53  ;;  %v3563_v46 = vadd.f32 %v5099_v28, %v5165_v53 }
 0x2e4   : > { %v5179_v39 = vpop.permute.xlu1 %2640 }
 0x2e5   : > { %v3094_v13 = vmax.f32 %v3566_v56, 0.0  ;;  %v3095_v50 = vmax.f32 %v3567_v6, 0.0  ;;  %v3092_v55 = vmax.f32 %v3562_v36, 0.0  ;;  %v3093_v34 = vmax.f32 %v3563_v46, 0.0 }
 0x2e6   : > { %v3568_v1 = vadd.f32 %v5071_v31, %v5179_v39  ;;  %v3569_v54 = vadd.f32 %v5074_v15, %v5179_v39  ;;  %v3564_v16 = vadd.f32 %v5103_v20, %v5179_v39  ;;  %v3565_v21 = vadd.f32 %v5107_v0, %v5179_v39 }
 0x2e7   : > { %v3159_v28 = vmul.f32 %v3117_v22, %v3092_v55  ;;  %v3161_v23 = vmul.f32 %v3125_v30, %v3094_v13  ;;  %v3162_v58 = vmul.f32 %v3129_v63, %v3095_v50  ;;  %v3160_v33 = vmul.f32 %v3121_v44, %v3093_v34 }
 0x2e8   : > { %v3103_v29 = vmax.f32 %v3568_v1, 0.0  ;;  %v3104_v51 = vmax.f32 %v3569_v54, 0.0  ;;  %v3101_v2 = vmax.f32 %v3564_v16, 0.0  ;;  %v3102_v10 = vmax.f32 %v3565_v21, 0.0 }
 0x2e9   : > { %v3531_v24 = vpack.c.bf16 %v3162_v58, %v3161_v23  ;;  %v3530_v31 = vpack.c.bf16 %v3160_v33, %v3159_v28 }
 0x2ea   : > { %v3170_v7 = vmul.f32 %v3125_v30, %v3103_v29  ;;  %v3171_v48 = vmul.f32 %v3129_v63, %v3104_v51  ;;  %v3168_v15 = vmul.f32 %v3117_v22, %v3101_v2  ;;  %v3169_v11 = vmul.f32 %v3121_v44, %v3102_v10 }
 0x2eb   : > { %3234 = vst [vmem:[%s5190_s19 + $0x8] sm:$0xff] %v3531_v24  ;;  %3233 = vst [vmem:[%s5190_s19] sm:$0xff] %v3530_v31  ;;  %v3137_v22 = vrot.slane %v5163_v4, %v3136_v27  ;;  %v3504_v31 = vld [vmem:[%s5156_s12 + $0x8] ss:$0 sm:$0xff] }
 0x2ec   : > { %v3536_v20 = vpack.c.bf16 %v3171_v48, %v3170_v7  ;;  %v3535_v0 = vpack.c.bf16 %v3169_v11, %v3168_v15 }
 0x2ee   : > { %3239 = vst [vmem:[%s5190_s19 + $0x2c] sm:$0xff] %v3536_v20  ;;  %3238 = vst [vmem:[%s5190_s19 + $0x24] sm:$0xff] %v3535_v0 }
 0x373   : > { %v3001_v19 = vpop.f32.mrb[4].mxu1 }
 0x374   : > { %v3574_v35 = vadd.f32 %v3001_v19, %v5165_v53  ;;  %v3003_v41 = vpop.f32.mrb[5].mxu1 }
 0x375   : > { %v3575_v25 = vadd.f32 %v3003_v41, %v5165_v53  ;;  %v3005_v60 = vpop.f32.mrb[6].mxu1  ;;  %v3278_v41 = vld [vmem:[%s5190_s19 + $0x24] sm:$0xff] (%p4015_p13) }
 0x376   : > { %v3098_v26 = vmax.f32 %v3574_v35, 0.0  ;;  %v3576_v14 = vadd.f32 %v3005_v60, %v5179_v39  ;;  %v3007_v18 = vpop.f32.mrb[7].mxu1  ;;  %3520 = vst [vmem:[%s3360_s14 + $0xd8] sm:$0xff] (%p4015_p13), %v3278_v41 }
 0x377   : > { %v3099_v61 = vmax.f32 %v3575_v25, 0.0  ;;  %v3577_v32 = vadd.f32 %v3007_v18, %v5179_v39  ;;  %v3280_v25 = vld [vmem:[%s5190_s19 + $0x2c] sm:$0xff] (%p4015_p13) }
 0x378   : > { %v3165_v9 = vmul.f32 %v3141_v57, %v3098_v26  ;;  %v3107_v12 = vmax.f32 %v3576_v14, 0.0  ;;  %3521 = vst [vmem:[%s3360_s14 + $0xe0] sm:$0xff] (%p4015_p13), %v3280_v25 }
 0x379   : > { %v3166_v17 = vmul.f32 %v3145_v49, %v3099_v61  ;;  %v3108_v3 = vmax.f32 %v3577_v32, 0.0 }
 0x37a   : > { %v2915_v47 = vpop.f32.mrb[4].mxu0  ;;  %v3174_v8 = vmul.f32 %v3141_v57, %v3107_v12 }
 0x37b   : > { %v3570_v37 = vadd.f32 %v2915_v47, %v5165_v53  ;;  %v2917_v45 = vpop.f32.mrb[5].mxu0  ;;  %v3533_v59 = vpack.c.bf16 %v3166_v17, %v3165_v9  ;;  %v3175_v52 = vmul.f32 %v3145_v49, %v3108_v3 }
 0x37c   : > { %v3571_v40 = vadd.f32 %v2917_v45, %v5165_v53  ;;  %v2919_v5 = vpop.f32.mrb[6].mxu0 }
 0x37d   : > { %v3096_v30 = vmax.f32 %v3570_v37, 0.0  ;;  %v3572_v63 = vadd.f32 %v2919_v5, %v5179_v39  ;;  %v2921_v44 = vpop.f32.mrb[7].mxu0  ;;  %3236 = vst [vmem:[%s5190_s19 + $0x18] sm:$0xff] %v3533_v59  ;;  %v3538_v56 = vpack.c.bf16 %v3175_v52, %v3174_v8 }
 0x37e   : > { %v3097_v6 = vmax.f32 %v3571_v40, 0.0  ;;  %v3573_v36 = vadd.f32 %v2921_v44, %v5179_v39 }
 0x37f   : > { %v3163_v46 = vmul.f32 %v3133_v38, %v3096_v30  ;;  %v3105_v13 = vmax.f32 %v3572_v63, 0.0  ;;  %3241 = vst [vmem:[%s5190_s19 + $0x3c] sm:$0xff] %v3538_v56 }
 0x380   : > { %v3164_v50 = vmul.f32 %v3137_v22, %v3097_v6  ;;  %v3106_v55 = vmax.f32 %v3573_v36, 0.0 }
 0x381   : > { %v3172_v34 = vmul.f32 %v3133_v38, %v3105_v13 }
 0x382   : > { %v3532_v1 = vpack.c.bf16 %v3164_v50, %v3163_v46  ;;  %v3173_v4 = vmul.f32 %v3137_v22, %v3106_v55 }
 0x384   : > { %3235 = vst [vmem:[%s5190_s19 + $0x10] sm:$0xff] %v3532_v1  ;;  %v3537_v54 = vpack.c.bf16 %v3173_v4, %v3172_v34  ;;  %v3276_v57 = vld [vmem:[%s5190_s19 + $0x18] sm:$0xff] (%p4015_p13) }
 0x385   : > { %3519 = vst [vmem:[%s3360_s14 + $0x3c] sm:$0xff] (%p4015_p13), %v3276_v57 }
 0x386   : > { %3240 = vst [vmem:[%s5190_s19 + $0x34] sm:$0xff] %v3537_v54  ;;  %v3284_v60 = vld [vmem:[%s5190_s19 + $0x3c] sm:$0xff] (%p4015_p13) }
 0x387   : > { %3523 = vst [vmem:[%s3360_s14 + $0xf0] sm:$0xff] (%p4015_p13), %v3284_v60 }
 0x38b   : > { %v3274_v35 = vld [vmem:[%s5190_s19 + $0x10] sm:$0xff] (%p4015_p13) }
 0x38c   : > { %3518 = vst [vmem:[%s3360_s14 + $0x34] sm:$0xff] (%p4015_p13), %v3274_v35 }
 0x38d   : > { %v3282_v49 = vld [vmem:[%s5190_s19 + $0x34] sm:$0xff] (%p4015_p13) }
 0x38e   : > { %3522 = vst [vmem:[%s3360_s14 + $0xe8] sm:$0xff] (%p4015_p13), %v3282_v49 }
 0x3a7   : > { %v3556_v16 = vpop.f32.mrb[8].mxu0 }
 0x3a8   : > { %v3557_v21 = vpop.f32.mrb[9].mxu0 }
 0x3a9   : > { %v3558_v28 = vadd.f32 %v3557_v21, %v3556_v16  ;;  %v3559_v23 = vpop.f32.mrb[10].mxu0 }
 0x3aa   : > { %v3560_v58 = vpop.f32.mrb[11].mxu0 }
 0x3ab   : > { %v3561_v33 = vadd.f32 %v3560_v58, %v3559_v23  ;;  %v3045_v29 = vadd.f32 %v3558_v28, %v5165_v53  ;;  %v3270_v53 = vld [vmem:[%s5190_s19] sm:$0xff] (%p4015_p13) }
 0x3ac   : > { %3516 = vst [vmem:[%s3360_s14 + $0x24] sm:$0xff] (%p4015_p13), %v3270_v53 }
 0x3ad   : > { %v3085_v51 = vpop.f32.mrb[8].mxu1  ;;  %v3048_v24 = vadd.f32 %v3561_v33, %v5179_v39  ;;  %v3272_v39 = vld [vmem:[%s5190_s19 + $0x8] sm:$0xff] (%p4015_p13) }
 0x3ae   : > { %v3086_v2 = vadd.f32 %v3085_v51, %v3045_v29  ;;  %v3087_v10 = vpop.f32.mrb[9].mxu1  ;;  %3517 = vst [vmem:[%s3360_s14 + $0x2c] sm:$0xff] (%p4015_p13), %v3272_v39 }
 0x3af   : > { %v3088_v7 = vpop.f32.mrb[10].mxu1 }
 0x3b0   : > { %v3100_v48 = vmax.f32 %v3086_v2, 0.0  ;;  %v3089_v15 = vadd.f32 %v3088_v7, %v3048_v24  ;;  %v3090_v11 = vpop.f32.mrb[11].mxu1 }
 0x3b2   : > { %v3167_v20 = vmul.f32 %v3504_v31, %v3100_v48  ;;  %v3109_v0 = vmax.f32 %v3089_v15, 0.0  ;;  %3249 = sbr.rel (!%p4015_p13) target bundleno = 961 (0x3c1), region = 126 }
 0x3b4   : > { %v3534_v62 = vpack.c.bf16 %v3167_v20, %v3167_v20  ;;  %v3176_v43 = vmul.f32 %v3504_v31, %v3109_v0 }
 0x3b6   : > { %3237 = vst [vmem:[%s5190_s19 + $0x20] sm:$0xf] %v3534_v62  ;;  %v3539_v19 = vpack.c.bf16 %v3176_v43, %v3176_v43 }
 0x3b8   : > { %3242 = vst [vmem:[%s5190_s19 + $0x44] sm:$0xf] %v3539_v19 }
 0x3bd   : > { %v3524_v26 = vld [vmem:[%s5190_s19 + $0x20] sm:$0xf] }
 0x3be   : > { %3525 = vst [vmem:[%s3360_s14 + $0x44] sm:$0xf] %v3524_v26 }
 0x3bf   : > { %v3526_v14 = vld [vmem:[%s5190_s19 + $0x44] sm:$0xf] }
 0x3c0   : > { %3527 = vst [vmem:[%s3360_s14 + $0xf8] sm:$0xf] %v3526_v14 }
 0x3c1 PF: > { %s16_s7 = sadd.s32 1, %s3838_s7   ;;  %s5441_s8 = sld [smem:[#allocation13_spill]] }
 0x3c2   : > { %p13_p5 = scmp.ge.s32.totalorder %s16_s7, 8   ;;  %s5442_s28 = sld [smem:[#allocation10_spill]] }
 0x3c3   : > { %s5443_s13 = sld [smem:[#allocation11_spill]]  ;;  %s5444_s30 = sld [smem:[#allocation12_spill]] }
 0x3c4   : > { %s5445_s21 = smov %s3802_s22  ;;  %s5446_s22 = smov %s4020_s16 }
 0x3c5   : > { %s5447_s23 = smov %s3810_s24  ;;  %s5448_s24 = smov %s3986_s5 }
 0x3c6   : > { %s5449_s25 = smov %s3818_s26  ;;  %s5451_s27 = smov %s3830_s29 }
 0x3c7   : > { %s5450_s26 = smov %s5441_s8  ;;  %15 = sbr.rel (!%p13_p5) target bundleno = 12 (0xc), region = 226 }
 0x3c9   : > { %s5452_s29 = smov %s5443_s13 }

// kernel: basic_block_3d_forward.3
= control target key start
LH: loop header
LB: loop body
LE: loop exit
PB: predicated region body
PF: predicated region fallthrough
CT: control target
= control target key end

     0   :  { %s5699_s0 = inlined_call_operand.vmem [shape: bf16[2,16,5760], index: 0, kind: input, shape index: {}, may-alias: {0,1,2}]   ;;  %s5700_s1 = inlined_call_operand.vmem [shape: bf16[2,16,5760], index: 1, kind: input, shape index: {}, may-alias: {0,1,2}]   ;;  %s5701_s2 = inlined_call_operand.vmem [shape: bf16[2,16,5760], index: 2, kind: input, shape index: {}, may-alias: {0,1,2}]   ;;  %s5702_s3 = inlined_call_operand.vmem [shape: bf16[2,16,5760], index: 3, kind: input, shape index: {}]   ;;  %s5703_s4 = inlined_call_operand.vmem [shape: bf16[16,432], index: 4, kind: input, shape index: {}]   ;;  %s5704_s5 = inlined_call_operand.vmem [shape: f32[16,1], index: 5, kind: input, shape index: {}]   ;;  %s5705_s6 = inlined_call_operand.vmem [shape: bf16[16,16], index: 6, kind: input, shape index: {}]   ;;  %s5706_s7 = inlined_call_operand.vmem [shape: f32[16,1], index: 7, kind: input, shape index: {}]   ;;  %s5707_s8 = inlined_call_operand.vmem [shape: f32[2,16,5760], index: 8, kind: output, shape index: {}]  }
   0x1   :  { %5774 = sst [smem:[#allocation15_spill]] %s5699_s0 }
   0x2   :  { %5775 = sst [smem:[#allocation16_spill]] %s5700_s1 }
   0x3   :  { %5776 = sst [smem:[#allocation17_spill]] %s5701_s2 }
   0x4   :  { %5777 = sst [smem:[#allocation18_spill]] %s5702_s3 }
   0x5   :  { %5778 = sst [smem:[#allocation19_spill]] %s5704_s5 }
   0x6   :  { %5779 = sst [smem:[#allocation20_spill]] %s5705_s6 }
   0x7   :  { %5780 = sst [smem:[#allocation21_spill]] %s5706_s7 }
   0x8   :  { %5781 = sst [smem:[#allocation22_spill]] %s5707_s8 }
   0x9   :  { %s4306_s27 = smov 0   ;;  %s4308_s28 = smov 0  }
   0xa   :  { %s4310_s29 = smov 0   ;;  %s4312_s30 = smov 0  }
   0xb   :  { %s4314_s9 = smov 0   ;;  %s4316_s10 = smov 0  }
   0xc   :  { %s4318_s11 = smov 0   ;;  %s4320_s12 = smov 0  }
   0xd   :  { %s4322_s13 = smov 0   ;;  %s4324_s14 = smov 0  }
   0xe   :  { %s4326_s15 = smov 0  }
   0xf LB: > { %5782 = sst [smem:[#allocation9_spill]] %s4214_s11  ;;  %s27_s17 = sadd.s32 1, %s4222_s13  ;;  %s4230_s15 = sphi %s4326_s15, %s18_s15   ;;  %s4226_s14 = sphi %s4324_s14, %s5885_s14   ;;  %s4222_s13 = sphi %s4322_s13, %s5893_s13   ;;  %s4218_s12 = sphi %s4320_s12, %s5883_s12   ;;  %s4214_s11 = sphi %s4318_s11, %s5892_s11   ;;  %s4210_s10 = sphi %s4316_s10, %s5891_s10   ;;  %s4206_s9 = sphi %s4314_s9, %s5890_s9   ;;  %s4202_s30 = sphi %s4312_s30, %s5889_s30   ;;  %s4198_s29 = sphi %s4310_s29, %s5888_s29   ;;  %s4194_s28 = sphi %s4308_s28, %s5887_s28   ;;  %s4190_s27 = sphi %s4306_s27, %s5886_s27  }
  0x10   : > { %5783 = sst [smem:[#allocation10_spill]] %s4218_s12  ;;  %p28_p0 = scmp.ge.s32.totalorder %s27_s17, 3 }
  0x11   : > { %5784 = sst [smem:[#allocation11_spill]] %s4226_s14  ;;  %s30_s18 = sadd.s32 1, %s4226_s14 }
  0x12   : > { %s35_s19 = smul.u32 3, %s27_s17  ;;  %s45_s20 = sadd.s32 1, %s4210_s10 }
  0x13   : > { %s4365_s21 = scalar_select %p28_p0, 0, %s27_s17  }
  0x14   : > { %s5895_s18 = smov (!%p28_p0, %s30_s18), %s4226_s14  ;;  %s4368_s22 = sadd.s32 4294967295, %s35_s19 }
  0x15   : > { %5785 = sst [smem:[#allocation12_spill]] %s4365_s21  ;;  %s37_s23 = sadd.s32 1, %s4365_s21 }
  0x16   : > { %p32_p1 = scmp.ge.s32.totalorder %s5895_s18, 2  ;;  %s38_s24 = smul.u32 3, %s37_s23 }
  0x17   : > { %p52_p2 = scmp.ne.s32.totalorder %s4210_s10, %s4206_s9  ;;  %p53_p3 = scmp.eq.s32.totalorder %s4230_s15, 0 }
  0x18   : > { %s5897_s18 = smov (%p32_p1, %s5895_s18), 0  ;;  %s3787_s25 = sadd.s32 4294967295, %s38_s24 }
  0x19   : > { %5786 = sst [smem:[#allocation13_spill]] %s5897_s18  ;;  %p4378_p4 = por %p53_p3, %p52_p2 }
  0x1a   : > { %s40_s19 = ssub.s32 %s4226_s14, %s5897_s18  ;;  %s41_s16 = ssub.s32 %s4368_s22, %s3787_s25 }
  0x1b   : > { %s42_s8 = sor.u32 %s41_s16, %s40_s19  ;;  %s71_s12 = ssub.s32 %s27_s17, %s37_s23 }
  0x1c   : > { %p43_p5 = scmp.eq.s32.totalorder %s42_s8, 0  ;;  %s72_s11 = sor.u32 %s71_s12, %s40_s19 }
  0x1d   : > { %p73_p6 = scmp.eq.s32.totalorder %s72_s11, 0  ;;  %s75_s24 = sadd.s32 1, %s4202_s30 }
  0x1e   : > { %s4387_s6 = scalar_select %p43_p5, %s4210_s10, %s45_s20  }
  0x1f   : > { %s4390_s7 = scalar_select %p73_p6, %s4202_s30, %s75_s24  }
  0x20   : > { %5788 = sst [smem:[#allocation14_spill]] %s4387_s6  ;;  %p82_p7 = scmp.ne.s32.totalorder %s4202_s30, %s4198_s29 }
  0x21   : > { %s98_s18 = sadd.s32 2, %s4222_s13  ;;  %s100_s5 = sadd.s32 2, %s4365_s21 }
  0x22   : > { %s99_s25 = smul.u32 3, %s98_s18  ;;  %p4401_p8 = por %p82_p7, %p53_p3 }
  0x23   : > { %s101_s8 = smul.u32 3, %s100_s5  ;;  %s107_s11 = sadd.s32 1, %s4194_s28 }
  0x24   : > { %p114_p9 = scmp.ne.s32.totalorder %s4194_s28, %s4190_s27  ;;  %s5790_s17 = sadd.s32 4294967295, %s4230_s15  }
  0x25   : > { %s103_s12 = ssub.s32 %s99_s25, %s101_s8  ;;  %p262_p10 = scmp.eq.s32.totalorder %s5790_s17, 5 }
  0x26   : > { %s104_s20 = sor.u32 %s103_s12, %s40_s19  ;;  %p4412_p11 = por %p114_p9, %p53_p3 }
  0x27   : > { %p105_p12 = scmp.eq.s32.totalorder %s104_s20, 0  ;;  %p4419_p13 = por %p262_p10, %p82_p7 }
  0x28   : > { %p3789_p0 = scmp.ge.s32.totalorder %s4230_s15, 6 }
  0x29   : > { %s4424_s24 = scalar_select %p105_p12, %s4194_s28, %s107_s11  }
  0x2a   : > { %296 = sbr.rel (%p3789_p0) target bundleno = 99 (0x63), region = 32 }
  0x31   : > { %299 = sbr.rel (!%p4378_p4) target bundleno = 60 (0x3c), region = 36  ;;  %s301_s5 = sand.u32 (%p4378_p4), 1, %s4210_s10  }
  0x32   : > { %s307_s19 = smul.u32 (%p4378_p4), 3, %s4368_s22  ;;  %s5793_s0 = sld [smem:[#allocation15_spill]] (%p4378_p4) }
  0x33   : > { %s3968_s25 = smul.u32 (%p4378_p4), 24, %s301_s5 }
  0x34   : > { %s3969_s8 = smul.u32 (%p4378_p4), 90, %s4226_s14 }
  0x35   : > { %s303_s6 = scalar_lea.vmem (%p4378_p4), [#allocation4], %s3968_s25 }
  0x36   : > { %s309_s12 = sadd.s32 (%p4378_p4), %s3969_s8, %s307_s19 }
  0x37   : > { %s3791_s17 = sshll.u32 (%p4378_p4), %s309_s12, 2 }
  0x38   : > { %s311_s11 = scalar_lea.vmem %s5793_s0, %s3791_s17 }
  0x39   : > { %v326_v0 = vld [vmem:[%s311_s11] sm:$0xff]  ;;  %v328_v1 = vld [vmem:[%s311_s11 + $0xb4] sm:$0xff]  ;;  %v3792_v2 = vld [vmem:[%s311_s11 + $0x8] sm:$0xf] }
  0x3a   : > { %327 = vst [vmem:[%s303_s6] sm:$0xff] %v326_v0  ;;  %329 = vst [vmem:[%s303_s6 + $0xc] sm:$0xff] %v328_v1  ;;  %v3794_v3 = vld [vmem:[%s311_s11 + $0xbc] sm:$0xf] }
  0x3b   : > { %3793 = vst [vmem:[%s303_s6 + $0x8] sm:$0xf] %v3792_v2  ;;  %3795 = vst [vmem:[%s303_s6 + $0x14] sm:$0xf] %v3794_v3 }
  0x3c PF: > { %346 = sbr.rel (!%p4401_p8) target bundleno = 74 (0x4a), region = 62  ;;  %s348_s22 = sand.u32 (%p4401_p8), 1, %s4202_s30  }
  0x3d   : > { %s3645_s26 = smul.u32 (%p4401_p8), 9, %s4222_s13  ;;  %s5794_s1 = sld [smem:[#allocation16_spill]] (%p4401_p8) }
  0x3e   : > { %s3970_s21 = smul.u32 (%p4401_p8), 72, %s348_s22 }
  0x3f   : > { %s3646_s5 = smul.u32 (%p4401_p8), 90, %s4226_s14 }
  0x40   : > { %s350_s6 = scalar_lea.vmem (%p4401_p8), [#allocation5], %s3970_s21 }
  0x41   : > { %s3647_s19 = sadd.s32 (%p4401_p8), %s3646_s5, %s3645_s26 }
  0x42   : > { %s3796_s8 = sshll.u32 (%p4401_p8), %s3647_s19, 2 }
  0x43   : > { %s3649_s17 = scalar_lea.vmem %s5794_s1, %s3796_s8 }
  0x44   : > { %v3797_v4 = vld [vmem:[%s3649_s17 + $0x24] sm:$0xff]  ;;  %v3798_v5 = vld [vmem:[%s3649_s17 + $0x2c] sm:$0xff]  ;;  %v3799_v6 = vld [vmem:[%s3649_s17 + $0x34] sm:$0xff] }
  0x45   : > { %372 = vst [vmem:[%s350_s6] sm:$0xff] %v3797_v4  ;;  %374 = vst [vmem:[%s350_s6 + $0x8] sm:$0xff] %v3798_v5  ;;  %v3800_v7 = vld [vmem:[%s3649_s17 + $0x3c] sm:$0xff]  ;;  %v3803_v10 = vld [vmem:[%s3649_s17 + $0xe8] sm:$0xff] }
  0x46   : > { %376 = vst [vmem:[%s350_s6 + $0x10] sm:$0xff] %v3799_v6  ;;  %v3801_v8 = vld [vmem:[%s3649_s17 + $0xd8] sm:$0xff]  ;;  %v3802_v9 = vld [vmem:[%s3649_s17 + $0xe0] sm:$0xff]  ;;  %378 = vst [vmem:[%s350_s6 + $0x18] sm:$0xff] %v3800_v7 }
  0x47   : > { %380 = vst [vmem:[%s350_s6 + $0x24] sm:$0xff] %v3801_v8  ;;  %382 = vst [vmem:[%s350_s6 + $0x2c] sm:$0xff] %v3802_v9  ;;  %v3804_v11 = vld [vmem:[%s3649_s17 + $0xf0] sm:$0xff]  ;;  %v3805_v12 = vld [vmem:[%s3649_s17 + $0x44] sm:$0xf] }
  0x48   : > { %384 = vst [vmem:[%s350_s6 + $0x34] sm:$0xff] %v3803_v10  ;;  %386 = vst [vmem:[%s350_s6 + $0x3c] sm:$0xff] %v3804_v11  ;;  %v3807_v13 = vld [vmem:[%s3649_s17 + $0xf8] sm:$0xf] }
  0x49   : > { %3806 = vst [vmem:[%s350_s6 + $0x20] sm:$0xf] %v3805_v12  ;;  %3808 = vst [vmem:[%s350_s6 + $0x44] sm:$0xf] %v3807_v13 }
  0x4a PF: > { %403 = sbr.rel (!%p4412_p11) target bundleno = 85 (0x55), region = 88  ;;  %s405_s20 = sand.u32 (%p4412_p11), 1, %s4194_s28  }
  0x4b   : > { %s3654_s11 = smul.u32 (%p4412_p11), 9, %s4222_s13  ;;  %s5795_s2 = sld [smem:[#allocation17_spill]] (%p4412_p11) }
  0x4c   : > { %s3971_s22 = smul.u32 (%p4412_p11), 24, %s405_s20 }
  0x4d   : > { %s3655_s26 = smul.u32 (%p4412_p11), 90, %s4226_s14 }
  0x4e   : > { %s407_s25 = scalar_lea.vmem (%p4412_p11), [#allocation6], %s3971_s22 }
  0x4f   : > { %s3656_s21 = sadd.s32 (%p4412_p11), %s3655_s26, %s3654_s11 }
  0x50   : > { %s3809_s5 = sshll.u32 (%p4412_p11), %s3656_s21, 2 }
  0x51   : > { %s3658_s12 = scalar_lea.vmem %s5795_s2, %s3809_s5 }
  0x52   : > { %v3810_v14 = vld [vmem:[%s3658_s12 + $0x48] sm:$0xff]  ;;  %v3811_v15 = vld [vmem:[%s3658_s12 + $0xfc] sm:$0xff]  ;;  %v3812_v16 = vld [vmem:[%s3658_s12 + $0x50] sm:$0xf] }
  0x53   : > { %430 = vst [vmem:[%s407_s25] sm:$0xff] %v3810_v14  ;;  %432 = vst [vmem:[%s407_s25 + $0xc] sm:$0xff] %v3811_v15  ;;  %v3814_v17 = vld [vmem:[%s3658_s12 + $0x104] sm:$0xf] }
  0x54   : > { %3813 = vst [vmem:[%s407_s25 + $0x8] sm:$0xf] %v3812_v16  ;;  %3815 = vst [vmem:[%s407_s25 + $0x14] sm:$0xf] %v3814_v17 }
  0x55 PF: > { %449 = sbr.rel (!%p4401_p8) target bundleno = 99 (0x63), region = 114  ;;  %s451_s23 = sand.u32 (%p4401_p8), 1, %s4202_s30  }
  0x56   : > { %s3663_s17 = smul.u32 (%p4401_p8), 9, %s4222_s13  ;;  %s5796_s3 = sld [smem:[#allocation18_spill]] (%p4401_p8) }
  0x57   : > { %s3972_s6 = smul.u32 (%p4401_p8), 72, %s451_s23 }
  0x58   : > { %s3664_s20 = smul.u32 (%p4401_p8), 90, %s4226_s14 }
  0x59   : > { %s453_s19 = scalar_lea.vmem (%p4401_p8), [#allocation7], %s3972_s6 }
  0x5a   : > { %s3665_s11 = sadd.s32 (%p4401_p8), %s3664_s20, %s3663_s17 }
  0x5b   : > { %s3816_s26 = sshll.u32 (%p4401_p8), %s3665_s11, 2 }
  0x5c   : > { %s3667_s5 = scalar_lea.vmem %s5796_s3, %s3816_s26 }
  0x5d   : > { %v3817_v18 = vld [vmem:[%s3667_s5 + $0x24] sm:$0xff]  ;;  %v3818_v19 = vld [vmem:[%s3667_s5 + $0x2c] sm:$0xff]  ;;  %v3819_v20 = vld [vmem:[%s3667_s5 + $0x34] sm:$0xff] }
  0x5e   : > { %475 = vst [vmem:[%s453_s19] sm:$0xff] %v3817_v18  ;;  %477 = vst [vmem:[%s453_s19 + $0x8] sm:$0xff] %v3818_v19  ;;  %v3820_v21 = vld [vmem:[%s3667_s5 + $0x3c] sm:$0xff]  ;;  %v3823_v24 = vld [vmem:[%s3667_s5 + $0xe8] sm:$0xff] }
  0x5f   : > { %479 = vst [vmem:[%s453_s19 + $0x10] sm:$0xff] %v3819_v20  ;;  %v3821_v22 = vld [vmem:[%s3667_s5 + $0xd8] sm:$0xff]  ;;  %v3822_v23 = vld [vmem:[%s3667_s5 + $0xe0] sm:$0xff]  ;;  %481 = vst [vmem:[%s453_s19 + $0x18] sm:$0xff] %v3820_v21 }
  0x60   : > { %483 = vst [vmem:[%s453_s19 + $0x24] sm:$0xff] %v3821_v22  ;;  %485 = vst [vmem:[%s453_s19 + $0x2c] sm:$0xff] %v3822_v23  ;;  %v3824_v25 = vld [vmem:[%s3667_s5 + $0xf0] sm:$0xff]  ;;  %v3825_v26 = vld [vmem:[%s3667_s5 + $0x44] sm:$0xf] }
  0x61   : > { %487 = vst [vmem:[%s453_s19 + $0x34] sm:$0xff] %v3823_v24  ;;  %489 = vst [vmem:[%s453_s19 + $0x3c] sm:$0xff] %v3824_v25  ;;  %v3827_v27 = vld [vmem:[%s3667_s5 + $0xf8] sm:$0xf] }
  0x62   : > { %3826 = vst [vmem:[%s453_s19 + $0x20] sm:$0xf] %v3825_v26  ;;  %3828 = vst [vmem:[%s453_s19 + $0x44] sm:$0xf] %v3827_v27 }
  0x63 PF: > { %p3829_p1 = scmp.ge.s32.totalorder %s4230_s15, 1  ;;  %p505_p2 = scmp.lt.s32.totalorder %s4230_s15, 7 }
  0x65   : > { %p506_p3 = pnand %p3829_p1, %p505_p2 }
  0x66   : > { %s5712_s16 = sand.u32 (!%p506_p3), 1, %s4198_s29   ;;  %s512_s12 = sand.u32 (!%p506_p3), 1, %s4206_s9   ;;  %vm742_vm0 = vcmask (!%p506_p3), 711680   ;;  %vm810_vm1 = vcmask (!%p506_p3), 703488   ;;  %vm878_vm2 = vcmask (!%p506_p3), 695296   ;;  %vm5773_vm3 = vcmask (!%p506_p3), 564224  }
  0x67   : > { %509 = sbr.rel (%p506_p3) target bundleno = 994 (0x3e2), region = 140  ;;  %s5765_s17 = smov (!%p506_p3), 87   ;;  %v4633_v59 = vld [vmem:[%s5703_s4 + $0x4] ss:$16 sps:$4 sm:$0xff] (!%p506_p3)   ;;  %vm5772_vm4 = vcmask (!%p506_p3), 556032   ;;  %vm5771_vm5 = vcmask (!%p506_p3), 547840  }
  0x68   : > { %s4464_s8 = smul.u32 (!%p506_p3), 72, %s5712_s16  ;;  %s5764_s9 = smov (!%p506_p3), 86   ;;  %2888 = vmatprep.mubr.bf16.mxu1 (!%p506_p3), %v4633_v59  ;;  %2802 = vmatprep.mubr.bf16.mxu0 (!%p506_p3), %v4633_v59  ;;  %vm5770_vm6 = vcmask (!%p506_p3), 416768   ;;  %vm5769_vm7 = vcmask (!%p506_p3), 408576   ;;  %vm1286_vm8 = vcmask (!%p506_p3), 400384   ;;  %vm1354_vm9 = vcmask (!%p506_p3), 154624  }
  0x69   : > { %s3973_s25 = smul.u32 (!%p506_p3), 24, %s512_s12  ;;  %s5763_s20 = smov (!%p506_p3), 85   ;;  %vm1422_vm10 = vcmask (!%p506_p3), 146432   ;;  %vm1490_vm11 = vcmask (!%p506_p3), 138240   ;;  %vm5747_vm12 = vcmask (!%p506_p3), 7168   ;;  %vm5748_vm13 = vcmask (!%p506_p3), 1039360  }
  0x6a   : > { %s4468_s23 = scalar_lea.vmem (!%p506_p3), [#allocation5], %s4464_s8  ;;  %s5762_s11 = smov (!%p506_p3), 69   ;;  %vm5749_vm14 = vcmask (!%p506_p3), 908288   ;;  %vm1780_vm15 = vcmask (!%p506_p3), 900096  }
  0x6b   : > { %v4471_v28 = vld [vmem:[%s4468_s23] ss:$36 sps:$4 sm:$0xff] (!%p506_p3)   ;;  %s514_s6 = scalar_lea.vmem (!%p506_p3), [#allocation4], %s3973_s25  ;;  %s5761_s26 = smov (!%p506_p3), 68   ;;  %v4546_v33 = vld [vmem:[%s4468_s23 + $0x8] ss:$36 sps:$4 sm:$0xff] (!%p506_p3)  }
  0x6c   : > { %728 = vrot.lane.b32.xlu0 (!%p506_p3), %v4471_v28, %s5765_s17  ;;  %v4475_v29 = vld [vmem:[%s514_s6 + $0x8] ss:$12 sps:$4 sm:$0xff] (!%p506_p3)   ;;  %v4108_v31 = vld [vmem:[%s514_s6 + $0x4] ss:$12 sps:$4 sm:$0xff] (!%p506_p3)   ;;  %v4110_v32 = vld [vmem:[%s514_s6] ss:$12 sps:$4 sm:$0xff] (!%p506_p3)  }
  0x6d   : > { %v4478_v30 = vld [vmem:[%s4468_s23 + $0x4] ss:$36 sps:$4 sm:$0xff] (!%p506_p3)   ;;  %726 = vrot.lane.b32.xlu1 (!%p506_p3), %v4475_v29, %s5765_s17  ;;  %s5760_s21 = smov (!%p506_p3), 67   ;;  %s5759_s22 = smov (!%p506_p3), 51   ;;  %v4551_v34 = vld [vmem:[%s4468_s23 + $0xc] ss:$36 sps:$4 sm:$0xff] (!%p506_p3)  }
  0x6e   : > { %s5757_s5 = smov 50   ;;  %s5745_s19 = smov 49   ;;  %v4606_v47 = vld [vmem:[%s4468_s23 + $0x10] ss:$36 sps:$4 sm:$0xff]   ;;  %v4681_v18 = vld [vmem:[%s4468_s23 + $0x18] ss:$36 sps:$4 sm:$0xff]  }
  0x6f   : > { %s5719_s12 = smov 19   ;;  %s5717_s25 = smov 18   ;;  %v4674_v16 = vld [vmem:[%s4468_s23 + $0x14] ss:$36 sps:$4 sm:$0xff]  }
  0x70   : > { %730 = vrot.lane.b32.xlu0 %v4478_v30, %s5765_s17  ;;  %s5713_s6 = smov 17   ;;  %s5715_s16 = smov 1  }
  0x71   : > { %796 = vrot.lane.b32.xlu1 %v4471_v28, %s5764_s9  ;;  %s5810_s0 = smov 60   ;;  %s5811_s1 = smov 59  }
  0x72   : > { %s5812_s2 = smov 43   ;;  %s5813_s3 = smov 42  }
  0x73   : > { %s5814_s14 = smov 41  }
  0x74   : > { %798 = vrot.lane.b32.xlu0 %v4478_v30, %s5764_s9 }
  0x75   : > { %724 = vrot.lane.b32.xlu1 %v4108_v31, %s5765_s17 }
  0x78   : > { %794 = vrot.lane.b32.xlu0 %v4475_v29, %s5764_s9 }
  0x79   : > { %722 = vrot.lane.b32.xlu1 %v4110_v32, %s5765_s17 }
  0x7c   : > { %864 = vrot.lane.b32.xlu0 %v4471_v28, %s5763_s20 }
  0x7d   : > { %866 = vrot.lane.b32.xlu1 %v4478_v30, %s5763_s20 }
  0x80   : > { %792 = vrot.lane.b32.xlu0 %v4108_v31, %s5764_s9 }
  0x81   : > { %862 = vrot.lane.b32.xlu1 %v4475_v29, %s5763_s20 }
  0x84   : > { %790 = vrot.lane.b32.xlu0 %v4110_v32, %s5764_s9 }
  0x85   : > { %932 = vrot.lane.b32.xlu1 %v4471_v28, %s5762_s11 }
  0x88   : > { %934 = vrot.lane.b32.xlu0 %v4478_v30, %s5762_s11 }
  0x89   : > { %860 = vrot.lane.b32.xlu1 %v4108_v31, %s5763_s20 }
  0x8c   : > { %930 = vrot.lane.b32.xlu0 %v4475_v29, %s5762_s11 }
  0x8d   : > { %858 = vrot.lane.b32.xlu1 %v4110_v32, %s5763_s20 }
  0x90   : > { %1000 = vrot.lane.b32.xlu0 %v4471_v28, %s5761_s26 }
  0x91   : > { %1002 = vrot.lane.b32.xlu1 %v4478_v30, %s5761_s26 }
  0x94   : > { %928 = vrot.lane.b32.xlu0 %v4108_v31, %s5762_s11 }
  0x95   : > { %998 = vrot.lane.b32.xlu1 %v4475_v29, %s5761_s26 }
  0x98   : > { %926 = vrot.lane.b32.xlu0 %v4110_v32, %s5762_s11 }
  0x99   : > { %1068 = vrot.lane.b32.xlu1 %v4471_v28, %s5760_s21 }
  0x9c   : > { %1070 = vrot.lane.b32.xlu0 %v4478_v30, %s5760_s21 }
  0x9d   : > { %996 = vrot.lane.b32.xlu1 %v4108_v31, %s5761_s26 }
  0xa0   : > { %1066 = vrot.lane.b32.xlu0 %v4475_v29, %s5760_s21 }
  0xa1   : > { %994 = vrot.lane.b32.xlu1 %v4110_v32, %s5761_s26 }
  0xa4   : > { %1136 = vrot.lane.b32.xlu0 %v4471_v28, %s5759_s22 }
  0xa5   : > { %1138 = vrot.lane.b32.xlu1 %v4478_v30, %s5759_s22 }
  0xa8   : > { %1064 = vrot.lane.b32.xlu0 %v4108_v31, %s5760_s21 }
  0xa9   : > { %1134 = vrot.lane.b32.xlu1 %v4475_v29, %s5759_s22 }
  0xac   : > { %1062 = vrot.lane.b32.xlu0 %v4110_v32, %s5760_s21 }
  0xad   : > { %1204 = vrot.lane.b32.xlu1 %v4471_v28, %s5757_s5 }
  0xb0   : > { %1206 = vrot.lane.b32.xlu0 %v4478_v30, %s5757_s5 }
  0xb1   : > { %1132 = vrot.lane.b32.xlu1 %v4108_v31, %s5759_s22 }
  0xb4   : > { %1202 = vrot.lane.b32.xlu0 %v4475_v29, %s5757_s5 }
  0xb5   : > { %1130 = vrot.lane.b32.xlu1 %v4110_v32, %s5759_s22 }
  0xb8   : > { %1272 = vrot.lane.b32.xlu0 %v4471_v28, %s5745_s19 }
  0xb9   : > { %1274 = vrot.lane.b32.xlu1 %v4478_v30, %s5745_s19 }
  0xbc   : > { %1200 = vrot.lane.b32.xlu0 %v4108_v31, %s5757_s5 }
  0xbd   : > { %1270 = vrot.lane.b32.xlu1 %v4475_v29, %s5745_s19 }
  0xc0   : > { %1198 = vrot.lane.b32.xlu0 %v4110_v32, %s5757_s5 }
  0xc1   : > { %1340 = vrot.lane.b32.xlu1 %v4546_v33, %s5719_s12 }
  0xc4   : > { %1342 = vrot.lane.b32.xlu0 %v4551_v34, %s5719_s12 }
  0xc5   : > { %1268 = vrot.lane.b32.xlu1 %v4108_v31, %s5745_s19 }
  0xc8   : > { %1338 = vrot.lane.b32.xlu0 %v4478_v30, %s5719_s12 }
  0xc9   : > { %1266 = vrot.lane.b32.xlu1 %v4110_v32, %s5745_s19  ;;  %s5797_s19 = smov 49  }
  0xcc   : > { %1408 = vrot.lane.b32.xlu0 %v4546_v33, %s5717_s25 }
  0xcd   : > { %1410 = vrot.lane.b32.xlu1 %v4551_v34, %s5717_s25 }
  0xd0   : > { %1336 = vrot.lane.b32.xlu0 %v4471_v28, %s5719_s12 }
  0xd1   : > { %1406 = vrot.lane.b32.xlu1 %v4478_v30, %s5717_s25 }
  0xd4   : > { %1334 = vrot.lane.b32.xlu0 %v4475_v29, %s5719_s12  ;;  %s5723_s12 = smov 110  }
  0xd5   : > { %1476 = vrot.lane.b32.xlu1 %v4546_v33, %s5713_s6 }
  0xd8   : > { %1478 = vrot.lane.b32.xlu0 %v4551_v34, %s5713_s6 }
  0xd9   : > { %1404 = vrot.lane.b32.xlu1 %v4471_v28, %s5717_s25 }
  0xdc   : > { %1474 = vrot.lane.b32.xlu0 %v4478_v30, %s5713_s6 }
  0xdd   : > { %1402 = vrot.lane.b32.xlu1 %v4475_v29, %s5717_s25  ;;  %s5725_s25 = smov 109  }
  0xde   : > { %v729_v35 = vpop.permute.xlu0 %728 }
  0xdf   : > { %v727_v36 = vpop.permute.xlu1 %726 }
  0xe0   : > { %1544 = vrot.lane.b32.xlu0 %v4546_v33, %s5715_s16  ;;  %v745_v39 = vsel %vm742_vm0, %v727_v36, %v729_v35 }
  0xe1   : > { %1546 = vrot.lane.b32.xlu1 %v4551_v34, %s5715_s16 }
  0xe2   : > { %v4584_v37 = vpop.permute.xlu0 %730 }
  0xe3   : > { %v746_v38 = vsel %vm742_vm0, %v729_v35, %v4584_v37  ;;  %v797_v40 = vpop.permute.xlu1 %796 }
  0xe4   : > { %2856 = vmatprep.subr.bf16.mxu1 %v746_v38  ;;  %1472 = vrot.lane.b32.xlu0 %v4471_v28, %s5713_s6 }
  0xe5   : > { %2857 = vmatpush1.bf16.msra.mxu1 %v745_v39  ;;  %1542 = vrot.lane.b32.xlu1 %v4478_v30, %s5715_s16 }
  0xe6   : > { %v4593_v41 = vpop.permute.xlu0 %798 }
  0xe7   : > { %v814_v42 = vsel %vm810_vm1, %v797_v40, %v4593_v41  ;;  %v725_v43 = vpop.permute.xlu1 %724 }
  0xe8   : > { %2858 = vmatprep.subr.bf16.mxu1 %v814_v42  ;;  %1470 = vrot.lane.b32.xlu0 %v4475_v29, %s5713_s6  ;;  %v744_v44 = vsel %vm742_vm0, %v725_v43, %v727_v36  ;;  %s5741_s6 = smov 127  }
  0xe9   : > { %2770 = vmatprep.subr.bf16.mxu0 %v744_v44  ;;  %1540 = vrot.lane.b32.xlu1 %v4471_v28, %s5715_s16 }
  0xea   : > { %v795_v45 = vpop.permute.xlu0 %794 }
  0xeb   : > { %v813_v46 = vsel %vm810_vm1, %v795_v45, %v797_v40  ;;  %v723_v48 = vpop.permute.xlu1 %722 }
  0xec   : > { %2859 = vmatpush1.bf16.msra.mxu1 %v813_v46  ;;  %1538 = vrot.lane.b32.xlu0 %v4475_v29, %s5715_s16  ;;  %v743_v49 = vsel %vm742_vm0, %v723_v48, %v725_v43  ;;  %s5721_s16 = smov 111  }
  0xed   : > { %1630 = vrot.lane.b32.xlu1 %v4551_v34, %s5741_s6  ;;  %2771 = vmatpush1.bf16.msra.mxu0 %v743_v49 }
  0xee   : > { %v865_v50 = vpop.permute.xlu0 %864 }
  0xef   : > { %v4615_v51 = vpop.permute.xlu1 %866 }
  0xf0   : > { %1632 = vrot.lane.b32.xlu0 %v4606_v47, %s5741_s6  ;;  %v882_v52 = vsel %vm878_vm2, %v865_v50, %v4615_v51 }
  0xf1   : > { %1628 = vrot.lane.b32.xlu1 %v4546_v33, %s5741_s6  ;;  %2860 = vmatprep.subr.bf16.mxu1 %v882_v52 }
  0xf2   : > { %v793_v53 = vpop.permute.xlu0 %792 }
  0xf3   : > { %v812_v54 = vsel %vm810_vm1, %v793_v53, %v795_v45  ;;  %v863_v55 = vpop.permute.xlu1 %862 }
  0xf4   : > { %1698 = vrot.lane.b32.xlu0 %v4551_v34, %s5721_s16  ;;  %2772 = vmatprep.subr.bf16.mxu0 %v812_v54  ;;  %v881_v56 = vsel %vm878_vm2, %v863_v55, %v865_v50 }
  0xf5   : > { %1700 = vrot.lane.b32.xlu1 %v4606_v47, %s5721_s16  ;;  %2861 = vmatpush1.bf16.msra.mxu1 %v881_v56 }
  0xf6   : > { %v791_v57 = vpop.permute.xlu0 %790 }
  0xf7   : > { %v811_v58 = vsel %vm810_vm1, %v791_v57, %v793_v53  ;;  %v933_v60 = vpop.permute.xlu1 %932 }
  0xf8   : > { %1626 = vrot.lane.b32.xlu0 %v4478_v30, %s5741_s6  ;;  %2773 = vmatpush1.bf16.msra.mxu0 %v811_v58 }
  0xf9   : > { %1696 = vrot.lane.b32.xlu1 %v4546_v33, %s5721_s16 }
  0xfa   : > { %v4635_v61 = vpop.permute.xlu0 %934 }
  0xfb   : > { %v950_v62 = vsel %vm5773_vm3, %v933_v60, %v4635_v61  ;;  %v861_v63 = vpop.permute.xlu1 %860 }
  0xfc   : > { %1624 = vrot.lane.b32.xlu0 %v4471_v28, %s5741_s6  ;;  %2862 = vmatprep.subr.bf16.mxu1 %v950_v62  ;;  %v880_v0 = vsel %vm878_vm2, %v861_v63, %v863_v55 }
  0xfd   : > { %1766 = vrot.lane.b32.xlu1 %v4551_v34, %s5723_s12  ;;  %2774 = vmatprep.subr.bf16.mxu0 %v880_v0 }
  0xfe   : > { %v931_v1 = vpop.permute.xlu0 %930 }
  0xff   : > { %v949_v2 = vsel %vm5773_vm3, %v931_v1, %v933_v60  ;;  %v859_v3 = vpop.permute.xlu1 %858 }
 0x100   : > { %1768 = vrot.lane.b32.xlu0 %v4606_v47, %s5723_s12  ;;  %2863 = vmatpush1.bf16.msra.mxu1 %v949_v2  ;;  %v879_v4 = vsel %vm878_vm2, %v859_v3, %v861_v63 }
 0x101   : > { %1694 = vrot.lane.b32.xlu1 %v4478_v30, %s5721_s16  ;;  %2775 = vmatpush1.bf16.msra.mxu0 %v879_v4 }
 0x102   : > { %v1001_v5 = vpop.permute.xlu0 %1000 }
 0x103   : > { %v4656_v6 = vpop.permute.xlu1 %1002 }
 0x104   : > { %1764 = vrot.lane.b32.xlu0 %v4546_v33, %s5723_s12  ;;  %v1018_v7 = vsel %vm5772_vm4, %v1001_v5, %v4656_v6 }
 0x105   : > { %1692 = vrot.lane.b32.xlu1 %v4471_v28, %s5721_s16  ;;  %2864 = vmatprep.subr.bf16.mxu1 %v1018_v7  ;;  %s5727_s16 = smov 79  }
 0x106   : > { %v929_v8 = vpop.permute.xlu0 %928 }
 0x107   : > { %v948_v9 = vsel %vm5773_vm3, %v929_v8, %v931_v1  ;;  %v999_v10 = vpop.permute.xlu1 %998 }
 0x108   : > { %1834 = vrot.lane.b32.xlu0 %v4551_v34, %s5725_s25  ;;  %2776 = vmatprep.subr.bf16.mxu0 %v948_v9  ;;  %v1017_v11 = vsel %vm5772_vm4, %v999_v10, %v1001_v5 }
 0x109   : > { %1836 = vrot.lane.b32.xlu1 %v4606_v47, %s5725_s25  ;;  %2865 = vmatpush1.bf16.msra.mxu1 %v1017_v11 }
 0x10a   : > { %v927_v12 = vpop.permute.xlu0 %926 }
 0x10b   : > { %v947_v13 = vsel %vm5773_vm3, %v927_v12, %v929_v8  ;;  %v1069_v14 = vpop.permute.xlu1 %1068 }
 0x10c   : > { %1762 = vrot.lane.b32.xlu0 %v4478_v30, %s5723_s12  ;;  %2777 = vmatpush1.bf16.msra.mxu0 %v947_v13 }
 0x10d   : > { %1832 = vrot.lane.b32.xlu1 %v4546_v33, %s5725_s25 }
 0x10e   : > { %v4671_v15 = vpop.permute.xlu0 %1070 }
 0x10f   : > { %v1086_v17 = vsel %vm5771_vm5, %v1069_v14, %v4671_v15  ;;  %v997_v19 = vpop.permute.xlu1 %996 }
 0x110   : > { %1760 = vrot.lane.b32.xlu0 %v4471_v28, %s5723_s12  ;;  %2866 = vmatprep.subr.bf16.mxu1 %v1086_v17  ;;  %v1016_v20 = vsel %vm5772_vm4, %v997_v19, %v999_v10  ;;  %s5729_s12 = smov 78  }
 0x111   : > { %1902 = vrot.lane.b32.xlu1 %v4674_v16, %s5727_s16  ;;  %2778 = vmatprep.subr.bf16.mxu0 %v1016_v20 }
 0x112   : > { %v1067_v21 = vpop.permute.xlu0 %1066 }
 0x113   : > { %v1085_v22 = vsel %vm5771_vm5, %v1067_v21, %v1069_v14  ;;  %v995_v23 = vpop.permute.xlu1 %994 }
 0x114   : > { %1904 = vrot.lane.b32.xlu0 %v4681_v18, %s5727_s16  ;;  %2867 = vmatpush1.bf16.msra.mxu1 %v1085_v22  ;;  %v1015_v24 = vsel %vm5772_vm4, %v995_v23, %v997_v19 }
 0x115   : > { %1830 = vrot.lane.b32.xlu1 %v4478_v30, %s5725_s25  ;;  %2779 = vmatpush1.bf16.msra.mxu0 %v1015_v24 }
 0x116   : > { %v1137_v25 = vpop.permute.xlu0 %1136 }
 0x117   : > { %v4696_v26 = vpop.permute.xlu1 %1138 }
 0x118   : > { %1900 = vrot.lane.b32.xlu0 %v4606_v47, %s5727_s16  ;;  %v1154_v27 = vsel %vm5770_vm6, %v1137_v25, %v4696_v26 }
 0x119   : > { %1828 = vrot.lane.b32.xlu1 %v4471_v28, %s5725_s25  ;;  %2868 = vmatprep.subr.bf16.mxu1 %v1154_v27  ;;  %s5731_s25 = smov 77  }
 0x11a   : > { %v1065_v29 = vpop.permute.xlu0 %1064 }
 0x11b   : > { %v1084_v31 = vsel %vm5771_vm5, %v1065_v29, %v1067_v21  ;;  %v1135_v32 = vpop.permute.xlu1 %1134 }
 0x11c   : > { %1970 = vrot.lane.b32.xlu0 %v4674_v16, %s5729_s12  ;;  %2780 = vmatprep.subr.bf16.mxu0 %v1084_v31  ;;  %v1153_v35 = vsel %vm5770_vm6, %v1135_v32, %v1137_v25 }
 0x11d   : > { %1972 = vrot.lane.b32.xlu1 %v4681_v18, %s5729_s12  ;;  %2869 = vmatpush1.bf16.msra.mxu1 %v1153_v35 }
 0x11e   : > { %v1063_v36 = vpop.permute.xlu0 %1062 }
 0x11f   : > { %v1083_v38 = vsel %vm5771_vm5, %v1063_v36, %v1065_v29  ;;  %v1205_v39 = vpop.permute.xlu1 %1204 }
 0x120   : > { %1898 = vrot.lane.b32.xlu0 %v4551_v34, %s5727_s16  ;;  %2781 = vmatpush1.bf16.msra.mxu0 %v1083_v38 }
 0x121   : > { %1968 = vrot.lane.b32.xlu1 %v4606_v47, %s5729_s12 }
 0x122   : > { %v4711_v40 = vpop.permute.xlu0 %1206 }
 0x123   : > { %v1222_v42 = vsel %vm5769_vm7, %v1205_v39, %v4711_v40  ;;  %v1133_v43 = vpop.permute.xlu1 %1132 }
 0x124   : > { %1896 = vrot.lane.b32.xlu0 %v4546_v33, %s5727_s16  ;;  %2870 = vmatprep.subr.bf16.mxu1 %v1222_v42  ;;  %v1152_v44 = vsel %vm5770_vm6, %v1133_v43, %v1135_v32  ;;  %s5733_s16 = smov 61  }
 0x125   : > { %2038 = vrot.lane.b32.xlu1 %v4674_v16, %s5731_s25  ;;  %2782 = vmatprep.subr.bf16.mxu0 %v1152_v44 }
 0x126   : > { %v1203_v45 = vpop.permute.xlu0 %1202 }
 0x127   : > { %v1221_v46 = vsel %vm5769_vm7, %v1203_v45, %v1205_v39  ;;  %v1131_v48 = vpop.permute.xlu1 %1130 }
 0x128   : > { %2040 = vrot.lane.b32.xlu0 %v4681_v18, %s5731_s25  ;;  %2871 = vmatpush1.bf16.msra.mxu1 %v1221_v46  ;;  %v1151_v49 = vsel %vm5770_vm6, %v1131_v48, %v1133_v43 }
 0x129   : > { %1966 = vrot.lane.b32.xlu1 %v4551_v34, %s5729_s12  ;;  %2783 = vmatpush1.bf16.msra.mxu0 %v1151_v49 }
 0x12a   : > { %v1273_v50 = vpop.permute.xlu0 %1272 }
 0x12b   : > { %v4730_v52 = vpop.permute.xlu1 %1274 }
 0x12c   : > { %2036 = vrot.lane.b32.xlu0 %v4606_v47, %s5731_s25  ;;  %v1290_v53 = vsel %vm1286_vm8, %v1273_v50, %v4730_v52 }
 0x12d   : > { %1964 = vrot.lane.b32.xlu1 %v4546_v33, %s5729_s12  ;;  %2872 = vmatprep.subr.bf16.mxu1 %v1290_v53  ;;  %s5735_s12 = smov 60  }
 0x12e   : > { %v1201_v54 = vpop.permute.xlu0 %1200 }
 0x12f   : > { %v1220_v55 = vsel %vm5769_vm7, %v1201_v54, %v1203_v45  ;;  %v1271_v56 = vpop.permute.xlu1 %1270 }
 0x130   : > { %2106 = vrot.lane.b32.xlu0 %v4674_v16, %s5733_s16  ;;  %2784 = vmatprep.subr.bf16.mxu0 %v1220_v55  ;;  %v1289_v57 = vsel %vm1286_vm8, %v1271_v56, %v1273_v50 }
 0x131   : > { %2108 = vrot.lane.b32.xlu1 %v4681_v18, %s5733_s16  ;;  %2873 = vmatpush1.bf16.msra.mxu1 %v1289_v57 }
 0x132   : > { %v1199_v58 = vpop.permute.xlu0 %1198 }
 0x133   : > { %v1219_v60 = vsel %vm5769_vm7, %v1199_v58, %v1201_v54  ;;  %v1341_v62 = vpop.permute.xlu1 %1340 }
 0x134   : > { %2034 = vrot.lane.b32.xlu0 %v4551_v34, %s5731_s25  ;;  %2785 = vmatpush1.bf16.msra.mxu0 %v1219_v60 }
 0x135   : > { %2104 = vrot.lane.b32.xlu1 %v4606_v47, %s5733_s16 }
 0x136   : > { %v4745_v63 = vpop.permute.xlu0 %1342 }
 0x137   : > { %v1358_v0 = vsel %vm1354_vm9, %v1341_v62, %v4745_v63  ;;  %v1269_v1 = vpop.permute.xlu1 %1268 }
 0x138   : > { %2032 = vrot.lane.b32.xlu0 %v4546_v33, %s5731_s25  ;;  %2874 = vmatprep.subr.bf16.mxu1 %v1358_v0  ;;  %v1288_v2 = vsel %vm1286_vm8, %v1269_v1, %v1271_v56  ;;  %s5737_s25 = smov 59  }
 0x139   : > { %2174 = vrot.lane.b32.xlu1 %v4674_v16, %s5735_s12  ;;  %2786 = vmatprep.subr.bf16.mxu0 %v1288_v2 }
 0x13a   : > { %v1339_v3 = vpop.permute.xlu0 %1338 }
 0x13b   : > { %v1357_v4 = vsel %vm1354_vm9, %v1339_v3, %v1341_v62  ;;  %v1267_v5 = vpop.permute.xlu1 %1266 }
 0x13c   : > { %2176 = vrot.lane.b32.xlu0 %v4681_v18, %s5735_s12  ;;  %2875 = vmatpush1.bf16.msra.mxu1 %v1357_v4  ;;  %v1287_v7 = vsel %vm1286_vm8, %v1267_v5, %v1269_v1  ;;  %v4857_v5 = vld [vmem:[%s5703_s4 + $0xc] ss:$16 sps:$4 sm:$0xff]  }
 0x13d   : > { %2102 = vrot.lane.b32.xlu1 %v4551_v34, %s5733_s16  ;;  %2787 = vmatpush1.bf16.msra.mxu0 %v1287_v7 }
 0x13e   : > { %v1409_v8 = vpop.permute.xlu0 %1408 }
 0x13f   : > { %v4764_v9 = vpop.permute.xlu1 %1410 }
 0x140   : > { %2172 = vrot.lane.b32.xlu0 %v4606_v47, %s5735_s12  ;;  %v1426_v10 = vsel %vm1422_vm10, %v1409_v8, %v4764_v9 }
 0x141   : > { %2100 = vrot.lane.b32.xlu1 %v4546_v33, %s5733_s16  ;;  %2876 = vmatprep.subr.bf16.mxu1 %v1426_v10  ;;  %s5739_s16 = smov 43  }
 0x142   : > { %v1337_v11 = vpop.permute.xlu0 %1336 }
 0x143   : > { %v1356_v12 = vsel %vm1354_vm9, %v1337_v11, %v1339_v3  ;;  %v1407_v13 = vpop.permute.xlu1 %1406  ;;  %v4849_v3 = vld [vmem:[%s5703_s4] ss:$16 sps:$4 sm:$0xff]  }
 0x144   : > { %2242 = vrot.lane.b32.xlu0 %v4674_v16, %s5737_s25  ;;  %2788 = vmatprep.subr.bf16.mxu0 %v1356_v12  ;;  %v1425_v14 = vsel %vm1422_vm10, %v1407_v13, %v1409_v8 }
 0x145   : > { %2244 = vrot.lane.b32.xlu1 %v4681_v18, %s5737_s25  ;;  %2877 = vmatpush1.bf16.msra.mxu1 %v1425_v14 }
 0x146   : > { %v1335_v17 = vpop.permute.xlu0 %1334 }
 0x147   : > { %v1355_v19 = vsel %vm1354_vm9, %v1335_v17, %v1337_v11  ;;  %v1477_v20 = vpop.permute.xlu1 %1476 }
 0x148   : > { %2170 = vrot.lane.b32.xlu0 %v4551_v34, %s5735_s12  ;;  %2789 = vmatpush1.bf16.msra.mxu0 %v1355_v19 }
 0x149   : > { %2240 = vrot.lane.b32.xlu1 %v4606_v47, %s5737_s25 }
 0x14a   : > { %v4779_v21 = vpop.permute.xlu0 %1478 }
 0x14b   : > { %v1494_v22 = vsel %vm1490_vm11, %v1477_v20, %v4779_v21  ;;  %v1405_v23 = vpop.permute.xlu1 %1404 }
 0x14c   : > { %2168 = vrot.lane.b32.xlu0 %v4546_v33, %s5735_s12  ;;  %2878 = vmatprep.subr.bf16.mxu1 %v1494_v22  ;;  %v1424_v24 = vsel %vm1422_vm10, %v1405_v23, %v1407_v13  ;;  %s5743_s12 = smov 42  }
 0x14d   : > { %2310 = vrot.lane.b32.xlu1 %v4674_v16, %s5739_s16  ;;  %2790 = vmatprep.subr.bf16.mxu0 %v1424_v24 }
 0x14e   : > { %v1475_v25 = vpop.permute.xlu0 %1474 }
 0x14f   : > { %v1493_v27 = vsel %vm1490_vm11, %v1475_v25, %v1477_v20  ;;  %v1403_v29 = vpop.permute.xlu1 %1402 }
 0x150   : > { %2312 = vrot.lane.b32.xlu0 %v4681_v18, %s5739_s16  ;;  %2879 = vmatpush1.bf16.msra.mxu1 %v1493_v27  ;;  %v1423_v31 = vsel %vm1422_vm10, %v1403_v29, %v1405_v23 }
 0x151   : > { %2238 = vrot.lane.b32.xlu1 %v4551_v34, %s5737_s25  ;;  %2791 = vmatpush1.bf16.msra.mxu0 %v1423_v31 }
 0x152   : > { %v1545_v32 = vpop.permute.xlu0 %1544 }
 0x153   : > { %v4798_v35 = vpop.permute.xlu1 %1546 }
 0x154   : > { %2308 = vrot.lane.b32.xlu0 %v4606_v47, %s5739_s16  ;;  %v1562_v36 = vsel %vm5747_vm12, %v1545_v32, %v4798_v35 }
 0x155   : > { %2236 = vrot.lane.b32.xlu1 %v4546_v33, %s5737_s25  ;;  %2880 = vmatprep.subr.bf16.mxu1 %v1562_v36  ;;  %s5766_s25 = smov 41  }
 0x156   : > { %v1473_v38 = vpop.permute.xlu0 %1472 }
 0x157   : > { %v1492_v39 = vsel %vm1490_vm11, %v1473_v38, %v1475_v25  ;;  %v1543_v42 = vpop.permute.xlu1 %1542 }
 0x158   : > { %2378 = vrot.lane.b32.xlu0 %v4674_v16, %s5743_s12  ;;  %2792 = vmatprep.subr.bf16.mxu0 %v1492_v39  ;;  %v1561_v43 = vsel %vm5747_vm12, %v1543_v42, %v1545_v32 }
 0x159   : > { %2380 = vrot.lane.b32.xlu1 %v4681_v18, %s5743_s12  ;;  %2881 = vmatpush1.bf16.msra.mxu1 %v1561_v43 }
 0x15a   : > { %v1471_v44 = vpop.permute.xlu0 %1470  ;;  %2882 = vmatprep.subr.bf16.mxu1 %v4551_v34 }
 0x15b   : > { %v1491_v45 = vsel %vm1490_vm11, %v1471_v44, %v1473_v38  ;;  %v1541_v46 = vpop.permute.xlu1 %1540 }
 0x15c   : > { %2306 = vrot.lane.b32.xlu0 %v4551_v34, %s5739_s16  ;;  %2793 = vmatpush1.bf16.msra.mxu0 %v1491_v45  ;;  %v1560_v48 = vsel %vm5747_vm12, %v1541_v46, %v1543_v42 }
 0x15d   : > { %2376 = vrot.lane.b32.xlu1 %v4606_v47, %s5743_s12  ;;  %2794 = vmatprep.subr.bf16.mxu0 %v1560_v48 }
 0x15e   : > { %v1539_v49 = vpop.permute.xlu0 %1538  ;;  %2883 = vmatpush1.bf16.msra.mxu1 %v4546_v33 }
 0x15f   : > { %v1559_v50 = vsel %vm5747_vm12, %v1539_v49, %v1541_v46  ;;  %v1631_v53 = vpop.permute.xlu1 %1630  ;;  %vm5750_vm12 = vcmask 392192  }
 0x160   : > { %2304 = vrot.lane.b32.xlu0 %v4546_v33, %s5739_s16  ;;  %2795 = vmatpush1.bf16.msra.mxu0 %v1559_v50  ;;  %s526_s16 = sand.u32 1, %s4190_s27  }
 0x161   : > { %2796 = vmatprep.subr.bf16.mxu0 %v4478_v30  ;;  %2446 = vrot.lane.b32.xlu1 %v4674_v16, %s5766_s25  ;;  %s3975_s6 = smul.u32 24, %s526_s16  ;;  %s5799_s16 = smov 18  }
 0x162   : > { %v4822_v54 = vpop.permute.xlu0 %1632 }
 0x163   : > { %v1648_v55 = vsel %vm5748_vm13, %v1631_v53, %v4822_v54  ;;  %v1629_v56 = vpop.permute.xlu1 %1628  ;;  %s4873_s27 = scalar_lea.vmem [#allocation6], %s3975_s6  ;;  %s5800_s6 = smov 17  }
 0x164   : > { %2448 = vrot.lane.b32.xlu0 %v4681_v18, %s5766_s25  ;;  %2884 = vmatprep.subr.bf16.mxu1 %v1648_v55  ;;  %v1647_v57 = vsel %vm5748_vm13, %v1629_v56, %v1631_v53 }
 0x165   : > { %2797 = vmatpush1.bf16.msra.mxu0 %v4471_v28  ;;  %2374 = vrot.lane.b32.xlu1 %v4551_v34, %s5743_s12 }
 0x166   : > { %v1699_v58 = vpop.permute.xlu0 %1698  ;;  %2885 = vmatpush1.bf16.msra.mxu1 %v1647_v57 }
 0x167   : > { %v4836_v30 = vpop.permute.xlu1 %1700 }
 0x168   : > { %2444 = vrot.lane.b32.xlu0 %v4606_v47, %s5766_s25  ;;  %v1716_v60 = vsel %vm5749_vm14, %v1699_v58, %v4836_v30 }
 0x169   : > { %2372 = vrot.lane.b32.xlu1 %v4546_v33, %s5743_s12  ;;  %2886 = vmatprep.subr.bf16.mxu1 %v1716_v60  ;;  %s5798_s12 = smov 19  }
 0x16a   : > { %v1627_v62 = vpop.permute.xlu0 %1626 }
 0x16b   : > { %v1646_v28 = vsel %vm5748_vm13, %v1627_v62, %v1629_v56  ;;  %v1697_v0 = vpop.permute.xlu1 %1696 }
 0x16c   : > { %736 = vrot.lane.b32.xlu0 %v4606_v47, %s5765_s17  ;;  %2798 = vmatprep.subr.bf16.mxu0 %v1646_v28  ;;  %v1715_v1 = vsel %vm5749_vm14, %v1697_v0, %v1699_v58 }
 0x16d   : > { %738 = vrot.lane.b32.xlu1 %v4674_v16, %s5765_s17  ;;  %2887 = vmatpush1.bf16.msra.mxu1 %v1715_v1 }
 0x16e   : > { %v1625_v2 = vpop.permute.xlu0 %1624 }
 0x16f   : > { %v1645_v4 = vsel %vm5748_vm13, %v1625_v2, %v1627_v62  ;;  %v1767_v7 = vpop.permute.xlu1 %1766  ;;  %vm5751_vm13 = vcmask 891904  }
 0x170   : > { %734 = vrot.lane.b32.xlu0 %v4551_v34, %s5765_s17  ;;  %2799 = vmatpush1.bf16.msra.mxu0 %v1645_v4 }
 0x171   : > { %2889 = vmatmul.mubr.bf16.vlgmr.msra.gmra.mrb[0].mxu1 %v4849_v3  ;;  %2442 = vrot.lane.b32.xlu1 %v4551_v34, %s5766_s25 }
 0x172   : > { %v4862_v8 = vpop.permute.xlu0 %1768  ;;  %3850 = vmatprep.mubr.msk.bf16.mxu1 %vm5750_vm12, %v4857_v5 }
 0x173   : > { %v1784_v10 = vsel %vm1780_vm15, %v1767_v7, %v4862_v8  ;;  %v1695_v11 = vpop.permute.xlu1 %1694 }
 0x174   : > { %2440 = vrot.lane.b32.xlu0 %v4546_v33, %s5766_s25  ;;  %2899 = vmatprep.subr.bf16.mxu1 %v1784_v10  ;;  %v1714_v12 = vsel %vm5749_vm14, %v1695_v11, %v1697_v0  ;;  %s5809_s25 = smov 61  }
 0x175   : > { %804 = vrot.lane.b32.xlu1 %v4606_v47, %s5764_s9  ;;  %2800 = vmatprep.subr.bf16.mxu0 %v1714_v12 }
 0x176   : > { %v1765_v13 = vpop.permute.xlu0 %1764 }
 0x177   : > { %v1783_v14 = vsel %vm1780_vm15, %v1765_v13, %v1767_v7  ;;  %v1693_v17 = vpop.permute.xlu1 %1692 }
 0x178   : > { %806 = vrot.lane.b32.xlu0 %v4674_v16, %s5764_s9  ;;  %2900 = vmatpush1.bf16.msra.mxu1 %v1783_v14  ;;  %v1713_v19 = vsel %vm5749_vm14, %v1693_v17, %v1695_v11  ;;  %vm5752_vm14 = vcmask 646144  }
 0x179   : > { %732 = vrot.lane.b32.xlu1 %v4546_v33, %s5765_s17  ;;  %2801 = vmatpush1.bf16.msra.mxu0 %v1713_v19  ;;  %s5808_s17 = smov 77  }
 0x17a   : > { %v1835_v20 = vpop.permute.xlu0 %1834 }
 0x17b   : > { %v4886_v22 = vpop.permute.xlu1 %1836 }
 0x17c   : > { %802 = vrot.lane.b32.xlu0 %v4551_v34, %s5764_s9  ;;  %v1852_v23 = vsel %vm5751_vm13, %v1835_v20, %v4886_v22  ;;  %2803 = vmatmul.mubr.bf16.vlgmr.msra.gmra.mrb[0].mxu0 %v4849_v3 }
 0x17d   : > { %872 = vrot.lane.b32.xlu1 %v4606_v47, %s5763_s20  ;;  %2901 = vmatprep.subr.bf16.mxu1 %v1852_v23 }
 0x17e   : > { %v1763_v24 = vpop.permute.xlu0 %1762  ;;  %3849 = vmatprep.mubr.msk.bf16.mxu0 %vm5750_vm12, %v4857_v5  ;;  %vm5753_vm12 = vcmask 637952  }
 0x17f   : > { %v1782_v25 = vsel %vm1780_vm15, %v1763_v24, %v1765_v13  ;;  %v1833_v27 = vpop.permute.xlu1 %1832 }
 0x180   : > { %874 = vrot.lane.b32.xlu0 %v4674_v16, %s5763_s20  ;;  %2813 = vmatprep.subr.bf16.mxu0 %v1782_v25  ;;  %v1851_v29 = vsel %vm5751_vm13, %v1833_v27, %v1835_v20 }
 0x181   : > { %800 = vrot.lane.b32.xlu1 %v4546_v33, %s5764_s9  ;;  %2902 = vmatpush1.bf16.msra.mxu1 %v1851_v29  ;;  %s5807_s9 = smov 78  }
 0x182   : > { %v1761_v31 = vpop.permute.xlu0 %1760 }
 0x183   : > { %v1781_v32 = vsel %vm1780_vm15, %v1761_v31, %v1763_v24  ;;  %v1903_v36 = vpop.permute.xlu1 %1902 }
 0x184   : > { %870 = vrot.lane.b32.xlu0 %v4551_v34, %s5763_s20  ;;  %2814 = vmatpush1.bf16.msra.mxu0 %v1781_v32 }
 0x185   : > { %940 = vrot.lane.b32.xlu1 %v4606_v47, %s5762_s11 }
 0x186   : > { %v4904_v38 = vpop.permute.xlu0 %1904 }
 0x187   : > { %v1920_v39 = vsel %vm5752_vm14, %v1903_v36, %v4904_v38  ;;  %v1831_v42 = vpop.permute.xlu1 %1830 }
 0x188   : > { %942 = vrot.lane.b32.xlu0 %v4674_v16, %s5762_s11  ;;  %2903 = vmatprep.subr.bf16.mxu1 %v1920_v39  ;;  %v1850_v43 = vsel %vm5751_vm13, %v1831_v42, %v1833_v27 }
 0x189   : > { %868 = vrot.lane.b32.xlu1 %v4546_v33, %s5763_s20  ;;  %2815 = vmatprep.subr.bf16.mxu0 %v1850_v43  ;;  %s5806_s20 = smov 79  }
 0x18a   : > { %v1901_v44 = vpop.permute.xlu0 %1900 }
 0x18b   : > { %v1919_v45 = vsel %vm5752_vm14, %v1901_v44, %v1903_v36  ;;  %v1829_v46 = vpop.permute.xlu1 %1828 }
 0x18c   : > { %938 = vrot.lane.b32.xlu0 %v4551_v34, %s5762_s11  ;;  %2904 = vmatpush1.bf16.msra.mxu1 %v1919_v45  ;;  %v1849_v48 = vsel %vm5751_vm13, %v1829_v46, %v1831_v42  ;;  %vm5754_vm13 = vcmask 629760  }
 0x18d   : > { %1008 = vrot.lane.b32.xlu1 %v4606_v47, %s5761_s26  ;;  %2816 = vmatpush1.bf16.msra.mxu0 %v1849_v48 }
 0x18e   : > { %v1971_v49 = vpop.permute.xlu0 %1970 }
 0x18f   : > { %v4923_v50 = vpop.permute.xlu1 %1972 }
 0x190   : > { %1010 = vrot.lane.b32.xlu0 %v4674_v16, %s5761_s26  ;;  %v1988_v53 = vsel %vm5753_vm12, %v1971_v49, %v4923_v50 }
 0x191   : > { %936 = vrot.lane.b32.xlu1 %v4546_v33, %s5762_s11  ;;  %2905 = vmatprep.subr.bf16.mxu1 %v1988_v53  ;;  %s5803_s11 = smov 111  }
 0x192   : > { %v1899_v55 = vpop.permute.xlu0 %1898 }
 0x193   : > { %v1918_v56 = vsel %vm5752_vm14, %v1899_v55, %v1901_v44  ;;  %v1969_v57 = vpop.permute.xlu1 %1968  ;;  %v4987_v44 = vld [vmem:[%s4468_s23 + $0x1c] ss:$36 sps:$4 sm:$0xff]  }
 0x194   : > { %1006 = vrot.lane.b32.xlu0 %v4551_v34, %s5761_s26  ;;  %2817 = vmatprep.subr.bf16.mxu0 %v1918_v56  ;;  %v1987_v58 = vsel %vm5753_vm12, %v1969_v57, %v1971_v49 }
 0x195   : > { %1076 = vrot.lane.b32.xlu1 %v4606_v47, %s5760_s21  ;;  %2906 = vmatpush1.bf16.msra.mxu1 %v1987_v58 }
 0x196   : > { %v1897_v60 = vpop.permute.xlu0 %1896 }
 0x197   : > { %v1917_v62 = vsel %vm5752_vm14, %v1897_v60, %v1899_v55  ;;  %v2039_v28 = vpop.permute.xlu1 %2038  ;;  %vm5755_vm14 = vcmask 498688  }
 0x198   : > { %1078 = vrot.lane.b32.xlu0 %v4674_v16, %s5760_s21  ;;  %2818 = vmatpush1.bf16.msra.mxu0 %v1917_v62 }
 0x199   : > { %1004 = vrot.lane.b32.xlu1 %v4546_v33, %s5761_s26  ;;  %s5804_s26 = smov 110  }
 0x19a   : > { %v4938_v0 = vpop.permute.xlu0 %2040 }
 0x19b   : > { %v2056_v1 = vsel %vm5754_vm13, %v2039_v28, %v4938_v0  ;;  %v1967_v2 = vpop.permute.xlu1 %1966 }
 0x19c   : > { %1074 = vrot.lane.b32.xlu0 %v4551_v34, %s5760_s21  ;;  %2907 = vmatprep.subr.bf16.mxu1 %v2056_v1  ;;  %v1986_v4 = vsel %vm5753_vm12, %v1967_v2, %v1969_v57 }
 0x19d   : > { %1144 = vrot.lane.b32.xlu1 %v4606_v47, %s5759_s22  ;;  %2819 = vmatprep.subr.bf16.mxu0 %v1986_v4 }
 0x19e   : > { %v2037_v7 = vpop.permute.xlu0 %2036 }
 0x19f   : > { %v2055_v10 = vsel %vm5754_vm13, %v2037_v7, %v2039_v28  ;;  %v1965_v11 = vpop.permute.xlu1 %1964 }
 0x1a0   : > { %1146 = vrot.lane.b32.xlu0 %v4674_v16, %s5759_s22  ;;  %2908 = vmatpush1.bf16.msra.mxu1 %v2055_v10  ;;  %v1985_v12 = vsel %vm5753_vm12, %v1965_v11, %v1967_v2  ;;  %vm5756_vm12 = vcmask 490496  }
 0x1a1   : > { %1072 = vrot.lane.b32.xlu1 %v4546_v33, %s5760_s21  ;;  %2820 = vmatpush1.bf16.msra.mxu0 %v1985_v12  ;;  %s5805_s21 = smov 109  }
 0x1a2   : > { %v2107_v13 = vpop.permute.xlu0 %2106 }
 0x1a3   : > { %v4957_v14 = vpop.permute.xlu1 %2108 }
 0x1a4   : > { %1142 = vrot.lane.b32.xlu0 %v4551_v34, %s5759_s22  ;;  %v2124_v17 = vsel %vm5755_vm14, %v2107_v13, %v4957_v14 }
 0x1a5   : > { %1212 = vrot.lane.b32.xlu1 %v4606_v47, %s5757_s5  ;;  %2909 = vmatprep.subr.bf16.mxu1 %v2124_v17 }
 0x1a6   : > { %v2035_v19 = vpop.permute.xlu0 %2034 }
 0x1a7   : > { %v2054_v20 = vsel %vm5754_vm13, %v2035_v19, %v2037_v7  ;;  %v2105_v23 = vpop.permute.xlu1 %2104 }
 0x1a8   : > { %1214 = vrot.lane.b32.xlu0 %v4674_v16, %s5757_s5  ;;  %2821 = vmatprep.subr.bf16.mxu0 %v2054_v20  ;;  %v2123_v24 = vsel %vm5755_vm14, %v2105_v23, %v2107_v13 }
 0x1a9   : > { %1140 = vrot.lane.b32.xlu1 %v4546_v33, %s5759_s22  ;;  %2910 = vmatpush1.bf16.msra.mxu1 %v2123_v24  ;;  %s5802_s22 = smov 127  }
 0x1aa   : > { %v2033_v25 = vpop.permute.xlu0 %2032 }
 0x1ab   : > { %v2053_v27 = vsel %vm5754_vm13, %v2033_v25, %v2035_v19  ;;  %v2175_v29 = vpop.permute.xlu1 %2174  ;;  %vm5758_vm13 = vcmask 482304  }
 0x1ac   : > { %1210 = vrot.lane.b32.xlu0 %v4551_v34, %s5757_s5  ;;  %2822 = vmatpush1.bf16.msra.mxu0 %v2053_v27 }
 0x1ad   : > { %1280 = vrot.lane.b32.xlu1 %v4606_v47, %s5797_s19 }
 0x1ae   : > { %v4972_v31 = vpop.permute.xlu0 %2176 }
 0x1af   : > { %v2192_v32 = vsel %vm5756_vm12, %v2175_v29, %v4972_v31  ;;  %v2103_v36 = vpop.permute.xlu1 %2102 }
 0x1b0   : > { %1282 = vrot.lane.b32.xlu0 %v4674_v16, %s5797_s19  ;;  %2911 = vmatprep.subr.bf16.mxu1 %v2192_v32  ;;  %v2122_v39 = vsel %vm5755_vm14, %v2103_v36, %v2105_v23 }
 0x1b1   : > { %1208 = vrot.lane.b32.xlu1 %v4546_v33, %s5757_s5  ;;  %2823 = vmatprep.subr.bf16.mxu0 %v2122_v39  ;;  %s5801_s5 = smov 1  }
 0x1b2   : > { %v2173_v42 = vpop.permute.xlu0 %2172 }
 0x1b3   : > { %v2191_v43 = vsel %vm5756_vm12, %v2173_v42, %v2175_v29  ;;  %v2101_v45 = vpop.permute.xlu1 %2100 }
 0x1b4   : > { %1278 = vrot.lane.b32.xlu0 %v4551_v34, %s5797_s19  ;;  %2912 = vmatpush1.bf16.msra.mxu1 %v2191_v43  ;;  %v2121_v46 = vsel %vm5755_vm14, %v2101_v45, %v2103_v36  ;;  %vm2324_vm14 = vcmask 351232   ;;  %v5048_v36 = vld [vmem:[%s4468_s23 + $0x20] ss:$36 sps:$4 sm:$0xff]  }
 0x1b5   : > { %1348 = vrot.lane.b32.xlu1 %v4681_v18, %s5798_s12  ;;  %2824 = vmatpush1.bf16.msra.mxu0 %v2121_v46 }
 0x1b6   : > { %v2243_v48 = vpop.permute.xlu0 %2242 }
 0x1b7   : > { %v4994_v49 = vpop.permute.xlu1 %2244 }
 0x1b8   : > { %1350 = vrot.lane.b32.xlu0 %v4987_v44, %s5798_s12  ;;  %v2260_v34 = vsel %vm5758_vm13, %v2243_v48, %v4994_v49 }
 0x1b9   : > { %1276 = vrot.lane.b32.xlu1 %v4546_v33, %s5797_s19  ;;  %2913 = vmatprep.subr.bf16.mxu1 %v2260_v34 }
 0x1ba   : > { %v2171_v53 = vpop.permute.xlu0 %2170 }
 0x1bb   : > { %v2190_v55 = vsel %vm5756_vm12, %v2171_v53, %v2173_v42  ;;  %v2241_v56 = vpop.permute.xlu1 %2240 }
 0x1bc   : > { %1346 = vrot.lane.b32.xlu0 %v4674_v16, %s5798_s12  ;;  %2825 = vmatprep.subr.bf16.mxu0 %v2190_v55  ;;  %v2259_v57 = vsel %vm5758_vm13, %v2241_v56, %v2243_v48 }
 0x1bd   : > { %1416 = vrot.lane.b32.xlu1 %v4681_v18, %s5799_s16  ;;  %2914 = vmatpush1.bf16.msra.mxu1 %v2259_v57 }
 0x1be   : > { %v2169_v58 = vpop.permute.xlu0 %2168 }
 0x1bf   : > { %v2189_v60 = vsel %vm5756_vm12, %v2169_v58, %v2171_v53  ;;  %v2311_v33 = vpop.permute.xlu1 %2310  ;;  %vm2392_vm12 = vcmask 343040  }
 0x1c0   : > { %1418 = vrot.lane.b32.xlu0 %v4987_v44, %s5799_s16  ;;  %2826 = vmatpush1.bf16.msra.mxu0 %v2189_v60 }
 0x1c1   : > { %1344 = vrot.lane.b32.xlu1 %v4606_v47, %s5798_s12 }
 0x1c2   : > { %v5009_v62 = vpop.permute.xlu0 %2312 }
 0x1c3   : > { %v2328_v28 = vsel %vm2324_vm14, %v2311_v33, %v5009_v62  ;;  %v2239_v1 = vpop.permute.xlu1 %2238 }
 0x1c4   : > { %1414 = vrot.lane.b32.xlu0 %v4674_v16, %s5799_s16  ;;  %2915 = vmatprep.subr.bf16.mxu1 %v2328_v28  ;;  %v2258_v2 = vsel %vm5758_vm13, %v2239_v1, %v2241_v56 }
 0x1c5   : > { %1484 = vrot.lane.b32.xlu1 %v4681_v18, %s5800_s6  ;;  %2827 = vmatprep.subr.bf16.mxu0 %v2258_v2 }
 0x1c6   : > { %v2309_v4 = vpop.permute.xlu0 %2308 }
 0x1c7   : > { %v2327_v7 = vsel %vm2324_vm14, %v2309_v4, %v2311_v33  ;;  %v2237_v10 = vpop.permute.xlu1 %2236 }
 0x1c8   : > { %1486 = vrot.lane.b32.xlu0 %v4987_v44, %s5800_s6  ;;  %2916 = vmatpush1.bf16.msra.mxu1 %v2327_v7  ;;  %v2257_v11 = vsel %vm5758_vm13, %v2237_v10, %v2239_v1  ;;  %vm2460_vm13 = vcmask 334848  }
 0x1c9   : > { %1412 = vrot.lane.b32.xlu1 %v4606_v47, %s5799_s16  ;;  %2828 = vmatpush1.bf16.msra.mxu0 %v2257_v11 }
 0x1ca   : > { %v2379_v12 = vpop.permute.xlu0 %2378 }
 0x1cb   : > { %v5028_v13 = vpop.permute.xlu1 %2380 }
 0x1cc   : > { %1482 = vrot.lane.b32.xlu0 %v4674_v16, %s5800_s6  ;;  %v2396_v17 = vsel %vm2392_vm12, %v2379_v12, %v5028_v13 }
 0x1cd   : > { %1552 = vrot.lane.b32.xlu1 %v4681_v18, %s5801_s5  ;;  %2917 = vmatprep.subr.bf16.mxu1 %v2396_v17 }
 0x1ce   : > { %v2307_v19 = vpop.permute.xlu0 %2306 }
 0x1cf   : > { %v2326_v20 = vsel %vm2324_vm14, %v2307_v19, %v2309_v4  ;;  %v2377_v23 = vpop.permute.xlu1 %2376 }
 0x1d0   : > { %1554 = vrot.lane.b32.xlu0 %v4987_v44, %s5801_s5  ;;  %2829 = vmatprep.subr.bf16.mxu0 %v2326_v20  ;;  %v2395_v24 = vsel %vm2392_vm12, %v2377_v23, %v2379_v12 }
 0x1d1   : > { %1480 = vrot.lane.b32.xlu1 %v4606_v47, %s5800_s6  ;;  %2918 = vmatpush1.bf16.msra.mxu1 %v2395_v24  ;;  %v5117_v24 = vld [vmem:[%s4873_s27 + $0x4] ss:$12 sps:$4 sm:$0xff]  }
 0x1d2   : > { %v2305_v25 = vpop.permute.xlu0 %2304 }
 0x1d3   : > { %v2325_v27 = vsel %vm2324_vm14, %v2305_v25, %v2307_v19  ;;  %v2447_v29 = vpop.permute.xlu1 %2446 }
 0x1d4   : > { %1550 = vrot.lane.b32.xlu0 %v4674_v16, %s5801_s5  ;;  %2830 = vmatpush1.bf16.msra.mxu0 %v2325_v27 }
 0x1d5   : > { %1548 = vrot.lane.b32.xlu1 %v4606_v47, %s5801_s5  ;;  %v5063_v47 = vld [vmem:[%s5703_s4 + $0x8] ss:$16 sps:$4 sm:$0xff]  }
 0x1d6   : > { %v5043_v32 = vpop.permute.xlu0 %2448 }
 0x1d7   : > { %v2464_v39 = vsel %vm2460_vm13, %v2447_v29, %v5043_v32  ;;  %v2375_v42 = vpop.permute.xlu1 %2374 }
 0x1d8   : > { %1638 = vrot.lane.b32.xlu0 %v4987_v44, %s5802_s22  ;;  %2919 = vmatprep.subr.bf16.mxu1 %v2464_v39  ;;  %v2394_v43 = vsel %vm2392_vm12, %v2375_v42, %v2377_v23  ;;  %v5110_v23 = vld [vmem:[%s4873_s27] ss:$12 sps:$4 sm:$0xff]  }
 0x1d9   : > { %1640 = vrot.lane.b32.xlu1 %v5048_v36, %s5802_s22  ;;  %2831 = vmatprep.subr.bf16.mxu0 %v2394_v43 }
 0x1da   : > { %v2445_v45 = vpop.permute.xlu0 %2444 }
 0x1db   : > { %v2463_v46 = vsel %vm2460_vm13, %v2445_v45, %v2447_v29  ;;  %v2373_v48 = vpop.permute.xlu1 %2372 }
 0x1dc   : > { %1636 = vrot.lane.b32.xlu0 %v4681_v18, %s5802_s22  ;;  %2920 = vmatpush1.bf16.msra.mxu1 %v2463_v46  ;;  %v2393_v34 = vsel %vm2392_vm12, %v2373_v48, %v2375_v42 }
 0x1dd   : > { %1706 = vrot.lane.b32.xlu1 %v4987_v44, %s5803_s11  ;;  %2832 = vmatpush1.bf16.msra.mxu0 %v2393_v34 }
 0x1de   : > { %v737_v53 = vpop.permute.xlu0 %736 }
 0x1df   : > { %2932 = vmatmul.mubr.bf16.vlgmr.msra.gmra.mrb[0].mxu1 %v5063_v47  ;;  %v5071_v55 = vpop.permute.xlu1 %738 }
 0x1e0   : > { %1708 = vrot.lane.b32.xlu0 %v5048_v36, %s5803_s11  ;;  %3060 = vmatprep.mubr.bf16.mxu1 %v4633_v59  ;;  %v750_v56 = vsel %vm742_vm0, %v737_v53, %v5071_v55 }
 0x1e1   : > { %1634 = vrot.lane.b32.xlu1 %v4674_v16, %s5802_s22  ;;  %3028 = vmatprep.subr.bf16.mxu1 %v750_v56 }
 0x1e2   : > { %v735_v57 = vpop.permute.xlu0 %734 }
 0x1e3   : > { %v749_v58 = vsel %vm742_vm0, %v735_v57, %v737_v53  ;;  %v2443_v60 = vpop.permute.xlu1 %2442 }
 0x1e4   : > { %1704 = vrot.lane.b32.xlu0 %v4681_v18, %s5803_s11  ;;  %3029 = vmatpush1.bf16.msra.mxu1 %v749_v58  ;;  %v2462_v33 = vsel %vm2460_vm13, %v2443_v60, %v2445_v45 }
 0x1e5   : > { %1774 = vrot.lane.b32.xlu1 %v4987_v44, %s5804_s26  ;;  %2833 = vmatprep.subr.bf16.mxu0 %v2462_v33 }
 0x1e6   : > { %v2441_v28 = vpop.permute.xlu0 %2440 }
 0x1e7   : > { %v2461_v1 = vsel %vm2460_vm13, %v2441_v28, %v2443_v60  ;;  %v805_v2 = vpop.permute.xlu1 %804 }
 0x1e8   : > { %1776 = vrot.lane.b32.xlu0 %v5048_v36, %s5804_s26  ;;  %2834 = vmatpush1.bf16.msra.mxu0 %v2461_v1 }
 0x1e9   : > { %1702 = vrot.lane.b32.xlu1 %v4674_v16, %s5803_s11 }
 0x1ea   : > { %v5087_v4 = vpop.permute.xlu0 %806 }
 0x1eb   : > { %v818_v7 = vsel %vm810_vm1, %v805_v2, %v5087_v4  ;;  %2846 = vmatmul.mubr.bf16.vlgmr.msra.gmra.mrb[0].mxu0 %v5063_v47  ;;  %v733_v10 = vpop.permute.xlu1 %732 }
 0x1ec   : > { %1772 = vrot.lane.b32.xlu0 %v4681_v18, %s5804_s26  ;;  %3030 = vmatprep.subr.bf16.mxu1 %v818_v7  ;;  %v748_v11 = vsel %vm742_vm0, %v733_v10, %v735_v57  ;;  %v747_v12 = vsel %vm742_vm0, %v4584_v37, %v733_v10 }
 0x1ed   : > { %2974 = vmatprep.mubr.bf16.mxu0 %v4633_v59  ;;  %1842 = vrot.lane.b32.xlu1 %v4987_v44, %s5805_s21 }
 0x1ee   : > { %v803_v17 = vpop.permute.xlu0 %802  ;;  %2942 = vmatprep.subr.bf16.mxu0 %v748_v11 }
 0x1ef   : > { %v817_v19 = vsel %vm810_vm1, %v803_v17, %v805_v2  ;;  %2943 = vmatpush1.bf16.msra.mxu0 %v747_v12  ;;  %v873_v20 = vpop.permute.xlu1 %872 }
 0x1f0   : > { %1844 = vrot.lane.b32.xlu0 %v5048_v36, %s5805_s21  ;;  %3031 = vmatpush1.bf16.msra.mxu1 %v817_v19 }
 0x1f1   : > { %1770 = vrot.lane.b32.xlu1 %v4674_v16, %s5804_s26 }
 0x1f2   : > { %v5105_v59 = vpop.permute.xlu0 %874 }
 0x1f3   : > { %v886_v37 = vsel %vm878_vm2, %v873_v20, %v5105_v59  ;;  %v801_v25 = vpop.permute.xlu1 %800 }
 0x1f4   : > { %1840 = vrot.lane.b32.xlu0 %v4681_v18, %s5805_s21  ;;  %3032 = vmatprep.subr.bf16.mxu1 %v886_v37  ;;  %v816_v27 = vsel %vm810_vm1, %v801_v25, %v803_v17  ;;  %v815_v29 = vsel %vm810_vm1, %v4593_v41, %v801_v25 }
 0x1f5   : > { %1910 = vrot.lane.b32.xlu1 %v5110_v23, %s5806_s20  ;;  %2944 = vmatprep.subr.bf16.mxu0 %v816_v27 }
 0x1f6   : > { %v871_v39 = vpop.permute.xlu0 %870  ;;  %2945 = vmatpush1.bf16.msra.mxu0 %v815_v29 }
 0x1f7   : > { %v885_v42 = vsel %vm878_vm2, %v871_v39, %v873_v20  ;;  %v941_v18 = vpop.permute.xlu1 %940 }
 0x1f8   : > { %1912 = vrot.lane.b32.xlu0 %v5117_v24, %s5806_s20  ;;  %3033 = vmatpush1.bf16.msra.mxu1 %v885_v42 }
 0x1f9   : > { %1838 = vrot.lane.b32.xlu1 %v4674_v16, %s5805_s21 }
 0x1fa   : > { %v5127_v43 = vpop.permute.xlu0 %942 }
 0x1fb   : > { %v954_v41 = vsel %vm5773_vm3, %v941_v18, %v5127_v43  ;;  %v869_v45 = vpop.permute.xlu1 %868 }
 0x1fc   : > { %1908 = vrot.lane.b32.xlu0 %v5048_v36, %s5806_s20  ;;  %3034 = vmatprep.subr.bf16.mxu1 %v954_v41  ;;  %v884_v46 = vsel %vm878_vm2, %v869_v45, %v871_v39  ;;  %v883_v48 = vsel %vm878_vm2, %v4615_v51, %v869_v45 }
 0x1fd   : > { %1978 = vrot.lane.b32.xlu1 %v5110_v23, %s5807_s9  ;;  %2946 = vmatprep.subr.bf16.mxu0 %v884_v46 }
 0x1fe   : > { %v939_v34 = vpop.permute.xlu0 %938  ;;  %2947 = vmatpush1.bf16.msra.mxu0 %v883_v48 }
 0x1ff   : > { %v953_v16 = vsel %vm5773_vm3, %v939_v34, %v941_v18  ;;  %v1009_v53 = vpop.permute.xlu1 %1008 }
 0x200   : > { %1980 = vrot.lane.b32.xlu0 %v5117_v24, %s5807_s9  ;;  %3035 = vmatpush1.bf16.msra.mxu1 %v953_v16 }
 0x201   : > { %1906 = vrot.lane.b32.xlu1 %v4987_v44, %s5806_s20 }
 0x202   : > { %v5143_v56 = vpop.permute.xlu0 %1010 }
 0x203   : > { %v1022_v51 = vsel %vm5772_vm4, %v1009_v53, %v5143_v56  ;;  %v937_v57 = vpop.permute.xlu1 %936 }
 0x204   : > { %1976 = vrot.lane.b32.xlu0 %v5048_v36, %s5807_s9  ;;  %3036 = vmatprep.subr.bf16.mxu1 %v1022_v51  ;;  %v952_v58 = vsel %vm5773_vm3, %v937_v57, %v939_v34  ;;  %v951_v60 = vsel %vm5773_vm3, %v4635_v61, %v937_v57  ;;  %vm5844_vm3 = vcmask 629760  }
 0x205   : > { %2046 = vrot.lane.b32.xlu1 %v5110_v23, %s5808_s17  ;;  %2948 = vmatprep.subr.bf16.mxu0 %v952_v58 }
 0x206   : > { %v1007_v33 = vpop.permute.xlu0 %1006  ;;  %2949 = vmatpush1.bf16.msra.mxu0 %v951_v60 }
 0x207   : > { %v1021_v28 = vsel %vm5772_vm4, %v1007_v33, %v1009_v53  ;;  %v1077_v1 = vpop.permute.xlu1 %1076 }
 0x208   : > { %2048 = vrot.lane.b32.xlu0 %v5117_v24, %s5808_s17  ;;  %3037 = vmatpush1.bf16.msra.mxu1 %v1021_v28 }
 0x209   : > { %1974 = vrot.lane.b32.xlu1 %v4987_v44, %s5807_s9 }
 0x20a   : > { %v5159_v2 = vpop.permute.xlu0 %1078 }
 0x20b   : > { %v1090_v61 = vsel %vm5771_vm5, %v1077_v1, %v5159_v2  ;;  %v1005_v7 = vpop.permute.xlu1 %1004 }
 0x20c   : > { %2044 = vrot.lane.b32.xlu0 %v5048_v36, %s5808_s17  ;;  %3038 = vmatprep.subr.bf16.mxu1 %v1090_v61  ;;  %v1020_v10 = vsel %vm5772_vm4, %v1005_v7, %v1007_v33  ;;  %v1019_v11 = vsel %vm5772_vm4, %v4656_v6, %v1005_v7 }
 0x20d   : > { %2114 = vrot.lane.b32.xlu1 %v5110_v23, %s5809_s25  ;;  %2950 = vmatprep.subr.bf16.mxu0 %v1020_v10 }
 0x20e   : > { %v1075_v12 = vpop.permute.xlu0 %1074  ;;  %2951 = vmatpush1.bf16.msra.mxu0 %v1019_v11 }
 0x20f   : > { %v1089_v17 = vsel %vm5771_vm5, %v1075_v12, %v1077_v1  ;;  %v1145_v19 = vpop.permute.xlu1 %1144 }
 0x210   : > { %2116 = vrot.lane.b32.xlu0 %v5117_v24, %s5809_s25  ;;  %3039 = vmatpush1.bf16.msra.mxu1 %v1089_v17 }
 0x211   : > { %2042 = vrot.lane.b32.xlu1 %v4987_v44, %s5808_s17 }
 0x212   : > { %v5175_v20 = vpop.permute.xlu0 %1146 }
 0x213   : > { %v1158_v6 = vsel %vm5770_vm6, %v1145_v19, %v5175_v20  ;;  %v1073_v37 = vpop.permute.xlu1 %1072 }
 0x214   : > { %2112 = vrot.lane.b32.xlu0 %v5048_v36, %s5809_s25  ;;  %3040 = vmatprep.subr.bf16.mxu1 %v1158_v6  ;;  %v1088_v25 = vsel %vm5771_vm5, %v1073_v37, %v1075_v12  ;;  %v1087_v27 = vsel %vm5771_vm5, %v4671_v15, %v1073_v37 }
 0x215   : > { %2182 = vrot.lane.b32.xlu1 %v5110_v23, %s5810_s0  ;;  %2952 = vmatprep.subr.bf16.mxu0 %v1088_v25 }
 0x216   : > { %v1143_v29 = vpop.permute.xlu0 %1142  ;;  %2953 = vmatpush1.bf16.msra.mxu0 %v1087_v27 }
 0x217   : > { %v1157_v39 = vsel %vm5770_vm6, %v1143_v29, %v1145_v19  ;;  %v1213_v42 = vpop.permute.xlu1 %1212 }
 0x218   : > { %2184 = vrot.lane.b32.xlu0 %v5117_v24, %s5810_s0  ;;  %3041 = vmatpush1.bf16.msra.mxu1 %v1157_v39 }
 0x219   : > { %2110 = vrot.lane.b32.xlu1 %v4987_v44, %s5809_s25 }
 0x21a   : > { %v5191_v18 = vpop.permute.xlu0 %1214 }
 0x21b   : > { %v1226_v15 = vsel %vm5769_vm7, %v1213_v42, %v5191_v18  ;;  %v1141_v41 = vpop.permute.xlu1 %1140 }
 0x21c   : > { %2180 = vrot.lane.b32.xlu0 %v5048_v36, %s5810_s0  ;;  %3042 = vmatprep.subr.bf16.mxu1 %v1226_v15  ;;  %v1156_v45 = vsel %vm5770_vm6, %v1141_v41, %v1143_v29  ;;  %v1155_v46 = vsel %vm5770_vm6, %v4696_v26, %v1141_v41  ;;  %v4258_v29 = vmov 0  }
 0x21d   : > { %2250 = vrot.lane.b32.xlu1 %v5110_v23, %s5811_s1  ;;  %2954 = vmatprep.subr.bf16.mxu0 %v1156_v45 }
 0x21e   : > { %v1211_v48 = vpop.permute.xlu0 %1210  ;;  %2955 = vmatpush1.bf16.msra.mxu0 %v1155_v46  ;;  %4094 = vset.pattern.permute.xlu0 %v4258_v29 }
 0x21f   : > { %v1225_v34 = vsel %vm5769_vm7, %v1211_v48, %v1213_v42  ;;  %v1281_v16 = vpop.permute.xlu1 %1280  ;;  %4095 = vset.pattern.permute.xlu1 %v4258_v29 }
 0x220   : > { %2252 = vrot.lane.b32.xlu0 %v5117_v24, %s5811_s1  ;;  %3043 = vmatpush1.bf16.msra.mxu1 %v1225_v34 }
 0x221   : > { %2178 = vrot.lane.b32.xlu1 %v4987_v44, %s5810_s0 }
 0x222   : > { %v5207_v53 = vpop.permute.xlu0 %1282 }
 0x223   : > { %v1294_v26 = vsel %vm1286_vm8, %v1281_v16, %v5207_v53  ;;  %v1209_v51 = vpop.permute.xlu1 %1208 }
 0x224   : > { %2248 = vrot.lane.b32.xlu0 %v5048_v36, %s5811_s1  ;;  %3044 = vmatprep.subr.bf16.mxu1 %v1294_v26  ;;  %v1224_v57 = vsel %vm5769_vm7, %v1209_v51, %v1211_v48  ;;  %v1223_v58 = vsel %vm5769_vm7, %v4711_v40, %v1209_v51  ;;  %v5276_v26 = vld [vmem:[%s4468_s23 + $0x18] ss:$36 sps:$4 sm:$0xff]   ;;  %vm5815_vm7 = vcmask 7168  }
 0x225   : > { %2318 = vrot.lane.b32.xlu1 %v5110_v23, %s5812_s2  ;;  %2956 = vmatprep.subr.bf16.mxu0 %v1224_v57  ;;  %vm5817_vm6 = vmmov %vm5815_vm7 }
 0x226   : > { %v1279_v60 = vpop.permute.xlu0 %1278  ;;  %2957 = vmatpush1.bf16.msra.mxu0 %v1223_v58  ;;  %vm5819_vm5 = vmmov %vm5817_vm6 }
 0x227   : > { %v1293_v33 = vsel %vm1286_vm8, %v1279_v60, %v1281_v16  ;;  %v1349_v28 = vpop.permute.xlu1 %1348 }
 0x228   : > { %2320 = vrot.lane.b32.xlu0 %v5117_v24, %s5812_s2  ;;  %3045 = vmatpush1.bf16.msra.mxu1 %v1293_v33 }
 0x229   : > { %2246 = vrot.lane.b32.xlu1 %v4987_v44, %s5811_s1 }
 0x22a   : > { %v5223_v1 = vpop.permute.xlu0 %1350 }
 0x22b   : > { %v1362_v40 = vsel %vm1354_vm9, %v1349_v28, %v5223_v1  ;;  %v1277_v61 = vpop.permute.xlu1 %1276 }
 0x22c   : > { %2316 = vrot.lane.b32.xlu0 %v5048_v36, %s5812_s2  ;;  %3046 = vmatprep.subr.bf16.mxu1 %v1362_v40  ;;  %v1291_v7 = vsel %vm1286_vm8, %v4730_v52, %v1277_v61  ;;  %v1292_v10 = vsel %vm1286_vm8, %v1277_v61, %v1279_v60 }
 0x22d   : > { %2386 = vrot.lane.b32.xlu1 %v5110_v23, %s5813_s3  ;;  %2958 = vmatprep.subr.bf16.mxu0 %v1292_v10 }
 0x22e   : > { %v1347_v11 = vpop.permute.xlu0 %1346  ;;  %2959 = vmatpush1.bf16.msra.mxu0 %v1291_v7 }
 0x22f   : > { %v1361_v12 = vsel %vm1354_vm9, %v1347_v11, %v1349_v28  ;;  %v1417_v17 = vpop.permute.xlu1 %1416  ;;  %v5291_v28 = vld [vmem:[%s4873_s27 + $0x8] ss:$12 sps:$4 sm:$0xff]   ;;  %s5820_s27 = smov 86  }
 0x230   : > { %2388 = vrot.lane.b32.xlu0 %v5117_v24, %s5813_s3  ;;  %3047 = vmatpush1.bf16.msra.mxu1 %v1361_v12 }
 0x231   : > { %2314 = vrot.lane.b32.xlu1 %v4987_v44, %s5812_s2 }
 0x232   : > { %v5239_v19 = vpop.permute.xlu0 %1418 }
 0x233   : > { %v1430_v52 = vsel %vm1422_vm10, %v1417_v17, %v5239_v19  ;;  %v1345_v6 = vpop.permute.xlu1 %1344 }
 0x234   : > { %2384 = vrot.lane.b32.xlu0 %v5048_v36, %s5813_s3  ;;  %3048 = vmatprep.subr.bf16.mxu1 %v1430_v52  ;;  %v1359_v37 = vsel %vm1354_vm9, %v4745_v63, %v1345_v6  ;;  %v1360_v25 = vsel %vm1354_vm9, %v1345_v6, %v1347_v11  ;;  %v4138_v11 = vld [vmem:[%s4468_s23 + $0x14] ss:$36 sps:$4 sm:$0xff]  }
 0x235   : > { %2454 = vrot.lane.b32.xlu1 %v5110_v23, %s5814_s14  ;;  %2960 = vmatprep.subr.bf16.mxu0 %v1360_v25 }
 0x236   : > { %v1415_v27 = vpop.permute.xlu0 %1414  ;;  %2961 = vmatpush1.bf16.msra.mxu0 %v1359_v37 }
 0x237   : > { %v1429_v39 = vsel %vm1422_vm10, %v1415_v27, %v1417_v17  ;;  %v1485_v42 = vpop.permute.xlu1 %1484  ;;  %v4139_v17 = vld [vmem:[%s4468_s23 + $0x10] ss:$36 sps:$4 sm:$0xff]   ;;  %s5827_s23 = smov 69  }
 0x238   : > { %2456 = vrot.lane.b32.xlu0 %v5117_v24, %s5814_s14  ;;  %3049 = vmatpush1.bf16.msra.mxu1 %v1429_v39 }
 0x239   : > { %2382 = vrot.lane.b32.xlu1 %v4987_v44, %s5813_s3 }
 0x23a   : > { %v5257_v63 = vpop.permute.xlu0 %1486 }
 0x23b   : > { %v1498_v15 = vsel %vm1490_vm11, %v1485_v42, %v5257_v63  ;;  %v1413_v41 = vpop.permute.xlu1 %1412 }
 0x23c   : > { %2452 = vrot.lane.b32.xlu0 %v5048_v36, %s5814_s14  ;;  %3050 = vmatprep.subr.bf16.mxu1 %v1498_v15  ;;  %v1427_v45 = vsel %vm1422_vm10, %v4764_v9, %v1413_v41  ;;  %v1428_v24 = vsel %vm1422_vm10, %v1413_v41, %v1415_v27 }
 0x23d   : > { %1778 = vrot.lane.b32.xlu1 %v5110_v23, %s5804_s26  ;;  %2962 = vmatprep.subr.bf16.mxu0 %v1428_v24  ;;  %s5816_s26 = smov 87  }
 0x23e   : > { %v1483_v46 = vpop.permute.xlu0 %1482  ;;  %2963 = vmatpush1.bf16.msra.mxu0 %v1427_v45 }
 0x23f   : > { %v1497_v48 = vsel %vm1490_vm11, %v1483_v46, %v1485_v42  ;;  %v1553_v34 = vpop.permute.xlu1 %1552 }
 0x240   : > { %2450 = vrot.lane.b32.xlu0 %v4987_v44, %s5814_s14  ;;  %3051 = vmatpush1.bf16.msra.mxu1 %v1497_v48 }
 0x241   : > { %1284 = vrot.lane.b32.xlu1 %v5276_v26, %s5797_s19 }
 0x242   : > { %v5273_v16 = vpop.permute.xlu0 %1554 }
 0x243   : > { %v1566_v9 = vsel %vm5815_vm7, %v1553_v34, %v5273_v16  ;;  %v1481_v51 = vpop.permute.xlu1 %1480  ;;  %vm5818_vm7 = vmmov %vm5817_vm6 }
 0x244   : > { %1846 = vrot.lane.b32.xlu0 %v5110_v23, %s5805_s21  ;;  %3052 = vmatprep.subr.bf16.mxu1 %v1566_v9  ;;  %v1495_v57 = vsel %vm1490_vm11, %v4779_v21, %v1481_v51  ;;  %v1496_v58 = vsel %vm1490_vm11, %v1481_v51, %v1483_v46 }
 0x245   : > { %740 = vrot.lane.b32.xlu1 %v5276_v26, %s5816_s26  ;;  %2964 = vmatprep.subr.bf16.mxu0 %v1496_v58 }
 0x246   : > { %v1551_v60 = vpop.permute.xlu0 %1550  ;;  %2965 = vmatpush1.bf16.msra.mxu0 %v1495_v57 }
 0x247   : > { %v1565_v33 = vsel %vm5817_vm6, %v1551_v60, %v1553_v34  ;;  %v1549_v40 = vpop.permute.xlu1 %1548 }
 0x248   : > { %1352 = vrot.lane.b32.xlu0 %v5048_v36, %s5798_s12  ;;  %3053 = vmatpush1.bf16.msra.mxu1 %v1565_v33  ;;  %v1563_v21 = vsel %vm5818_vm7, %v4798_v35, %v1549_v40  ;;  %v1564_v61 = vsel %vm5819_vm5, %v1549_v40, %v1551_v60  ;;  %vm5821_vm5 = vcmask 1039360   ;;  %vm5824_vm7 = vcmask 908288   ;;  %s5849_s12 = sld [smem:[#allocation21_spill]] }
 0x249   : > { %3054 = vmatprep.subr.bf16.mxu1 %v4987_v44  ;;  %1914 = vrot.lane.b32.xlu1 %v5291_v28, %s5806_s20  ;;  %vm5822_vm6 = vmmov %vm5821_vm5  ;;  %s5823_s20 = smov 85  }
 0x24a   : > { %v1639_v7 = vpop.permute.xlu0 %1638  ;;  %2966 = vmatprep.subr.bf16.mxu0 %v1564_v61  ;;  %vm5826_vm4 = vmmov %vm5824_vm7 }
 0x24b   : > { %2967 = vmatpush1.bf16.msra.mxu0 %v1563_v21  ;;  %v5303_v10 = vpop.permute.xlu1 %1640 }
 0x24c   : > { %808 = vrot.lane.b32.xlu0 %v5276_v26, %s5820_s27  ;;  %3055 = vmatpush1.bf16.msra.mxu1 %v5276_v26  ;;  %v1652_v35 = vsel %vm5821_vm5, %v1639_v7, %v5303_v10  ;;  %s5881_s27 = sld [smem:[#allocation22_spill]] (%p4419_p13) }
 0x24d   : > { %2968 = vmatprep.subr.bf16.mxu0 %v4138_v11  ;;  %1420 = vrot.lane.b32.xlu1 %v5048_v36, %s5799_s16 }
 0x24e   : > { %v1637_v12 = vpop.permute.xlu0 %1636  ;;  %3056 = vmatprep.subr.bf16.mxu1 %v1652_v35  ;;  %s5850_s16 = smov %s5849_s12 }
 0x24f   : > { %v1651_v44 = vsel %vm5822_vm6, %v1637_v12, %v1639_v7  ;;  %2969 = vmatpush1.bf16.msra.mxu0 %v4139_v17  ;;  %v1707_v52 = vpop.permute.xlu1 %1706  ;;  %vm5825_vm6 = vmmov %vm5821_vm5 }
 0x250   : > { %1982 = vrot.lane.b32.xlu0 %v5291_v28, %s5807_s9  ;;  %3057 = vmatpush1.bf16.msra.mxu1 %v1651_v44  ;;  %s5831_s9 = smov 67  }
 0x251   : > { %876 = vrot.lane.b32.xlu1 %v5276_v26, %s5823_s20 }
 0x252   : > { %v5315_v6 = vpop.permute.xlu0 %1708 }
 0x253   : > { %v1720_v37 = vsel %vm5824_vm7, %v1707_v52, %v5315_v6  ;;  %v1635_v25 = vpop.permute.xlu1 %1634  ;;  %vm5828_vm7 = vmmov %vm5826_vm4 }
 0x254   : > { %1488 = vrot.lane.b32.xlu0 %v5048_v36, %s5800_s6  ;;  %3058 = vmatprep.subr.bf16.mxu1 %v1720_v37  ;;  %v1649_v27 = vsel %vm5821_vm5, %v4822_v54, %v1635_v25  ;;  %v1650_v39 = vsel %vm5825_vm6, %v1635_v25, %v1637_v12  ;;  %vm5829_vm5 = vcmask 392192   ;;  %vm5832_vm6 = vcmask 891904  }
 0x255   : > { %2050 = vrot.lane.b32.xlu1 %v5291_v28, %s5808_s17  ;;  %2970 = vmatprep.subr.bf16.mxu0 %v1650_v39  ;;  %s5830_s17 = smov 68  }
 0x256   : > { %v1705_v42 = vpop.permute.xlu0 %1704  ;;  %2971 = vmatpush1.bf16.msra.mxu0 %v1649_v27 }
 0x257   : > { %v1719_v15 = vsel %vm5826_vm4, %v1705_v42, %v1707_v52  ;;  %v1775_v41 = vpop.permute.xlu1 %1774 }
 0x258   : > { %944 = vrot.lane.b32.xlu0 %v5276_v26, %s5827_s23  ;;  %3059 = vmatpush1.bf16.msra.mxu1 %v1719_v15 }
 0x259   : > { %1556 = vrot.lane.b32.xlu1 %v5048_v36, %s5801_s5  ;;  %s5879_s5 = sld [smem:[#allocation9_spill]] (%p4419_p13) }
 0x25a   : > { %v5331_v45 = vpop.permute.xlu0 %1776 }
 0x25b   : > { %v1788_v54 = vsel %vm1780_vm15, %v1775_v41, %v5331_v45  ;;  %v1703_v24 = vpop.permute.xlu1 %1702  ;;  %3061 = vmatmul.mubr.bf16.vlgmr.msra.gmra.mrb[4].mxu1 %v4849_v3 }
 0x25c   : > { %2118 = vrot.lane.b32.xlu0 %v5291_v28, %s5809_s25  ;;  %3071 = vmatprep.subr.bf16.mxu1 %v1788_v54  ;;  %v1717_v46 = vsel %vm5826_vm4, %v4836_v30, %v1703_v24  ;;  %v1718_v48 = vsel %vm5828_vm7, %v1703_v24, %v1705_v42  ;;  %vm5833_vm4 = vmmov %vm5829_vm5  ;;  %s5880_s25 = sld [smem:[#allocation10_spill]] (%p4419_p13) }
 0x25d   : > { %3852 = vmatprep.mubr.msk.bf16.mxu1 %vm5829_vm5, %v4857_v5  ;;  %1012 = vrot.lane.b32.xlu1 %v5276_v26, %s5830_s17  ;;  %vm5834_vm7 = vmmov %vm5832_vm6  ;;  %vm5836_vm5 = vcmask 646144  }
 0x25e   : > { %v1773_v34 = vpop.permute.xlu0 %1772  ;;  %2972 = vmatprep.subr.bf16.mxu0 %v1718_v48 }
 0x25f   : > { %v1787_v9 = vsel %vm1780_vm15, %v1773_v34, %v1775_v41  ;;  %2973 = vmatpush1.bf16.msra.mxu0 %v1717_v46  ;;  %v1843_v51 = vpop.permute.xlu1 %1842  ;;  %s3690_s19 = smul.u32 (%p4419_p13), 9, %s5879_s5 }
 0x260   : > { %2186 = vrot.lane.b32.xlu0 %v5291_v28, %s5810_s0  ;;  %3072 = vmatpush1.bf16.msra.mxu1 %v1787_v9  ;;  %s5368_s0 = scalar_lea.vmem [#allocation7], %s4464_s8  ;;  %v3494_v9 = vld [vmem:[%s5850_s16] sm:$0xff] }
 0x261   : > { %1080 = vrot.lane.b32.xlu1 %v5276_v26, %s5831_s9 }
 0x262   : > { %v5350_v30 = vpop.permute.xlu0 %1844  ;;  %2975 = vmatmul.mubr.bf16.vlgmr.msra.gmra.mrb[4].mxu0 %v4849_v3 }
 0x263   : > { %v1856_v57 = vsel %vm5832_vm6, %v1843_v51, %v5350_v30  ;;  %v1771_v58 = vpop.permute.xlu1 %1770  ;;  %3851 = vmatprep.mubr.msk.bf16.mxu0 %vm5833_vm4, %v4857_v5  ;;  %vm5837_vm4 = vmmov %vm5832_vm6 }
 0x264   : > { %1642 = vrot.lane.b32.xlu0 %v5110_v23, %s5802_s22  ;;  %3073 = vmatprep.subr.bf16.mxu1 %v1856_v57  ;;  %v1785_v60 = vsel %vm1780_vm15, %v4862_v8, %v1771_v58  ;;  %v1786_v33 = vsel %vm1780_vm15, %v1771_v58, %v1773_v34  ;;  %s5835_s22 = smov 51  }
 0x265   : > { %2254 = vrot.lane.b32.xlu1 %v5291_v28, %s5811_s1  ;;  %2985 = vmatprep.subr.bf16.mxu0 %v1786_v33  ;;  %s5838_s1 = smov 50  }
 0x266   : > { %v1841_v40 = vpop.permute.xlu0 %1840  ;;  %2986 = vmatpush1.bf16.msra.mxu0 %v1785_v60 }
 0x267   : > { %v1855_v3 = vsel %vm5834_vm7, %v1841_v40, %v1843_v51  ;;  %v1911_v21 = vpop.permute.xlu1 %1910  ;;  %vm5839_vm7 = vmmov %vm5836_vm5 }
 0x268   : > { %1148 = vrot.lane.b32.xlu0 %v5276_v26, %s5835_s22  ;;  %3074 = vmatpush1.bf16.msra.mxu1 %v1855_v3 }
 0x269   : > { %1710 = vrot.lane.b32.xlu1 %v5110_v23, %s5803_s11 }
 0x26a   : > { %v5372_v5 = vpop.permute.xlu0 %1912 }
 0x26b   : > { %v1924_v8 = vsel %vm5836_vm5, %v1911_v21, %v5372_v5  ;;  %v1839_v61 = vpop.permute.xlu1 %1838  ;;  %vm5840_vm5 = vcmask 637952  }
 0x26c   : > { %2322 = vrot.lane.b32.xlu0 %v5291_v28, %s5812_s2  ;;  %3075 = vmatprep.subr.bf16.mxu1 %v1924_v8  ;;  %v1853_v7 = vsel %vm5832_vm6, %v4886_v22, %v1839_v61  ;;  %v1854_v11 = vsel %vm5837_vm4, %v1839_v61, %v1841_v40  ;;  %vm5841_vm6 = vmmov %vm5839_vm7  ;;  %s5877_s2 = sld [smem:[#allocation20_spill]] }
 0x26d   : > { %1216 = vrot.lane.b32.xlu1 %v5276_v26, %s5838_s1  ;;  %2987 = vmatprep.subr.bf16.mxu0 %v1854_v11  ;;  %vm5842_vm4 = vmmov %vm5841_vm6 }
 0x26e   : > { %v1909_v35 = vpop.permute.xlu0 %1908  ;;  %2988 = vmatpush1.bf16.msra.mxu0 %v1853_v7 }
 0x26f   : > { %v1923_v23 = vsel %vm5839_vm7, %v1909_v35, %v1911_v21  ;;  %v1979_v12 = vpop.permute.xlu1 %1978  ;;  %vm5843_vm7 = vmmov %vm5840_vm5 }
 0x270   : > { %2390 = vrot.lane.b32.xlu0 %v5291_v28, %s5813_s3  ;;  %3076 = vmatpush1.bf16.msra.mxu1 %v1923_v23 }
 0x271   : > { %2458 = vrot.lane.b32.xlu1 %v5291_v28, %s5814_s14  ;;  %s5846_s14 = sld [smem:[#allocation19_spill]] }
 0x272   : > { %v5388_v44 = vpop.permute.xlu0 %1980 }
 0x273   : > { %v1992_v22 = vsel %vm5840_vm5, %v1979_v12, %v5388_v44  ;;  %v1907_v17 = vpop.permute.xlu1 %1906 }
 0x274   : > { %3077 = vmatprep.subr.bf16.mxu1 %v1992_v22  ;;  %v1921_v26 = vsel %vm5841_vm6, %v4904_v38, %v1907_v17  ;;  %v1922_v52 = vsel %vm5842_vm4, %v1907_v17, %v1909_v35  ;;  %vm5845_vm6 = vmmov %vm5840_vm5 }
 0x275   : > { %2989 = vmatprep.subr.bf16.mxu0 %v1922_v52  ;;  %vm5848_vm4 = vmmov %vm5844_vm3 }
 0x276   : > { %v1977_v37 = vpop.permute.xlu0 %1976  ;;  %2990 = vmatpush1.bf16.msra.mxu0 %v1921_v26 }
 0x277   : > { %v1991_v25 = vsel %vm5843_vm7, %v1977_v37, %v1979_v12  ;;  %v2047_v27 = vpop.permute.xlu1 %2046  ;;  %s5847_s8 = smov %s5846_s14  ;;  %v2735_v54 = vld [vmem:[%s5846_s14] sm:$0xff]  ;;  %vm5852_vm7 = vmmov %vm5848_vm4 }
 0x278   : > { %3078 = vmatpush1.bf16.msra.mxu1 %v1991_v25  ;;  %v2736_v24 = vld [vmem:[%s5847_s8 + $0x8] sm:$0xff]  ;;  %2739 = vperm.xlu0 %4094, %v2735_v54  }
 0x279   : > { %2744 = vperm.xlu1 %4095, %v2736_v24  }
 0x27a   : > { %v5398_v39 = vpop.permute.xlu0 %2048 }
 0x27b   : > { %v2060_v28 = vsel %vm5844_vm3, %v2047_v27, %v5398_v39  ;;  %v1975_v42 = vpop.permute.xlu1 %1974  ;;  %vm5851_vm3 = vcmask 498688  }
 0x27c   : > { %3079 = vmatprep.subr.bf16.mxu1 %v2060_v28  ;;  %v1989_v15 = vsel %vm5840_vm5, %v4923_v50, %v1975_v42  ;;  %v1990_v38 = vsel %vm5845_vm6, %v1975_v42, %v1977_v37  ;;  %v3495_v50 = vld [vmem:[%s5849_s12 + $0x8] sm:$0xff]  ;;  %vm5853_vm5 = vmmov %vm5848_vm4  ;;  %s3691_s12 = smul.u32 (%p4419_p13), 90, %s5880_s25 }
 0x27d   : > { %2991 = vmatprep.subr.bf16.mxu0 %v1990_v38  ;;  %3503 = vperm.xlu0 %4094, %v3495_v50   ;;  %vm5854_vm6 = vmmov %vm5851_vm3 }
 0x27e   : > { %v2045_v41 = vpop.permute.xlu0 %2044  ;;  %2992 = vmatpush1.bf16.msra.mxu0 %v1989_v15  ;;  %3498 = vperm.xlu1 %4095, %v3494_v9   ;;  %s3692_s18 = sadd.s32 (%p4419_p13), %s3691_s12, %s3690_s19 }
 0x27f   : > { %v2059_v46 = vsel %vm5848_vm4, %v2045_v41, %v2047_v27  ;;  %v2115_v48 = vpop.permute.xlu1 %2114  ;;  %vm5855_vm4 = vcmask 490496   ;;  %s3869_s6 = sshll.u32 (%p4419_p13), %s3692_s18, 3 }
 0x280   : > { %3080 = vmatpush1.bf16.msra.mxu1 %v2059_v46  ;;  %s3694_s20 = scalar_lea.vmem (%p4419_p13), %s5881_s27, %s3869_s6 }
 0x282   : > { %v5415_v34 = vpop.permute.xlu0 %2116 }
 0x283   : > { %v2128_v51 = vsel %vm5851_vm3, %v2115_v48, %v5415_v34  ;;  %v2043_v57 = vpop.permute.xlu1 %2042 }
 0x284   : > { %3081 = vmatprep.subr.bf16.mxu1 %v2128_v51  ;;  %v2057_v58 = vsel %vm5852_vm7, %v4938_v0, %v2043_v57  ;;  %v2058_v60 = vsel %vm5853_vm5, %v2043_v57, %v2045_v41  ;;  %vm5856_vm7 = vmmov %vm5851_vm3 }
 0x285   : > { %2993 = vmatprep.subr.bf16.mxu0 %v2058_v60  ;;  %vm5857_vm5 = vmmov %vm5855_vm4 }
 0x286   : > { %v2113_v33 = vpop.permute.xlu0 %2112  ;;  %2994 = vmatpush1.bf16.msra.mxu0 %v2057_v58 }
 0x287   : > { %v2127_v40 = vsel %vm5854_vm6, %v2113_v33, %v2115_v48  ;;  %v2183_v3 = vpop.permute.xlu1 %2182  ;;  %vm5858_vm6 = vcmask 482304  }
 0x288   : > { %3082 = vmatpush1.bf16.msra.mxu1 %v2127_v40 }
 0x28a   : > { %v5426_v21 = vpop.permute.xlu0 %2184 }
 0x28b   : > { %v2196_v8 = vsel %vm5855_vm4, %v2183_v3, %v5426_v21  ;;  %v2111_v61 = vpop.permute.xlu1 %2110 }
 0x28c   : > { %3083 = vmatprep.subr.bf16.mxu1 %v2196_v8  ;;  %v2125_v7 = vsel %vm5851_vm3, %v4957_v14, %v2111_v61  ;;  %v2126_v0 = vsel %vm5856_vm7, %v2111_v61, %v2113_v33  ;;  %vm5859_vm3 = vmmov %vm5855_vm4 }
 0x28d   : > { %2995 = vmatprep.subr.bf16.mxu0 %v2126_v0  ;;  %vm5860_vm7 = vmmov %vm5858_vm6 }
 0x28e   : > { %v2181_v11 = vpop.permute.xlu0 %2180  ;;  %2996 = vmatpush1.bf16.msra.mxu0 %v2125_v7 }
 0x28f   : > { %v2195_v35 = vsel %vm5857_vm5, %v2181_v11, %v2183_v3  ;;  %v2251_v23 = vpop.permute.xlu1 %2250  ;;  %vm5861_vm5 = vmmov %vm5858_vm6 }
 0x290   : > { %3084 = vmatpush1.bf16.msra.mxu1 %v2195_v35 }
 0x292   : > { %v5434_v12 = vpop.permute.xlu0 %2252 }
 0x293   : > { %v2264_v22 = vsel %vm5858_vm6, %v2251_v23, %v5434_v12  ;;  %v2179_v17 = vpop.permute.xlu1 %2178  ;;  %vm5862_vm6 = vmmov %vm5861_vm5 }
 0x294   : > { %3085 = vmatprep.subr.bf16.mxu1 %v2264_v22  ;;  %v2193_v26 = vsel %vm5855_vm4, %v4972_v31, %v2179_v17  ;;  %v2194_v14 = vsel %vm5859_vm3, %v2179_v17, %v2181_v11  ;;  %vm5864_vm4 = vcmask 891904  }
 0x295   : > { %2997 = vmatprep.subr.bf16.mxu0 %v2194_v14 }
 0x296   : > { %v2249_v52 = vpop.permute.xlu0 %2248  ;;  %2998 = vmatpush1.bf16.msra.mxu0 %v2193_v26 }
 0x297   : > { %v2263_v37 = vsel %vm5860_vm7, %v2249_v52, %v2251_v23  ;;  %v2319_v25 = vpop.permute.xlu1 %2318  ;;  %vm5872_vm7 = vcmask 547840  }
 0x298   : > { %3086 = vmatpush1.bf16.msra.mxu1 %v2263_v37 }
 0x29a   : > { %v5442_v27 = vpop.permute.xlu0 %2320 }
 0x29b   : > { %v2332_v28 = vsel %vm2324_vm14, %v2319_v25, %v5442_v27  ;;  %v2247_v42 = vpop.permute.xlu1 %2246 }
 0x29c   : > { %3087 = vmatprep.subr.bf16.mxu1 %v2332_v28  ;;  %v2261_v15 = vsel %vm5861_vm5, %v4994_v49, %v2247_v42  ;;  %v2262_v31 = vsel %vm5862_vm6, %v2247_v42, %v2249_v52  ;;  %vm5873_vm5 = vcmask 1039360  }
 0x29d   : > { %2999 = vmatprep.subr.bf16.mxu0 %v2262_v31 }
 0x29e   : > { %v2317_v38 = vpop.permute.xlu0 %2316  ;;  %3000 = vmatpush1.bf16.msra.mxu0 %v2261_v15 }
 0x29f   : > { %v2331_v41 = vsel %vm2324_vm14, %v2317_v38, %v2319_v25  ;;  %v2387_v54 = vpop.permute.xlu1 %2386 }
 0x2a0   : > { %3088 = vmatpush1.bf16.msra.mxu1 %v2331_v41 }
 0x2a2   : > { %v5450_v24 = vpop.permute.xlu0 %2388 }
 0x2a3   : > { %v2400_v46 = vsel %vm2392_vm12, %v2387_v54, %v5450_v24  ;;  %v2315_v50 = vpop.permute.xlu1 %2314 }
 0x2a4   : > { %3089 = vmatprep.subr.bf16.mxu1 %v2400_v46  ;;  %v2329_v48 = vsel %vm2324_vm14, %v5009_v62, %v2315_v50  ;;  %v2330_v49 = vsel %vm2324_vm14, %v2315_v50, %v2317_v38 }
 0x2a5   : > { %3001 = vmatprep.subr.bf16.mxu0 %v2330_v49 }
 0x2a6   : > { %v2385_v9 = vpop.permute.xlu0 %2384  ;;  %3002 = vmatpush1.bf16.msra.mxu0 %v2329_v48 }
 0x2a7   : > { %v2399_v51 = vsel %vm2392_vm12, %v2385_v9, %v2387_v54  ;;  %v2455_v57 = vpop.permute.xlu1 %2454 }
 0x2a8   : > { %3090 = vmatpush1.bf16.msra.mxu1 %v2399_v51 }
 0x2aa   : > { %v5458_v58 = vpop.permute.xlu0 %2456 }
 0x2ab   : > { %v2468_v60 = vsel %vm2460_vm13, %v2455_v57, %v5458_v58  ;;  %v2383_v33 = vpop.permute.xlu1 %2382 }
 0x2ac   : > { %3091 = vmatprep.subr.bf16.mxu1 %v2468_v60  ;;  %v2397_v40 = vsel %vm2392_vm12, %v5028_v13, %v2383_v33  ;;  %v2398_v62 = vsel %vm2392_vm12, %v2383_v33, %v2385_v9  ;;  %v4125_v60 = vld [vmem:[%s5368_s0 + $0x4] ss:$36 sps:$4 sm:$0xff]  }
 0x2ad   : > { %3003 = vmatprep.subr.bf16.mxu0 %v2398_v62  ;;  %v4123_v62 = vld [vmem:[%s5368_s0] ss:$36 sps:$4 sm:$0xff]  }
 0x2ae   : > { %v2453_v3 = vpop.permute.xlu0 %2452  ;;  %3004 = vmatpush1.bf16.msra.mxu0 %v2397_v40 }
 0x2af   : > { %v2467_v8 = vsel %vm2460_vm13, %v2453_v3, %v2455_v57  ;;  %v1779_v61 = vpop.permute.xlu1 %1778 }
 0x2b0   : > { %3092 = vmatpush1.bf16.msra.mxu1 %v2467_v8  ;;  %v1789_v0 = vsel %vm1780_vm15, %v5331_v45, %v1779_v61  ;;  %v4140_v45 = vld [vmem:[%s5703_s4 + $0xc] ss:$16 sps:$4 sm:$0xff]   ;;  %vm5863_vm15 = vcmask 392192  }
 0x2b1   : > { %3155 = vmatprep.subr.bf16.mxu1 %v4258_v29  ;;  %v4129_v8 = vld [vmem:[%s5368_s0 + $0xc] ss:$36 sps:$4 sm:$0xff]  }
 0x2b2   : > { %v2451_v7 = vpop.permute.xlu0 %2450 }
 0x2b3   : > { %v2465_v11 = vsel %vm2460_vm13, %v5043_v32, %v2451_v7  ;;  %v2466_v13 = vsel %vm2460_vm13, %v2451_v7, %v2453_v3  ;;  %3104 = vmatmul.mubr.bf16.vlgmr.msra.gmra.mrb[4].mxu1 %v5063_v47  ;;  %v1285_v35 = vpop.permute.xlu1 %1284  ;;  %v4132_v3 = vld [vmem:[%s5368_s0 + $0x14] ss:$36 sps:$4 sm:$0xff]   ;;  %v4135_v7 = vld [vmem:[%s5368_s0 + $0x1c] ss:$36 sps:$4 sm:$0xff]  }
 0x2b4   : > { %3005 = vmatprep.subr.bf16.mxu0 %v2466_v13  ;;  %3156 = vmatpush1.bf16.msra.mxu1 %v1789_v0  ;;  %v1295_v22 = vsel %vm1286_vm8, %v5207_v53, %v1285_v35  ;;  %v4141_v53 = vld [vmem:[%s5703_s4 + $0x4] ss:$16 sps:$4 sm:$0xff]   ;;  %vm5865_vm8 = vcmask 646144   ;;  %v4259_v35 = vmov 0.0  }
 0x2b5   : > { %3006 = vmatpush1.bf16.msra.mxu0 %v2465_v11  ;;  %3157 = vmatprep.subr.bf16.mxu1 %v4258_v29  ;;  %v4126_v0 = vld [vmem:[%s5877_s2] sm:$0xff]   ;;  %v4143_v11 = vld [vmem:[%s5703_s4 + $0x8] ss:$16 sps:$4 sm:$0xff]  }
 0x2b6   : > { %v1847_v23 = vpop.permute.xlu0 %1846  ;;  %3853 = vmatprep.mubr.msk.bf16.mxu1 %vm5863_vm15, %v4140_v45  ;;  %3890 = vmatprep.subr.bf16.mxu0 %v1295_v22  ;;  %vm5874_vm15 = vcmask 416768   ;;  %v4133_v13 = vld [vmem:[%s5368_s0 + $0x18] ss:$36 sps:$4 sm:$0xff]  }
 0x2b7   : > { %v1857_v32 = vsel %vm5864_vm4, %v5350_v30, %v1847_v23  ;;  %v741_v17 = vpop.permute.xlu1 %740  ;;  %vm5875_vm4 = vcmask 908288   ;;  %v4136_v23 = vld [vmem:[%s5368_s0 + $0x20] ss:$36 sps:$4 sm:$0xff]  }
 0x2b8   : > { %3158 = vmatpush1.bf16.msra.mxu1 %v1857_v32  ;;  %3018 = vmatmul.mubr.bf16.vlgmr.msra.gmra.mrb[4].mxu0 %v5063_v47  ;;  %v751_v26 = vsel %vm742_vm0, %v5071_v55, %v741_v17  ;;  %vm5866_vm0 = vcmask 637952  }
 0x2b9   : > { %3159 = vmatprep.subr.bf16.mxu1 %v4258_v29  ;;  %3146 = vmatprep.mubr.bf16.mxu0 %v4141_v53 }
 0x2ba   : > { %v1353_v14 = vpop.permute.xlu0 %1352  ;;  %3891 = vmatpush3.bf16.msra.mxu0 %v751_v26 }
 0x2bb   : > { %v1363_v30 = vsel %vm1354_vm9, %v5223_v1, %v1353_v14  ;;  %v1915_v52 = vpop.permute.xlu1 %1914  ;;  %vm5868_vm9 = vcmask 564224  }
 0x2bc   : > { %3892 = vmatprep.subr.bf16.mxu0 %v1363_v30  ;;  %v1925_v47 = vsel %vm5865_vm8, %v5372_v5, %v1915_v52  ;;  %vm5876_vm8 = vcmask 408576  }
 0x2bd   : > { %3160 = vmatpush1.bf16.msra.mxu1 %v1925_v47 }
 0x2be   : > { %v809_v37 = vpop.permute.xlu0 %808  ;;  %3161 = vmatprep.subr.bf16.mxu1 %v4258_v29 }
 0x2bf   : > { %v819_v25 = vsel %vm810_vm1, %v5087_v4, %v809_v37  ;;  %v1421_v28 = vpop.permute.xlu1 %1420  ;;  %vm5867_vm1 = vcmask 629760  }
 0x2c0   : > { %3893 = vmatpush3.bf16.msra.mxu0 %v819_v25  ;;  %v1431_v55 = vsel %vm1422_vm10, %v5239_v19, %v1421_v28  ;;  %vm5870_vm10 = vcmask 498688  }
 0x2c1   : > { %3894 = vmatprep.subr.bf16.mxu0 %v1431_v55 }
 0x2c2   : > { %v1983_v42 = vpop.permute.xlu0 %1982 }
 0x2c3   : > { %v1993_v1 = vsel %vm5866_vm0, %v5388_v44, %v1983_v42  ;;  %v877_v15 = vpop.permute.xlu1 %876 }
 0x2c4   : > { %3162 = vmatpush1.bf16.msra.mxu1 %v1993_v1  ;;  %v887_v5 = vsel %vm878_vm2, %v5105_v59, %v877_v15  ;;  %vm5869_vm2 = vcmask 7168  }
 0x2c5   : > { %3163 = vmatprep.subr.bf16.mxu1 %v4258_v29  ;;  %3895 = vmatpush3.bf16.msra.mxu0 %v887_v5 }
 0x2c6   : > { %v1489_v4 = vpop.permute.xlu0 %1488 }
 0x2c7   : > { %v1499_v31 = vsel %vm1490_vm11, %v5257_v63, %v1489_v4  ;;  %v2051_v38 = vpop.permute.xlu1 %2050  ;;  %vm5871_vm11 = vcmask 556032  }
 0x2c8   : > { %3896 = vmatprep.subr.bf16.mxu0 %v1499_v31  ;;  %v2061_v19 = vsel %vm5867_vm1, %v5398_v39, %v2051_v38 }
 0x2c9   : > { %3164 = vmatpush1.bf16.msra.mxu1 %v2061_v19 }
 0x2ca   : > { %v945_v41 = vpop.permute.xlu0 %944  ;;  %3165 = vmatprep.subr.bf16.mxu1 %v4258_v29 }
 0x2cb   : > { %v955_v44 = vsel %vm5868_vm9, %v5127_v43, %v945_v41  ;;  %v1557_v54 = vpop.permute.xlu1 %1556 }
 0x2cc   : > { %3897 = vmatpush3.bf16.msra.mxu0 %v955_v44  ;;  %v1567_v59 = vsel %vm5869_vm2, %v5273_v16, %v1557_v54 }
 0x2cd   : > { %3898 = vmatprep.subr.bf16.mxu0 %v1567_v59 }
 0x2ce   : > { %v2119_v46 = vpop.permute.xlu0 %2118 }
 0x2cf   : > { %v2129_v63 = vsel %vm5870_vm10, %v5415_v34, %v2119_v46  ;;  %v1013_v50 = vpop.permute.xlu1 %1012 }
 0x2d0   : > { %3166 = vmatpush1.bf16.msra.mxu1 %v2129_v63  ;;  %v1023_v39 = vsel %vm5871_vm11, %v5143_v56, %v1013_v50 }
 0x2d1   : > { %3167 = vmatprep.subr.bf16.mxu1 %v4258_v29  ;;  %3899 = vmatpush3.bf16.msra.mxu0 %v1023_v39 }
 0x2d2   : > { %v2187_v43 = vpop.permute.xlu0 %2186  ;;  %3900 = vmatprep.subr.bf16.mxu0 %v5048_v36 }
 0x2d3   : > { %v2197_v48 = vsel %vm5859_vm3, %v5426_v21, %v2187_v43  ;;  %v1081_v16 = vpop.permute.xlu1 %1080 }
 0x2d4   : > { %3168 = vmatpush1.bf16.msra.mxu1 %v2197_v48  ;;  %v1091_v34 = vsel %vm5872_vm7, %v5159_v2, %v1081_v16 }
 0x2d5   : > { %3169 = vmatprep.subr.bf16.mxu1 %v4258_v29  ;;  %3901 = vmatpush3.bf16.msra.mxu0 %v1091_v34 }
 0x2d6   : > { %v1643_v49 = vpop.permute.xlu0 %1642 }
 0x2d7   : > { %v1653_v56 = vsel %vm5873_vm5, %v5303_v10, %v1643_v49  ;;  %v2255_v9 = vpop.permute.xlu1 %2254 }
 0x2d8   : > { %3902 = vmatprep.subr.bf16.mxu0 %v1653_v56  ;;  %v2265_v21 = vsel %vm5862_vm6, %v5434_v12, %v2255_v9 }
 0x2d9   : > { %3170 = vmatpush1.bf16.msra.mxu1 %v2265_v21 }
 0x2da   : > { %v1149_v51 = vpop.permute.xlu0 %1148  ;;  %3171 = vmatprep.subr.bf16.mxu1 %v4258_v29 }
 0x2db   : > { %v1159_v36 = vsel %vm5874_vm15, %v5175_v20, %v1149_v51  ;;  %v1711_v2 = vpop.permute.xlu1 %1710 }
 0x2dc   : > { %3903 = vmatpush3.bf16.msra.mxu0 %v1159_v36  ;;  %v1721_v57 = vsel %vm5875_vm4, %v5315_v6, %v1711_v2 }
 0x2dd   : > { %3904 = vmatprep.subr.bf16.mxu0 %v1721_v57 }
 0x2de   : > { %v2323_v10 = vpop.permute.xlu0 %2322 }
 0x2df   : > { %v2333_v12 = vsel %vm2324_vm14, %v5442_v27, %v2323_v10  ;;  %v1217_v33 = vpop.permute.xlu1 %1216 }
 0x2e0   : > { %3172 = vmatpush1.bf16.msra.mxu1 %v2333_v12  ;;  %v1227_v20 = vsel %vm5876_vm8, %v5191_v18, %v1217_v33  ;;  %v4142_v18 = vld [vmem:[%s5703_s4] ss:$16 sps:$4 sm:$0xff]  }
 0x2e1   : > { %3173 = vmatprep.subr.bf16.mxu1 %v4258_v29  ;;  %3905 = vmatpush3.bf16.msra.mxu0 %v1227_v20 }
 0x2e2   : > { %v2391_v40 = vpop.permute.xlu0 %2390  ;;  %3263 = vmatprep.subr.bf16.mxu0 %v4125_v60 }
 0x2e3   : > { %v2401_v6 = vsel %vm2392_vm12, %v5450_v24, %v2391_v40  ;;  %v2459_v27 = vpop.permute.xlu1 %2458  ;;  %v4127_v24 = vld [vmem:[%s5368_s0 + $0x8] ss:$36 sps:$4 sm:$0xff]   ;;  %vm3259_vm12 = vcmask 130048  }
 0x2e4   : > { %3174 = vmatpush1.bf16.msra.mxu1 %v2401_v6  ;;  %3147 = vmatmul.mubr.bf16.vlgmr.msra.gmra.mrb[8].mxu0 %v4142_v18  ;;  %v2469_v61 = vsel %vm2460_vm13, %v5458_v58, %v2459_v27  ;;  %v4130_v58 = vld [vmem:[%s5368_s0 + $0x10] ss:$36 sps:$4 sm:$0xff]   ;;  %vm4260_vm13 = vmmov 0   ;;  %s5878_s0 = sand.u32 1, %s4198_s29  }
 0x2e5   : > { %3175 = vmatprep.subr.bf16.mxu1 %v4258_v29  ;;  %3264 = vmatpush1.bf16.msra.mxu0 %v4123_v62  ;;  %s3976_s11 = smul.u32 144, %s5878_s0 }
 0x2e6   : > { %3295 = vmatprep.mubr.bf16.mxu0 %v4258_v29  ;;  %3349 = vmatprep.subr.bf16.mxu0 %v4132_v3 }
 0x2e7   : > { %s5594_s29 = scalar_lea.vmem [#allocation8], %s3976_s11 }
 0x2e8   : > { %3176 = vmatpush1.bf16.msra.mxu1 %v2469_v61 }
 0x2e9   : > { %3306 = vmatprep.subr.bf16.mxu1 %v4129_v8 }
 0x2eb   : > { %3188 = vmatmul.mubr.bf16.vlgmr.msra.gmra.mrb[8].mxu1 %v4143_v11 }
 0x2ec   : > { %3307 = vmatpush1.bf16.msra.mxu1 %v4127_v24  ;;  %3338 = vmatprep.mubr.bf16.mxu1 %v4258_v29 }
 0x2ed   : > { %3392 = vmatprep.subr.bf16.mxu1 %v4135_v7  ;;  %3864 = vmatmul.mubr.msk.bf16.vlgmr.msra.gmra.mrb[0].mxu0 %vm3259_vm12, %v4126_v0 }
 0x2ee   : > { %3350 = vmatpush1.bf16.msra.mxu0 %v4130_v58  ;;  %3381 = vmatprep.mubr.bf16.mxu0 %v4258_v29 }
 0x2ef   : > { %3914 = vmatprep.subr.bf16.mxu0 %v4259_v35 }
 0x2f3   : > { %3865 = vmatmul.mubr.msk.bf16.vlgmr.msra.gmra.mrb[0].mxu1 %vm3259_vm12, %v4126_v0 }
 0x2f4   : > { %3393 = vmatpush1.bf16.msra.mxu1 %v4133_v13  ;;  %3424 = vmatprep.mubr.bf16.mxu1 %v4258_v29 }
 0x2f5   : > { %3866 = vmatmul.mubr.msk.bf16.vlgmr.msra.gmra.mrb[4].mxu0 %vm3259_vm12, %v4126_v0 }
 0x2f6   : > { %3915 = vmatpush3.bf16.msra.mxu0 %v4136_v23  ;;  %3916 = vmatprep.mubr.msk.bf16.mxu0 %vm4260_vm13, %v4259_v35 }
 0x2f7   : > { %v5569_v45 = vpop.permute.xlu0 %2739 }
 0x2f8   : > { %v5571_v17 = vpop.permute.xlu1 %2744 }
 0x2fb   : > { %3867 = vmatmul.mubr.msk.bf16.vlgmr.msra.gmra.mrb[4].mxu1 %vm3259_vm12, %v4126_v0 }
 0x2fc   : > { %v5585_v19 = vpop.permute.xlu0 %3503 }
 0x2fd   : > { %3917 = vmatmul.mubr.msk.bf16.vlgmr.msra.gmra.mrb[12].mxu0 %vm3259_vm12, %v4126_v0  ;;  %v5577_v55 = vpop.permute.xlu1 %3498 }
 0x3b7   : > { %v3906_v22 = vpop.f32.mrb[8].mxu0 }
 0x3b8   : > { %v3907_v32 = vpop.f32.mrb[9].mxu0 }
 0x3b9   : > { %v3908_v53 = vadd.f32 %v3907_v32, %v3906_v22  ;;  %v3909_v26 = vpop.f32.mrb[10].mxu0 }
 0x3ba   : > { %v3910_v14 = vpop.f32.mrb[11].mxu0 }
 0x3bb   : > { %v3911_v29 = vadd.f32 %v3910_v14, %v3909_v26  ;;  %v3149_v30 = vadd.f32 %v3908_v53, %v5569_v45 }
 0x3bd   : > { %v3152_v25 = vadd.f32 %v3911_v29, %v5571_v17 }
 0x3be   : > { %v3189_v52 = vpop.f32.mrb[8].mxu1 }
 0x3bf   : > { %v5574_v47 = vadd.f32 %v3189_v52, %v3149_v30  ;;  %v3191_v37 = vpop.f32.mrb[9].mxu1 }
 0x3c0   : > { %v3192_v28 = vpop.f32.mrb[10].mxu1  ;;  %v3297_v42 = vpop.f32.mrb[0].mxu0 }
 0x3c1   : > { %v5579_v1 = vadd.f32 %v3192_v28, %v3152_v25  ;;  %v3194_v15 = vpop.f32.mrb[11].mxu1  ;;  %v3920_v5 = vadd.f32 %v3297_v42, %v5569_v45  ;;  %v3299_v4 = vpop.f32.mrb[1].mxu0 }
 0x3c2   : > { %v3921_v31 = vadd.f32 %v3299_v4, %v5569_v45  ;;  %v3301_v38 = vpop.f32.mrb[2].mxu0 }
 0x3c3   : > { %v3922_v41 = vadd.f32 %v3301_v38, %v5571_v17  ;;  %v3506_v44 = vadd.f32 %v3920_v5, %v5577_v55  ;;  %v3303_v54 = vpop.f32.mrb[3].mxu0 }
 0x3c4   : > { %v3507_v59 = vadd.f32 %v3921_v31, %v5577_v55  ;;  %v3923_v46 = vadd.f32 %v3303_v54, %v5571_v17 }
 0x3c5   : > { %v3524_v63 = vmax.f32 %v3506_v44, 0.0  ;;  %v3515_v50 = vadd.f32 %v3922_v41, %v5585_v19 }
 0x3c6   : > { %v3340_v39 = vpop.f32.mrb[0].mxu1  ;;  %v3525_v43 = vmax.f32 %v3507_v59, 0.0  ;;  %v3516_v48 = vadd.f32 %v3923_v46, %v5585_v19 }
 0x3c7   : > { %v3924_v16 = vadd.f32 %v3340_v39, %v5569_v45  ;;  %v3342_v34 = vpop.f32.mrb[1].mxu1  ;;  %3542 = vst [vmem:[%s5594_s29] sm:$0xff] %v3524_v63  ;;  %v3533_v49 = vmax.f32 %v3515_v50, 0.0 }
 0x3c8   : > { %v3925_v56 = vadd.f32 %v3342_v34, %v5569_v45  ;;  %v3344_v9 = vpop.f32.mrb[2].mxu1  ;;  %3543 = vst [vmem:[%s5594_s29 + $0x8] sm:$0xff] %v3525_v43  ;;  %v3534_v21 = vmax.f32 %v3516_v48, 0.0  ;;  %v3383_v36 = vpop.f32.mrb[4].mxu0 }
 0x3c9   : > { %v3508_v51 = vadd.f32 %v3924_v16, %v5577_v55  ;;  %v3926_v2 = vadd.f32 %v3344_v9, %v5571_v17  ;;  %v3346_v57 = vpop.f32.mrb[3].mxu1  ;;  %3551 = vst [vmem:[%s5594_s29 + $0x48] sm:$0xff] %v3533_v49  ;;  %v3928_v10 = vadd.f32 %v3383_v36, %v5569_v45  ;;  %v3385_v60 = vpop.f32.mrb[5].mxu0 }
 0x3ca   : > { %v3509_v12 = vadd.f32 %v3925_v56, %v5577_v55  ;;  %v3927_v33 = vadd.f32 %v3346_v57, %v5571_v17  ;;  %3552 = vst [vmem:[%s5594_s29 + $0x50] sm:$0xff] %v3534_v21  ;;  %v3929_v40 = vadd.f32 %v3385_v60, %v5569_v45  ;;  %v3387_v62 = vpop.f32.mrb[6].mxu0 }
 0x3cb   : > { %v3526_v20 = vmax.f32 %v3508_v51, 0.0  ;;  %v3517_v6 = vadd.f32 %v3926_v2, %v5585_v19  ;;  %v3510_v3 = vadd.f32 %v3928_v10, %v5577_v55  ;;  %v3930_v8 = vadd.f32 %v3387_v62, %v5571_v17  ;;  %v3389_v61 = vpop.f32.mrb[7].mxu0 }
 0x3cc   : > { %v3527_v27 = vmax.f32 %v3509_v12, 0.0  ;;  %v3518_v18 = vadd.f32 %v3927_v33, %v5585_v19  ;;  %v3511_v24 = vadd.f32 %v3929_v40, %v5577_v55  ;;  %v3931_v0 = vadd.f32 %v3389_v61, %v5571_v17 }
 0x3cd   : > { %3544 = vst [vmem:[%s5594_s29 + $0x10] sm:$0xff] %v3526_v20  ;;  %v3535_v7 = vmax.f32 %v3517_v6, 0.0  ;;  %v3528_v11 = vmax.f32 %v3510_v3, 0.0  ;;  %v3519_v58 = vadd.f32 %v3930_v8, %v5585_v19 }
 0x3ce   : > { %3545 = vst [vmem:[%s5594_s29 + $0x18] sm:$0xff] %v3527_v27  ;;  %v3536_v13 = vmax.f32 %v3518_v18, 0.0  ;;  %v3426_v35 = vpop.f32.mrb[4].mxu1  ;;  %v3529_v23 = vmax.f32 %v3511_v24, 0.0  ;;  %v3520_v22 = vadd.f32 %v3931_v0, %v5585_v19 }
 0x3cf   : > { %3553 = vst [vmem:[%s5594_s29 + $0x58] sm:$0xff] %v3535_v7  ;;  %v3932_v32 = vadd.f32 %v3426_v35, %v5569_v45  ;;  %v3428_v53 = vpop.f32.mrb[5].mxu1  ;;  %3546 = vst [vmem:[%s5594_s29 + $0x20] sm:$0xff] %v3528_v11  ;;  %v3537_v26 = vmax.f32 %v3519_v58, 0.0 }
 0x3d0   : > { %3554 = vst [vmem:[%s5594_s29 + $0x60] sm:$0xff] %v3536_v13  ;;  %v3933_v14 = vadd.f32 %v3428_v53, %v5569_v45  ;;  %v3430_v29 = vpop.f32.mrb[6].mxu1  ;;  %3547 = vst [vmem:[%s5594_s29 + $0x28] sm:$0xff] %v3529_v23  ;;  %v3538_v30 = vmax.f32 %v3520_v22, 0.0  ;;  %v3469_v37 = vpop.f32.mrb[12].mxu0  ;;  %v3603_v9 = vld [vmem:[%s5594_s29 + $0x48] sm:$0xff] (%p4419_p13) }
 0x3d1   : > { %v3512_v52 = vadd.f32 %v3932_v32, %v5577_v55  ;;  %v3934_v25 = vadd.f32 %v3430_v29, %v5571_v17  ;;  %v3432_v28 = vpop.f32.mrb[7].mxu1  ;;  %3555 = vst [vmem:[%s5594_s29 + $0x68] sm:$0xff] %v3537_v26  ;;  %v3484_v42 = vadd.f32 %v3469_v37, %v5574_v47  ;;  %v3918_v5 = vpop.f32.mrb[13].mxu0  ;;  %v3605_v21 = vld [vmem:[%s5594_s29 + $0x50] sm:$0xff] (%p4419_p13)  ;;  %3879 = vst [vmem:[%s3694_s20 + $0x1b0] sm:$0xff] (%p4419_p13), %v3603_v9 }
 0x3d2   : > { %v3513_v15 = vadd.f32 %v3933_v14, %v5577_v55  ;;  %v3935_v4 = vadd.f32 %v3432_v28, %v5571_v17  ;;  %3556 = vst [vmem:[%s5594_s29 + $0x70] sm:$0xff] %v3538_v30  ;;  %v3472_v38 = vpop.f32.mrb[14].mxu0  ;;  %3880 = vst [vmem:[%s3694_s20 + $0x1b8] sm:$0xff] (%p4419_p13), %v3605_v21 }
 0x3d3   : > { %v3530_v45 = vmax.f32 %v3512_v52, 0.0  ;;  %v3521_v31 = vadd.f32 %v3934_v25, %v5585_v19  ;;  %v3514_v41 = vadd.f32 %v5577_v55, %v3484_v42  ;;  %v3493_v47 = vadd.f32 %v3472_v38, %v5579_v1  ;;  %v3919_v59 = vpop.f32.mrb[15].mxu0  ;;  %3566 = sbr.rel (!%p4419_p13) target bundleno = 994 (0x3e2), region = 160  ;;  %v3585_v55 = vld [vmem:[%s5594_s29] sm:$0xff] (%p4419_p13)  ;;  %v3587_v1 = vld [vmem:[%s5594_s29 + $0x8] sm:$0xff] (%p4419_p13) }
 0x3d4   : > { %v3531_v44 = vmax.f32 %v3513_v15, 0.0  ;;  %v3522_v54 = vadd.f32 %v3935_v4, %v5585_v19  ;;  %3870 = vst [vmem:[%s3694_s20 + $0x48] sm:$0xff] (%p4419_p13), %v3585_v55  ;;  %3871 = vst [vmem:[%s3694_s20 + $0x50] sm:$0xff] (%p4419_p13), %v3587_v1 }
 0x3d5   : > { %3548 = vst [vmem:[%s5594_s29 + $0x30] sm:$0xff] %v3530_v45  ;;  %v3539_v46 = vmax.f32 %v3521_v31, 0.0  ;;  %v3532_v17 = vmax.f32 %v3514_v41, 0.0  ;;  %v3523_v63 = vadd.f32 %v5585_v19, %v3493_v47  ;;  %v3589_v19 = vld [vmem:[%s5594_s29 + $0x10] sm:$0xff] (%p4419_p13)  ;;  %v3591_v43 = vld [vmem:[%s5594_s29 + $0x18] sm:$0xff] (%p4419_p13) }
 0x3d6   : > { %3549 = vst [vmem:[%s5594_s29 + $0x38] sm:$0xff] %v3531_v44  ;;  %v3540_v50 = vmax.f32 %v3522_v54, 0.0  ;;  %v3593_v48 = vld [vmem:[%s5594_s29 + $0x20] sm:$0xff] (%p4419_p13)  ;;  %v3607_v51 = vld [vmem:[%s5594_s29 + $0x58] sm:$0xff] (%p4419_p13)  ;;  %3872 = vst [vmem:[%s3694_s20 + $0x58] sm:$0xff] (%p4419_p13), %v3589_v19 }
 0x3d7   : > { %3557 = vst [vmem:[%s5594_s29 + $0x78] sm:$0xff] %v3539_v46  ;;  %3550 = vst [vmem:[%s5594_s29 + $0x40] sm:$0xff] %v3532_v17  ;;  %v3541_v39 = vmax.f32 %v3523_v63, 0.0  ;;  %v3595_v16 = vld [vmem:[%s5594_s29 + $0x28] sm:$0xff] (%p4419_p13)  ;;  %v3609_v36 = vld [vmem:[%s5594_s29 + $0x60] sm:$0xff] (%p4419_p13) }
 0x3d8   : > { %3558 = vst [vmem:[%s5594_s29 + $0x80] sm:$0xff] %v3540_v50  ;;  %v3611_v2 = vld [vmem:[%s5594_s29 + $0x68] sm:$0xff] (%p4419_p13)  ;;  %3873 = vst [vmem:[%s3694_s20 + $0x60] sm:$0xff] (%p4419_p13), %v3591_v43 }
 0x3d9   : > { %3559 = vst [vmem:[%s5594_s29 + $0x88] sm:$0xff] %v3541_v39  ;;  %v3613_v57 = vld [vmem:[%s5594_s29 + $0x70] sm:$0xff] (%p4419_p13)  ;;  %3874 = vst [vmem:[%s3694_s20 + $0x68] sm:$0xff] (%p4419_p13), %v3593_v48 }
 0x3da   : > { %3875 = vst [vmem:[%s3694_s20 + $0x70] sm:$0xff] %v3595_v16  ;;  %3881 = vst [vmem:[%s3694_s20 + $0x1c0] sm:$0xff] %v3607_v51 }
 0x3db   : > { %3882 = vst [vmem:[%s3694_s20 + $0x1c8] sm:$0xff] %v3609_v36  ;;  %3883 = vst [vmem:[%s3694_s20 + $0x1d0] sm:$0xff] %v3611_v2 }
 0x3dc   : > { %v3597_v34 = vld [vmem:[%s5594_s29 + $0x30] sm:$0xff]  ;;  %3884 = vst [vmem:[%s3694_s20 + $0x1d8] sm:$0xff] %v3613_v57 }
 0x3dd   : > { %v3599_v49 = vld [vmem:[%s5594_s29 + $0x38] sm:$0xff]  ;;  %3876 = vst [vmem:[%s3694_s20 + $0x78] sm:$0xff] %v3597_v34 }
 0x3de   : > { %v3601_v56 = vld [vmem:[%s5594_s29 + $0x40] sm:$0xff]  ;;  %v3615_v10 = vld [vmem:[%s5594_s29 + $0x78] sm:$0xff]  ;;  %3877 = vst [vmem:[%s3694_s20 + $0x80] sm:$0xff] %v3599_v49 }
 0x3df   : > { %v3617_v12 = vld [vmem:[%s5594_s29 + $0x80] sm:$0xff]  ;;  %3878 = vst [vmem:[%s3694_s20 + $0x88] sm:$0xff] %v3601_v56  ;;  %3885 = vst [vmem:[%s3694_s20 + $0x1e0] sm:$0xff] %v3615_v10 }
 0x3e0   : > { %v3619_v60 = vld [vmem:[%s5594_s29 + $0x88] sm:$0xff]  ;;  %3886 = vst [vmem:[%s3694_s20 + $0x1e8] sm:$0xff] %v3617_v12 }
 0x3e1   : > { %3887 = vst [vmem:[%s3694_s20 + $0x1f0] sm:$0xff] %v3619_v60 }
 0x3e2 PF: > { %s18_s15 = sadd.s32 1, %s4230_s15   ;;  %s5882_s23 = sld [smem:[#allocation14_spill]] }
 0x3e3   : > { %p15_p4 = scmp.ge.s32.totalorder %s18_s15, 8   ;;  %s5883_s12 = sld [smem:[#allocation11_spill]] }
 0x3e4   : > { %s5884_s17 = sld [smem:[#allocation12_spill]]  ;;  %s5885_s14 = sld [smem:[#allocation13_spill]] }
 0x3e5   : > { %s5886_s27 = smov %s4194_s28  ;;  %s5887_s28 = smov %s4424_s24 }
 0x3e6   : > { %s5888_s29 = smov %s4202_s30  ;;  %s5889_s30 = smov %s4390_s7 }
 0x3e7   : > { %s5890_s9 = smov %s4210_s10  ;;  %s5892_s11 = smov %s4222_s13 }
 0x3e8   : > { %s5891_s10 = smov %s5882_s23  ;;  %17 = sbr.rel (!%p15_p4) target bundleno = 15 (0xf), region = 262 }
 0x3ea   : > { %s5893_s13 = smov %s5884_s17 }

</bundles_post_ra>
